<compile_context>
chip_gen: v6e
topology: v6e:2x2x1
jax: 0.10.0
libtpu: 0.0.40
codegen_flags: <defaults>
</compile_context>

<pallas_src>
import functools
import math

import jax
import jax.numpy as jnp
from jax.experimental import pallas as pl
from jax.experimental.pallas import tpu as pltpu

LN_EPS = 1e-5  # GPT2Config.layer_norm_epsilon


def _layernorm(x, g, b):
    mu = jnp.mean(x, axis=-1, keepdims=True)
    var = jnp.mean((x - mu) ** 2, axis=-1, keepdims=True)
    return (x - mu) * jax.lax.rsqrt(var + LN_EPS) * g + b


def _gelu_new(x):
    # GPT2 "gelu_new" (tanh approximation).
    c = math.sqrt(2.0 / math.pi)
    return 0.5 * x * (1.0 + jnp.tanh(c * (x + 0.044715 * x * x * x)))


def _dt_kernel(n_head,
               # data
               ret_ref, st_ref, act_ref, amask_ref,
               # embedding linears + (pos_enc + wpe) rows for the 3 tokens
               ws_ref, bs_ref, wa_ref, ba_ref, wr_ref, br_ref, pe_ref,
               # per-layer stacked transformer weights (leading dim = layer)
               ln1g_ref, ln1b_ref,
               wqkv_ref, bqkv_ref,
               wap_ref, bap_ref,
               ln2g_ref, ln2b_ref, wfc_ref, bfc_ref, wmp_ref, bmp_ref,
               # final layernorm + action predictor head
               lnfg_ref, lnfb_ref, w1_ref, b1_ref, w2_ref, b2_ref,
               # output
               out_ref):
    B = ret_ref.shape[0]
    T, E = pe_ref.shape                       # T == 3 (returns, state, action)
    H = n_head
    Dh = E // H
    L = wqkv_ref.shape[0]
    M = B * T
    scale = 1.0 / math.sqrt(Dh)

    # ---- token embeddings (ReLU linears) + positional encodings --------------
    # Token-type-major row order: rows [0,B)=returns, [B,2B)=states, [2B,3B)=acts.
    pe = pe_ref[...]                                                      # (T, E)
    re = jnp.maximum(ret_ref[...] * wr_ref[...] + br_ref[...], 0.0) + pe[0:1, :]
    se = jnp.maximum(
        jnp.dot(st_ref[...], ws_ref[...], preferred_element_type=jnp.float32)
        + bs_ref[...], 0.0) + pe[1:2, :]
    ae = jnp.maximum(act_ref[...] * wa_ref[...] + ba_ref[...], 0.0) + pe[2:3, :]
    h = jnp.concatenate([re, se, ae], axis=0)                             # (M, E)

    # ---- hoisted constants ----------------------------------------------------
    amask = amask_ref[...]                               # (M, M) additive 0/-1e9
    lane = jax.lax.broadcasted_iota(jnp.int32, (1, E), 1)
    head_masks = [((lane >= hh * Dh) & (lane < (hh + 1) * Dh)).astype(jnp.float32)
                  for hh in range(H)]                    # H full-width lane masks

    # ---- GPT2 blocks: statically unrolled layer loop, h kept as (M, E) --------
    for l in range(L):
        # attention
        x = _layernorm(h, ln1g_ref[l], ln1b_ref[l])                       # (M, E)
        qkv = (jnp.dot(x, wqkv_ref[l], preferred_element_type=jnp.float32)
               + bqkv_ref[l])                                             # (M, 3E)
        q = qkv[:, 0:E] * scale            # 1/sqrt(Dh) folded into Q
        k = qkv[:, E:2 * E]
        v = qkv[:, 2 * E:3 * E]

        ctx = jnp.zeros((M, E), jnp.float32)
        for hh in range(H):
            mh = head_masks[hh]
            km = k * mh                    # zero non-head lanes (full-width VPU op)
            s = jnp.einsum('md,nd->mn', q, km,
                           preferred_element_type=jnp.float32) + amask    # (M, M)
            p = jax.nn.softmax(s, axis=-1)
            ctx = ctx + jnp.dot(p, v * mh,
                                preferred_element_type=jnp.float32)       # (M, E)

        attn = (jnp.dot(ctx, wap_ref[l], preferred_element_type=jnp.float32)
                + bap_ref[l])
        h = h + attn

        # MLP
        x = _layernorm(h, ln2g_ref[l], ln2b_ref[l])
        ff = jnp.dot(x, wfc_ref[l], preferred_element_type=jnp.float32) + bfc_ref[l]
        ff = _gelu_new(ff)
        ff = jnp.dot(ff, wmp_ref[l], preferred_element_type=jnp.float32) + bmp_ref[l]
        h = h + ff

    # ---- final layernorm (returns-token rows only) + action predictor --------
    x0 = _layernorm(h[0:B, :], lnfg_ref[...], lnfb_ref[...])              # (B, E)
    y = jnp.maximum(
        jnp.dot(x0, w1_ref[...], preferred_element_type=jnp.float32) + b1_ref[...],
        0.0)
    out_ref[...] = jnp.dot(y, w2_ref[...],
                           preferred_element_type=jnp.float32) + b2_ref[...]


def decision_transformer_forward(params, returns_to_go, states, actions, *, n_head):
    B = states.shape[0]
    E = params['wpe'].shape[-1]
    T = 3                                 # (returns, state, action) tokens
    L = params['w_qkv'].shape[0]
    A = params['w_out2'].shape[-1]
    H = n_head
    M = B * T

    ret = returns_to_go.reshape(B, 1).astype(jnp.float32)
    act = actions.reshape(B, 1).astype(jnp.float32)
    st = states.astype(jnp.float32)
    pe = (params['pos_enc'][0, :T, :] + params['wpe'][:T, :]).astype(jnp.float32)

    # Block-diagonal causal additive mask over token-type-major rows:
    # row i -> token i // B of batch i % B.
    idx = jnp.arange(M)
    tok = idx // B
    bat = idx % B
    allowed = (bat[:, None] == bat[None, :]) & (tok[None, :] <= tok[:, None])
    amask = jnp.where(allowed, 0.0, -1e9).astype(jnp.float32)

    inputs = [
        ret, st, act, amask,
        params['w_state'], params['b_state'],
        params['w_act'], params['b_act'],
        params['w_ret'], params['b_ret'],
        pe,
        params['ln1_g'], params['ln1_b'],
        params['w_qkv'], params['b_qkv'],
        params['w_attn_proj'], params['b_attn_proj'],
        params['ln2_g'], params['ln2_b'],
        params['w_fc'], params['b_fc'],
        params['w_mlp_proj'], params['b_mlp_proj'],
        params['lnf_g'], params['lnf_b'],
        params['w_out1'], params['b_out1'],
        params['w_out2'], params['b_out2'],
    ]

    vmem_spec = pl.BlockSpec(memory_space=pltpu.MemorySpace.VMEM)

    # Advisory cost hint for XLA scheduling around this small custom call.
    flops = (2 * B * st.shape[-1] * E                         # state embedding
             + 2 * L * M * E * (3 * E + E + 8 * E)            # qkv + attn proj + mlp
             + 2 * L * H * (2 * M * M * E)                    # masked scores + ctx
             + 2 * B * (E * E + E * A))                       # predictor head
    transcendentals = L * (H * M * M + M * 4 * E) + M * E
    bytes_accessed = (sum(int(a.size) * a.dtype.itemsize for a in inputs)
                      + B * A * 4)
    cost = pl.CostEstimate(flops=int(flops),
                           transcendentals=int(transcendentals),
                           bytes_accessed=int(bytes_accessed))

    # Explicit VMEM budget: everything (weights + activations) is VMEM-resident.
    vmem_limit = int(min(100 * 2**20, max(32 * 2**20, 4 * bytes_accessed)))

    return pl.pallas_call(
        functools.partial(_dt_kernel, n_head),
        out_shape=jax.ShapeDtypeStruct((B, A), jnp.float32),
        in_specs=[vmem_spec] * len(inputs),
        out_specs=vmem_spec,
        compiler_params=pltpu.CompilerParams(vmem_limit_bytes=vmem_limit),
        cost_estimate=cost,
    )(*inputs)


def reference_forward(params, returns_to_go, states, actions, n_head):
    """Pure-JAX reference mirroring the PyTorch forward (eval mode)."""
    B = states.shape[0]
    E = params['wpe'].shape[-1]
    T = 3
    H = n_head
    Dh = E // H

    re = jax.nn.relu(returns_to_go.reshape(B, 1) @ params['w_ret'] + params['b_ret'])
    se = jax.nn.relu(states @ params['w_state'] + params['b_state'])
    ae = jax.nn.relu(actions.reshape(B, 1) @ params['w_act'] + params['b_act'])
    h = jnp.stack([re, se, ae], axis=1)
    h = h + params['pos_enc'][:, :T, :] + params['wpe'][:T][None]

    L = params['w_qkv'].shape[0]
    mask = jnp.tril(jnp.ones((T, T), bool))
    neg = jnp.finfo(jnp.float32).min
    for l in range(L):
        x = _layernorm(h, params['ln1_g'][l], params['ln1_b'][l]).reshape(B * T, E)
        qkv = x @ params['w_qkv'][l] + params['b_qkv'][l]
        q = qkv[:, :E].reshape(B, T, H, Dh).transpose(0, 2, 1, 3)
        k = qkv[:, E:2 * E].reshape(B, T, H, Dh).transpose(0, 2, 1, 3)
        v = qkv[:, 2 * E:].reshape(B, T, H, Dh).transpose(0, 2, 1, 3)
        s = (q @ jnp.swapaxes(k, -1, -2)) / (Dh ** 0.5)
        s = jnp.where(mask, s, neg)
        p = jax.nn.softmax(s, axis=-1)
        ctx = (p @ v).transpose(0, 2, 1, 3).reshape(B * T, E)
        h = h + (ctx @ params['w_attn_proj'][l] + params['b_attn_proj'][l]).reshape(B, T, E)
        x = _layernorm(h, params['ln2_g'][l], params['ln2_b'][l]).reshape(B * T, E)
        ff = _gelu_new(x @ params['w_fc'][l] + params['b_fc'][l])
        ff = ff @ params['w_mlp_proj'][l] + params['b_mlp_proj'][l]
        h = h + ff.reshape(B, T, E)

    h = _layernorm(h, params['lnf_g'], params['lnf_b'])
    x0 = h[:, 0]
    y = jax.nn.relu(x0 @ params['w_out1'] + params['b_out1'])
    return y @ params['w_out2'] + params['b_out2']


def init_params(key, state_dim, action_dim, context_length, n_layer, n_head, n_embd):
    E = n_embd
    keys = iter(jax.random.split(key, 40))

    def w(shape, scale=0.02):
        return (scale * jax.random.normal(next(keys), shape)).astype(jnp.float32)

    return {
        # DT embedding linears (stored as (in, out) = W^T of nn.Linear)
        'w_state': w((state_dim * context_length, E)), 'b_state': w((1, E)),
        'w_act': w((1, E)), 'b_act': w((1, E)),
        'w_ret': w((1, E)), 'b_ret': w((1, E)),
        # DT learned positional encoding + GPT2 wpe
        'pos_enc': w((1, context_length, E)),
        'wpe': w((context_length, E)),
        # GPT2 blocks (stacked over layers); QKV fused as one (E, 3E) slab
        'ln1_g': jnp.ones((n_layer, 1, E), jnp.float32),
        'ln1_b': jnp.zeros((n_layer, 1, E), jnp.float32),
        'w_qkv': w((n_layer, E, 3 * E)), 'b_qkv': w((n_layer, 1, 3 * E)),
        'w_attn_proj': w((n_layer, E, E)), 'b_attn_proj': w((n_layer, 1, E)),
        'ln2_g': jnp.ones((n_layer, 1, E), jnp.float32),
        'ln2_b': jnp.zeros((n_layer, 1, E), jnp.float32),
        'w_fc': w((n_layer, E, 4 * E)), 'b_fc': w((n_layer, 1, 4 * E)),
        'w_mlp_proj': w((n_layer, 4 * E, E)), 'b_mlp_proj': w((n_layer, 1, E)),
        # final layernorm + action predictor
        'lnf_g': jnp.ones((1, E), jnp.float32),
        'lnf_b': jnp.zeros((1, E), jnp.float32),
        'w_out1': w((E, E)), 'b_out1': w((1, E)),
        'w_out2': w((E, action_dim)), 'b_out2': w((1, action_dim)),
    }


if __name__ == "__main__":
    # small, module-consistent shapes (E lane-aligned; B chosen so M = 3B is a
    # multiple of 8)
    state_dim = 2
    action_dim = 3
    context_length = 5
    batch = 8
    n_layer = 2
    n_head = 4
    n_embd = 128

    key = jax.random.PRNGKey(0)
    kp, kd = jax.random.split(key)
    params = init_params(kp, state_dim, action_dim, context_length,
                         n_layer, n_head, n_embd)

    k1, k2, k3 = jax.random.split(kd, 3)
    states = jax.random.normal(k1, (batch, state_dim * context_length), jnp.float32)
    actions = jax.random.normal(k2, (batch,), jnp.float32)
    returns_to_go = jax.random.normal(k3, (batch,), jnp.float32)

    out = decision_transformer_forward(params, returns_to_go, states, actions,
                                       n_head=n_head)
    out = jax.block_until_ready(out)

    ref = reference_forward(params, returns_to_go, states, actions, n_head)
    assert out.shape == (batch, action_dim)
    assert jnp.allclose(out, ref, atol=2e-3, rtol=2e-3), (out, ref)
    print("KERNEL_OK")
</pallas_src>

<mosaic_0001>
module attributes {stable_mosaic.version = 11 : i64} {
  func.func @_dt_kernel(%arg0: memref<8x1xf32, #tpu.memory_space<vmem>>, %arg1: memref<8x10xf32, #tpu.memory_space<vmem>>, %arg2: memref<8x1xf32, #tpu.memory_space<vmem>>, %arg3: memref<24x24xf32, #tpu.memory_space<vmem>>, %arg4: memref<10x128xf32, #tpu.memory_space<vmem>>, %arg5: memref<1x128xf32, #tpu.memory_space<vmem>>, %arg6: memref<1x128xf32, #tpu.memory_space<vmem>>, %arg7: memref<1x128xf32, #tpu.memory_space<vmem>>, %arg8: memref<1x128xf32, #tpu.memory_space<vmem>>, %arg9: memref<1x128xf32, #tpu.memory_space<vmem>>, %arg10: memref<3x128xf32, #tpu.memory_space<vmem>>, %arg11: memref<2x1x128xf32, #tpu.memory_space<vmem>>, %arg12: memref<2x1x128xf32, #tpu.memory_space<vmem>>, %arg13: memref<2x128x384xf32, #tpu.memory_space<vmem>>, %arg14: memref<2x1x384xf32, #tpu.memory_space<vmem>>, %arg15: memref<2x128x128xf32, #tpu.memory_space<vmem>>, %arg16: memref<2x1x128xf32, #tpu.memory_space<vmem>>, %arg17: memref<2x1x128xf32, #tpu.memory_space<vmem>>, %arg18: memref<2x1x128xf32, #tpu.memory_space<vmem>>, %arg19: memref<2x128x512xf32, #tpu.memory_space<vmem>>, %arg20: memref<2x1x512xf32, #tpu.memory_space<vmem>>, %arg21: memref<2x512x128xf32, #tpu.memory_space<vmem>>, %arg22: memref<2x1x128xf32, #tpu.memory_space<vmem>>, %arg23: memref<1x128xf32, #tpu.memory_space<vmem>>, %arg24: memref<1x128xf32, #tpu.memory_space<vmem>>, %arg25: memref<128x128xf32, #tpu.memory_space<vmem>>, %arg26: memref<1x128xf32, #tpu.memory_space<vmem>>, %arg27: memref<128x3xf32, #tpu.memory_space<vmem>>, %arg28: memref<1x3xf32, #tpu.memory_space<vmem>>, %arg29: memref<8x3xf32, #tpu.memory_space<vmem>>) attributes {dimension_semantics = [], scalar_prefetch = 0 : i64, scratch_operands = 0 : i64, tpu.core_type = #tpu.core_type<tc>} {
    %c0 = arith.constant 0 : index
    %c0_0 = arith.constant 0 : index
    %0 = vector.load %arg10[%c0, %c0_0] : memref<3x128xf32, #tpu.memory_space<vmem>>, vector<3x128xf32>
    %c0_1 = arith.constant 0 : index
    %c0_2 = arith.constant 0 : index
    %1 = vector.load %arg0[%c0_1, %c0_2] : memref<8x1xf32, #tpu.memory_space<vmem>>, vector<8x1xf32>
    %c0_3 = arith.constant 0 : index
    %c0_4 = arith.constant 0 : index
    %2 = vector.load %arg8[%c0_3, %c0_4] : memref<1x128xf32, #tpu.memory_space<vmem>>, vector<1x128xf32>
    %3 = vector.broadcast %1 : vector<8x1xf32> to vector<8x128xf32>
    %4 = vector.broadcast %2 : vector<1x128xf32> to vector<8x128xf32>
    %5 = arith.mulf %3, %4 : vector<8x128xf32>
    %c0_5 = arith.constant 0 : index
    %c0_6 = arith.constant 0 : index
    %6 = vector.load %arg9[%c0_5, %c0_6] : memref<1x128xf32, #tpu.memory_space<vmem>>, vector<1x128xf32>
    %7 = vector.broadcast %6 : vector<1x128xf32> to vector<8x128xf32>
    %8 = arith.addf %5, %7 : vector<8x128xf32>
    %cst = arith.constant 0.000000e+00 : f32
    %9 = vector.broadcast %cst : f32 to vector<8x128xf32>
    %10 = arith.maximumf %8, %9 : vector<8x128xf32>
    %11 = vector.extract_strided_slice %0 {offsets = [0, 0], sizes = [1, 128], strides = [1, 1]} : vector<3x128xf32> to vector<1x128xf32>
    %12 = vector.broadcast %11 : vector<1x128xf32> to vector<8x128xf32>
    %13 = arith.addf %10, %12 : vector<8x128xf32>
    %c0_7 = arith.constant 0 : index
    %c0_8 = arith.constant 0 : index
    %14 = vector.load %arg1[%c0_7, %c0_8] : memref<8x10xf32, #tpu.memory_space<vmem>>, vector<8x10xf32>
    %c0_9 = arith.constant 0 : index
    %c0_10 = arith.constant 0 : index
    %15 = vector.load %arg4[%c0_9, %c0_10] : memref<10x128xf32, #tpu.memory_space<vmem>>, vector<10x128xf32>
    %cst_11 = arith.constant dense<0.000000e+00> : vector<8x128xf32>
    %16 = tpu.matmul %14, %15, %cst_11 {dimension_numbers = #tpu.dot_dimension_numbers<[1], [0], [0], [1], [0, 0, 1, 1], [], []>} : vector<8x10xf32>, vector<10x128xf32>, vector<8x128xf32> -> vector<8x128xf32>
    %c0_12 = arith.constant 0 : index
    %c0_13 = arith.constant 0 : index
    %17 = vector.load %arg5[%c0_12, %c0_13] : memref<1x128xf32, #tpu.memory_space<vmem>>, vector<1x128xf32>
    %18 = vector.broadcast %17 : vector<1x128xf32> to vector<8x128xf32>
    %19 = arith.addf %16, %18 : vector<8x128xf32>
    %cst_14 = arith.constant 0.000000e+00 : f32
    %20 = vector.broadcast %cst_14 : f32 to vector<8x128xf32>
    %21 = arith.maximumf %19, %20 : vector<8x128xf32>
    %22 = vector.extract_strided_slice %0 {offsets = [1, 0], sizes = [1, 128], strides = [1, 1]} : vector<3x128xf32> to vector<1x128xf32>
    %23 = vector.broadcast %22 : vector<1x128xf32> to vector<8x128xf32>
    %24 = arith.addf %21, %23 : vector<8x128xf32>
    %c0_15 = arith.constant 0 : index
    %c0_16 = arith.constant 0 : index
    %25 = vector.load %arg2[%c0_15, %c0_16] : memref<8x1xf32, #tpu.memory_space<vmem>>, vector<8x1xf32>
    %c0_17 = arith.constant 0 : index
    %c0_18 = arith.constant 0 : index
    %26 = vector.load %arg6[%c0_17, %c0_18] : memref<1x128xf32, #tpu.memory_space<vmem>>, vector<1x128xf32>
    %27 = vector.broadcast %25 : vector<8x1xf32> to vector<8x128xf32>
    %28 = vector.broadcast %26 : vector<1x128xf32> to vector<8x128xf32>
    %29 = arith.mulf %27, %28 : vector<8x128xf32>
    %c0_19 = arith.constant 0 : index
    %c0_20 = arith.constant 0 : index
    %30 = vector.load %arg7[%c0_19, %c0_20] : memref<1x128xf32, #tpu.memory_space<vmem>>, vector<1x128xf32>
    %31 = vector.broadcast %30 : vector<1x128xf32> to vector<8x128xf32>
    %32 = arith.addf %29, %31 : vector<8x128xf32>
    %cst_21 = arith.constant 0.000000e+00 : f32
    %33 = vector.broadcast %cst_21 : f32 to vector<8x128xf32>
    %34 = arith.maximumf %32, %33 : vector<8x128xf32>
    %35 = vector.extract_strided_slice %0 {offsets = [2, 0], sizes = [1, 128], strides = [1, 1]} : vector<3x128xf32> to vector<1x128xf32>
    %36 = vector.broadcast %35 : vector<1x128xf32> to vector<8x128xf32>
    %37 = arith.addf %34, %36 : vector<8x128xf32>
    %38 = tpu.concatenate %13, %24, %37 in 0 : vector<8x128xf32>, vector<8x128xf32>, vector<8x128xf32> -> vector<24x128xf32>
    %c0_22 = arith.constant 0 : index
    %c0_23 = arith.constant 0 : index
    %39 = vector.load %arg3[%c0_22, %c0_23] : memref<24x24xf32, #tpu.memory_space<vmem>>, vector<24x24xf32>
    %40 = tpu.iota {dimensions = array<i32: 1>} : vector<1x128xi32>
    %c0_i32 = arith.constant 0 : i32
    %41 = vector.broadcast %c0_i32 : i32 to vector<1x128xi32>
    %42 = arith.cmpi sge, %40, %41 : vector<1x128xi32>
    %c32_i32 = arith.constant 32 : i32
    %43 = vector.broadcast %c32_i32 : i32 to vector<1x128xi32>
    %44 = arith.cmpi slt, %40, %43 : vector<1x128xi32>
    %45 = arith.andi %42, %44 : vector<1x128xi1>
    %46 = arith.extui %45 : vector<1x128xi1> to vector<1x128xi32>
    %47 = arith.sitofp %46 : vector<1x128xi32> to vector<1x128xf32>
    %c32_i32_24 = arith.constant 32 : i32
    %48 = vector.broadcast %c32_i32_24 : i32 to vector<1x128xi32>
    %49 = arith.cmpi sge, %40, %48 : vector<1x128xi32>
    %c64_i32 = arith.constant 64 : i32
    %50 = vector.broadcast %c64_i32 : i32 to vector<1x128xi32>
    %51 = arith.cmpi slt, %40, %50 : vector<1x128xi32>
    %52 = arith.andi %49, %51 : vector<1x128xi1>
    %53 = arith.extui %52 : vector<1x128xi1> to vector<1x128xi32>
    %54 = arith.sitofp %53 : vector<1x128xi32> to vector<1x128xf32>
    %c64_i32_25 = arith.constant 64 : i32
    %55 = vector.broadcast %c64_i32_25 : i32 to vector<1x128xi32>
    %56 = arith.cmpi sge, %40, %55 : vector<1x128xi32>
    %c96_i32 = arith.constant 96 : i32
    %57 = vector.broadcast %c96_i32 : i32 to vector<1x128xi32>
    %58 = arith.cmpi slt, %40, %57 : vector<1x128xi32>
    %59 = arith.andi %56, %58 : vector<1x128xi1>
    %60 = arith.extui %59 : vector<1x128xi1> to vector<1x128xi32>
    %61 = arith.sitofp %60 : vector<1x128xi32> to vector<1x128xf32>
    %c96_i32_26 = arith.constant 96 : i32
    %62 = vector.broadcast %c96_i32_26 : i32 to vector<1x128xi32>
    %63 = arith.cmpi sge, %40, %62 : vector<1x128xi32>
    %c128_i32 = arith.constant 128 : i32
    %64 = vector.broadcast %c128_i32 : i32 to vector<1x128xi32>
    %65 = arith.cmpi slt, %40, %64 : vector<1x128xi32>
    %66 = arith.andi %63, %65 : vector<1x128xi1>
    %67 = arith.extui %66 : vector<1x128xi1> to vector<1x128xi32>
    %68 = arith.sitofp %67 : vector<1x128xi32> to vector<1x128xf32>
    %c0_27 = arith.constant 0 : index
    %c0_28 = arith.constant 0 : index
    %c0_29 = arith.constant 0 : index
    %69 = vector.load %arg11[%c0_27, %c0_28, %c0_29] : memref<2x1x128xf32, #tpu.memory_space<vmem>>, vector<1x1x128xf32>
    %70 = vector.shape_cast %69 : vector<1x1x128xf32> to vector<1x128xf32>
    %c0_30 = arith.constant 0 : index
    %c0_31 = arith.constant 0 : index
    %c0_32 = arith.constant 0 : index
    %71 = vector.load %arg12[%c0_30, %c0_31, %c0_32] : memref<2x1x128xf32, #tpu.memory_space<vmem>>, vector<1x1x128xf32>
    %72 = vector.shape_cast %71 : vector<1x1x128xf32> to vector<1x128xf32>
    %cst_33 = arith.constant dense<0.000000e+00> : vector<24xf32>
    %73 = vector.multi_reduction <add>, %38, %cst_33 [1] : vector<24x128xf32> to vector<24xf32>
    %74 = vector.shape_cast %73 : vector<24xf32> to vector<24x1xf32>
    %cst_34 = arith.constant 1.280000e+02 : f32
    %75 = vector.broadcast %cst_34 : f32 to vector<24x1xf32>
    %76 = arith.divf %74, %75 : vector<24x1xf32>
    %77 = vector.broadcast %76 : vector<24x1xf32> to vector<24x128xf32>
    %78 = arith.subf %38, %77 : vector<24x128xf32>
    %79 = arith.mulf %78, %78 : vector<24x128xf32>
    %cst_35 = arith.constant dense<0.000000e+00> : vector<24xf32>
    %80 = vector.multi_reduction <add>, %79, %cst_35 [1] : vector<24x128xf32> to vector<24xf32>
    %81 = vector.shape_cast %80 : vector<24xf32> to vector<24x1xf32>
    %cst_36 = arith.constant 1.280000e+02 : f32
    %82 = vector.broadcast %cst_36 : f32 to vector<24x1xf32>
    %83 = arith.divf %81, %82 : vector<24x1xf32>
    %84 = vector.broadcast %76 : vector<24x1xf32> to vector<24x128xf32>
    %85 = arith.subf %38, %84 : vector<24x128xf32>
    %cst_37 = arith.constant 9.99999974E-6 : f32
    %86 = vector.broadcast %cst_37 : f32 to vector<24x1xf32>
    %87 = arith.addf %83, %86 : vector<24x1xf32>
    %88 = math.rsqrt %87 : vector<24x1xf32>
    %89 = vector.broadcast %88 : vector<24x1xf32> to vector<24x128xf32>
    %90 = arith.mulf %85, %89 : vector<24x128xf32>
    %91 = vector.broadcast %70 : vector<1x128xf32> to vector<24x128xf32>
    %92 = arith.mulf %90, %91 : vector<24x128xf32>
    %93 = vector.broadcast %72 : vector<1x128xf32> to vector<24x128xf32>
    %94 = arith.addf %92, %93 : vector<24x128xf32>
    %c0_38 = arith.constant 0 : index
    %c0_39 = arith.constant 0 : index
    %c0_40 = arith.constant 0 : index
    %95 = vector.load %arg13[%c0_38, %c0_39, %c0_40] : memref<2x128x384xf32, #tpu.memory_space<vmem>>, vector<1x128x384xf32>
    %96 = vector.shape_cast %95 : vector<1x128x384xf32> to vector<128x384xf32>
    %cst_41 = arith.constant dense<0.000000e+00> : vector<24x384xf32>
    %97 = tpu.matmul %94, %96, %cst_41 {dimension_numbers = #tpu.dot_dimension_numbers<[1], [0], [0], [1], [0, 0, 1, 1], [], []>} : vector<24x128xf32>, vector<128x384xf32>, vector<24x384xf32> -> vector<24x384xf32>
    %c0_42 = arith.constant 0 : index
    %c0_43 = arith.constant 0 : index
    %c0_44 = arith.constant 0 : index
    %98 = vector.load %arg14[%c0_42, %c0_43, %c0_44] : memref<2x1x384xf32, #tpu.memory_space<vmem>>, vector<1x1x384xf32>
    %99 = vector.shape_cast %98 : vector<1x1x384xf32> to vector<1x384xf32>
    %100 = vector.broadcast %99 : vector<1x384xf32> to vector<24x384xf32>
    %101 = arith.addf %97, %100 : vector<24x384xf32>
    %102 = vector.extract_strided_slice %101 {offsets = [0, 0], sizes = [24, 128], strides = [1, 1]} : vector<24x384xf32> to vector<24x128xf32>
    %cst_45 = arith.constant 0.176776692 : f32
    %103 = vector.broadcast %cst_45 : f32 to vector<24x128xf32>
    %104 = arith.mulf %102, %103 : vector<24x128xf32>
    %105 = vector.extract_strided_slice %101 {offsets = [0, 128], sizes = [24, 128], strides = [1, 1]} : vector<24x384xf32> to vector<24x128xf32>
    %106 = vector.extract_strided_slice %101 {offsets = [0, 256], sizes = [24, 128], strides = [1, 1]} : vector<24x384xf32> to vector<24x128xf32>
    %cst_46 = arith.constant 0.000000e+00 : f32
    %107 = vector.broadcast %cst_46 : f32 to vector<24x128xf32>
    %108 = vector.broadcast %47 : vector<1x128xf32> to vector<24x128xf32>
    %109 = arith.mulf %105, %108 : vector<24x128xf32>
    "tpu.trace_start"() <{level = 10 : i32, message = "md,nd->mn"}> : () -> ()
    %cst_47 = arith.constant dense<0.000000e+00> : vector<24x24xf32>
    %110 = tpu.matmul %104, %109, %cst_47 {dimension_numbers = #tpu.dot_dimension_numbers<[1], [1], [0], [0], [0, 0, 1, 0], [], []>} : vector<24x128xf32>, vector<24x128xf32>, vector<24x24xf32> -> vector<24x24xf32>
    "tpu.trace_stop"() : () -> ()
    %111 = arith.addf %110, %39 : vector<24x24xf32>
    %cst_48 = arith.constant dense<0xFF800000> : vector<24xf32>
    %112 = vector.multi_reduction <maximumf>, %111, %cst_48 [1] : vector<24x24xf32> to vector<24xf32>
    %cst_49 = arith.constant 0xFF800000 : f32
    %113 = vector.broadcast %cst_49 : f32 to vector<24xf32>
    %114 = arith.maximumf %113, %112 : vector<24xf32>
    %115 = vector.shape_cast %114 : vector<24xf32> to vector<24x1xf32>
    %116 = vector.broadcast %115 : vector<24x1xf32> to vector<24x24xf32>
    %117 = arith.subf %111, %116 : vector<24x24xf32>
    %118 = math.exp %117 : vector<24x24xf32>
    %cst_50 = arith.constant dense<0.000000e+00> : vector<24xf32>
    %119 = vector.multi_reduction <add>, %118, %cst_50 [1] : vector<24x24xf32> to vector<24xf32>
    %120 = vector.shape_cast %119 : vector<24xf32> to vector<24x1xf32>
    %121 = vector.broadcast %120 : vector<24x1xf32> to vector<24x24xf32>
    %122 = arith.divf %118, %121 : vector<24x24xf32>
    %123 = vector.broadcast %47 : vector<1x128xf32> to vector<24x128xf32>
    %124 = arith.mulf %106, %123 : vector<24x128xf32>
    %cst_51 = arith.constant dense<0.000000e+00> : vector<24x128xf32>
    %125 = tpu.matmul %122, %124, %cst_51 {dimension_numbers = #tpu.dot_dimension_numbers<[1], [0], [0], [1], [0, 0, 1, 1], [], []>} : vector<24x24xf32>, vector<24x128xf32>, vector<24x128xf32> -> vector<24x128xf32>
    %126 = arith.addf %107, %125 : vector<24x128xf32>
    %127 = vector.broadcast %54 : vector<1x128xf32> to vector<24x128xf32>
    %128 = arith.mulf %105, %127 : vector<24x128xf32>
    "tpu.trace_start"() <{level = 10 : i32, message = "md,nd->mn"}> : () -> ()
    %cst_52 = arith.constant dense<0.000000e+00> : vector<24x24xf32>
    %129 = tpu.matmul %104, %128, %cst_52 {dimension_numbers = #tpu.dot_dimension_numbers<[1], [1], [0], [0], [0, 0, 1, 0], [], []>} : vector<24x128xf32>, vector<24x128xf32>, vector<24x24xf32> -> vector<24x24xf32>
    "tpu.trace_stop"() : () -> ()
    %130 = arith.addf %129, %39 : vector<24x24xf32>
    %cst_53 = arith.constant dense<0xFF800000> : vector<24xf32>
    %131 = vector.multi_reduction <maximumf>, %130, %cst_53 [1] : vector<24x24xf32> to vector<24xf32>
    %cst_54 = arith.constant 0xFF800000 : f32
    %132 = vector.broadcast %cst_54 : f32 to vector<24xf32>
    %133 = arith.maximumf %132, %131 : vector<24xf32>
    %134 = vector.shape_cast %133 : vector<24xf32> to vector<24x1xf32>
    %135 = vector.broadcast %134 : vector<24x1xf32> to vector<24x24xf32>
    %136 = arith.subf %130, %135 : vector<24x24xf32>
    %137 = math.exp %136 : vector<24x24xf32>
    %cst_55 = arith.constant dense<0.000000e+00> : vector<24xf32>
    %138 = vector.multi_reduction <add>, %137, %cst_55 [1] : vector<24x24xf32> to vector<24xf32>
    %139 = vector.shape_cast %138 : vector<24xf32> to vector<24x1xf32>
    %140 = vector.broadcast %139 : vector<24x1xf32> to vector<24x24xf32>
    %141 = arith.divf %137, %140 : vector<24x24xf32>
    %142 = vector.broadcast %54 : vector<1x128xf32> to vector<24x128xf32>
    %143 = arith.mulf %106, %142 : vector<24x128xf32>
    %cst_56 = arith.constant dense<0.000000e+00> : vector<24x128xf32>
    %144 = tpu.matmul %141, %143, %cst_56 {dimension_numbers = #tpu.dot_dimension_numbers<[1], [0], [0], [1], [0, 0, 1, 1], [], []>} : vector<24x24xf32>, vector<24x128xf32>, vector<24x128xf32> -> vector<24x128xf32>
    %145 = arith.addf %126, %144 : vector<24x128xf32>
    %146 = vector.broadcast %61 : vector<1x128xf32> to vector<24x128xf32>
    %147 = arith.mulf %105, %146 : vector<24x128xf32>
    "tpu.trace_start"() <{level = 10 : i32, message = "md,nd->mn"}> : () -> ()
    %cst_57 = arith.constant dense<0.000000e+00> : vector<24x24xf32>
    %148 = tpu.matmul %104, %147, %cst_57 {dimension_numbers = #tpu.dot_dimension_numbers<[1], [1], [0], [0], [0, 0, 1, 0], [], []>} : vector<24x128xf32>, vector<24x128xf32>, vector<24x24xf32> -> vector<24x24xf32>
    "tpu.trace_stop"() : () -> ()
    %149 = arith.addf %148, %39 : vector<24x24xf32>
    %cst_58 = arith.constant dense<0xFF800000> : vector<24xf32>
    %150 = vector.multi_reduction <maximumf>, %149, %cst_58 [1] : vector<24x24xf32> to vector<24xf32>
    %cst_59 = arith.constant 0xFF800000 : f32
    %151 = vector.broadcast %cst_59 : f32 to vector<24xf32>
    %152 = arith.maximumf %151, %150 : vector<24xf32>
    %153 = vector.shape_cast %152 : vector<24xf32> to vector<24x1xf32>
    %154 = vector.broadcast %153 : vector<24x1xf32> to vector<24x24xf32>
    %155 = arith.subf %149, %154 : vector<24x24xf32>
    %156 = math.exp %155 : vector<24x24xf32>
    %cst_60 = arith.constant dense<0.000000e+00> : vector<24xf32>
    %157 = vector.multi_reduction <add>, %156, %cst_60 [1] : vector<24x24xf32> to vector<24xf32>
    %158 = vector.shape_cast %157 : vector<24xf32> to vector<24x1xf32>
    %159 = vector.broadcast %158 : vector<24x1xf32> to vector<24x24xf32>
    %160 = arith.divf %156, %159 : vector<24x24xf32>
    %161 = vector.broadcast %61 : vector<1x128xf32> to vector<24x128xf32>
    %162 = arith.mulf %106, %161 : vector<24x128xf32>
    %cst_61 = arith.constant dense<0.000000e+00> : vector<24x128xf32>
    %163 = tpu.matmul %160, %162, %cst_61 {dimension_numbers = #tpu.dot_dimension_numbers<[1], [0], [0], [1], [0, 0, 1, 1], [], []>} : vector<24x24xf32>, vector<24x128xf32>, vector<24x128xf32> -> vector<24x128xf32>
    %164 = arith.addf %145, %163 : vector<24x128xf32>
    %165 = vector.broadcast %68 : vector<1x128xf32> to vector<24x128xf32>
    %166 = arith.mulf %105, %165 : vector<24x128xf32>
    "tpu.trace_start"() <{level = 10 : i32, message = "md,nd->mn"}> : () -> ()
    %cst_62 = arith.constant dense<0.000000e+00> : vector<24x24xf32>
    %167 = tpu.matmul %104, %166, %cst_62 {dimension_numbers = #tpu.dot_dimension_numbers<[1], [1], [0], [0], [0, 0, 1, 0], [], []>} : vector<24x128xf32>, vector<24x128xf32>, vector<24x24xf32> -> vector<24x24xf32>
    "tpu.trace_stop"() : () -> ()
    %168 = arith.addf %167, %39 : vector<24x24xf32>
    %cst_63 = arith.constant dense<0xFF800000> : vector<24xf32>
    %169 = vector.multi_reduction <maximumf>, %168, %cst_63 [1] : vector<24x24xf32> to vector<24xf32>
    %cst_64 = arith.constant 0xFF800000 : f32
    %170 = vector.broadcast %cst_64 : f32 to vector<24xf32>
    %171 = arith.maximumf %170, %169 : vector<24xf32>
    %172 = vector.shape_cast %171 : vector<24xf32> to vector<24x1xf32>
    %173 = vector.broadcast %172 : vector<24x1xf32> to vector<24x24xf32>
    %174 = arith.subf %168, %173 : vector<24x24xf32>
    %175 = math.exp %174 : vector<24x24xf32>
    %cst_65 = arith.constant dense<0.000000e+00> : vector<24xf32>
    %176 = vector.multi_reduction <add>, %175, %cst_65 [1] : vector<24x24xf32> to vector<24xf32>
    %177 = vector.shape_cast %176 : vector<24xf32> to vector<24x1xf32>
    %178 = vector.broadcast %177 : vector<24x1xf32> to vector<24x24xf32>
    %179 = arith.divf %175, %178 : vector<24x24xf32>
    %180 = vector.broadcast %68 : vector<1x128xf32> to vector<24x128xf32>
    %181 = arith.mulf %106, %180 : vector<24x128xf32>
    %cst_66 = arith.constant dense<0.000000e+00> : vector<24x128xf32>
    %182 = tpu.matmul %179, %181, %cst_66 {dimension_numbers = #tpu.dot_dimension_numbers<[1], [0], [0], [1], [0, 0, 1, 1], [], []>} : vector<24x24xf32>, vector<24x128xf32>, vector<24x128xf32> -> vector<24x128xf32>
    %183 = arith.addf %164, %182 : vector<24x128xf32>
    %c0_67 = arith.constant 0 : index
    %c0_68 = arith.constant 0 : index
    %c0_69 = arith.constant 0 : index
    %184 = vector.load %arg15[%c0_67, %c0_68, %c0_69] : memref<2x128x128xf32, #tpu.memory_space<vmem>>, vector<1x128x128xf32>
    %185 = vector.shape_cast %184 : vector<1x128x128xf32> to vector<128x128xf32>
    %cst_70 = arith.constant dense<0.000000e+00> : vector<24x128xf32>
    %186 = tpu.matmul %183, %185, %cst_70 {dimension_numbers = #tpu.dot_dimension_numbers<[1], [0], [0], [1], [0, 0, 1, 1], [], []>} : vector<24x128xf32>, vector<128x128xf32>, vector<24x128xf32> -> vector<24x128xf32>
    %c0_71 = arith.constant 0 : index
    %c0_72 = arith.constant 0 : index
    %c0_73 = arith.constant 0 : index
    %187 = vector.load %arg16[%c0_71, %c0_72, %c0_73] : memref<2x1x128xf32, #tpu.memory_space<vmem>>, vector<1x1x128xf32>
    %188 = vector.shape_cast %187 : vector<1x1x128xf32> to vector<1x128xf32>
    %189 = vector.broadcast %188 : vector<1x128xf32> to vector<24x128xf32>
    %190 = arith.addf %186, %189 : vector<24x128xf32>
    %191 = arith.addf %38, %190 : vector<24x128xf32>
    %c0_74 = arith.constant 0 : index
    %c0_75 = arith.constant 0 : index
    %c0_76 = arith.constant 0 : index
    %192 = vector.load %arg17[%c0_74, %c0_75, %c0_76] : memref<2x1x128xf32, #tpu.memory_space<vmem>>, vector<1x1x128xf32>
    %193 = vector.shape_cast %192 : vector<1x1x128xf32> to vector<1x128xf32>
    %c0_77 = arith.constant 0 : index
    %c0_78 = arith.constant 0 : index
    %c0_79 = arith.constant 0 : index
    %194 = vector.load %arg18[%c0_77, %c0_78, %c0_79] : memref<2x1x128xf32, #tpu.memory_space<vmem>>, vector<1x1x128xf32>
    %195 = vector.shape_cast %194 : vector<1x1x128xf32> to vector<1x128xf32>
    %cst_80 = arith.constant dense<0.000000e+00> : vector<24xf32>
    %196 = vector.multi_reduction <add>, %191, %cst_80 [1] : vector<24x128xf32> to vector<24xf32>
    %197 = vector.shape_cast %196 : vector<24xf32> to vector<24x1xf32>
    %cst_81 = arith.constant 1.280000e+02 : f32
    %198 = vector.broadcast %cst_81 : f32 to vector<24x1xf32>
    %199 = arith.divf %197, %198 : vector<24x1xf32>
    %200 = vector.broadcast %199 : vector<24x1xf32> to vector<24x128xf32>
    %201 = arith.subf %191, %200 : vector<24x128xf32>
    %202 = arith.mulf %201, %201 : vector<24x128xf32>
    %cst_82 = arith.constant dense<0.000000e+00> : vector<24xf32>
    %203 = vector.multi_reduction <add>, %202, %cst_82 [1] : vector<24x128xf32> to vector<24xf32>
    %204 = vector.shape_cast %203 : vector<24xf32> to vector<24x1xf32>
    %cst_83 = arith.constant 1.280000e+02 : f32
    %205 = vector.broadcast %cst_83 : f32 to vector<24x1xf32>
    %206 = arith.divf %204, %205 : vector<24x1xf32>
    %207 = vector.broadcast %199 : vector<24x1xf32> to vector<24x128xf32>
    %208 = arith.subf %191, %207 : vector<24x128xf32>
    %cst_84 = arith.constant 9.99999974E-6 : f32
    %209 = vector.broadcast %cst_84 : f32 to vector<24x1xf32>
    %210 = arith.addf %206, %209 : vector<24x1xf32>
    %211 = math.rsqrt %210 : vector<24x1xf32>
    %212 = vector.broadcast %211 : vector<24x1xf32> to vector<24x128xf32>
    %213 = arith.mulf %208, %212 : vector<24x128xf32>
    %214 = vector.broadcast %193 : vector<1x128xf32> to vector<24x128xf32>
    %215 = arith.mulf %213, %214 : vector<24x128xf32>
    %216 = vector.broadcast %195 : vector<1x128xf32> to vector<24x128xf32>
    %217 = arith.addf %215, %216 : vector<24x128xf32>
    %c0_85 = arith.constant 0 : index
    %c0_86 = arith.constant 0 : index
    %c0_87 = arith.constant 0 : index
    %218 = vector.load %arg19[%c0_85, %c0_86, %c0_87] : memref<2x128x512xf32, #tpu.memory_space<vmem>>, vector<1x128x512xf32>
    %219 = vector.shape_cast %218 : vector<1x128x512xf32> to vector<128x512xf32>
    %cst_88 = arith.constant dense<0.000000e+00> : vector<24x512xf32>
    %220 = tpu.matmul %217, %219, %cst_88 {dimension_numbers = #tpu.dot_dimension_numbers<[1], [0], [0], [1], [0, 0, 1, 1], [], []>} : vector<24x128xf32>, vector<128x512xf32>, vector<24x512xf32> -> vector<24x512xf32>
    %c0_89 = arith.constant 0 : index
    %c0_90 = arith.constant 0 : index
    %c0_91 = arith.constant 0 : index
    %221 = vector.load %arg20[%c0_89, %c0_90, %c0_91] : memref<2x1x512xf32, #tpu.memory_space<vmem>>, vector<1x1x512xf32>
    %222 = vector.shape_cast %221 : vector<1x1x512xf32> to vector<1x512xf32>
    %223 = vector.broadcast %222 : vector<1x512xf32> to vector<24x512xf32>
    %224 = arith.addf %220, %223 : vector<24x512xf32>
    %cst_92 = arith.constant 5.000000e-01 : f32
    %225 = vector.broadcast %cst_92 : f32 to vector<24x512xf32>
    %226 = arith.mulf %225, %224 : vector<24x512xf32>
    %cst_93 = arith.constant 4.471500e-02 : f32
    %227 = vector.broadcast %cst_93 : f32 to vector<24x512xf32>
    %228 = arith.mulf %227, %224 : vector<24x512xf32>
    %229 = arith.mulf %228, %224 : vector<24x512xf32>
    %230 = arith.mulf %229, %224 : vector<24x512xf32>
    %231 = arith.addf %224, %230 : vector<24x512xf32>
    %cst_94 = arith.constant 0.797884583 : f32
    %232 = vector.broadcast %cst_94 : f32 to vector<24x512xf32>
    %233 = arith.mulf %232, %231 : vector<24x512xf32>
    %234 = math.tanh %233 : vector<24x512xf32>
    %cst_95 = arith.constant 1.000000e+00 : f32
    %235 = vector.broadcast %cst_95 : f32 to vector<24x512xf32>
    %236 = arith.addf %235, %234 : vector<24x512xf32>
    %237 = arith.mulf %226, %236 : vector<24x512xf32>
    %c0_96 = arith.constant 0 : index
    %c0_97 = arith.constant 0 : index
    %c0_98 = arith.constant 0 : index
    %238 = vector.load %arg21[%c0_96, %c0_97, %c0_98] : memref<2x512x128xf32, #tpu.memory_space<vmem>>, vector<1x512x128xf32>
    %239 = vector.shape_cast %238 : vector<1x512x128xf32> to vector<512x128xf32>
    %cst_99 = arith.constant dense<0.000000e+00> : vector<24x128xf32>
    %240 = tpu.matmul %237, %239, %cst_99 {dimension_numbers = #tpu.dot_dimension_numbers<[1], [0], [0], [1], [0, 0, 1, 1], [], []>} : vector<24x512xf32>, vector<512x128xf32>, vector<24x128xf32> -> vector<24x128xf32>
    %c0_100 = arith.constant 0 : index
    %c0_101 = arith.constant 0 : index
    %c0_102 = arith.constant 0 : index
    %241 = vector.load %arg22[%c0_100, %c0_101, %c0_102] : memref<2x1x128xf32, #tpu.memory_space<vmem>>, vector<1x1x128xf32>
    %242 = vector.shape_cast %241 : vector<1x1x128xf32> to vector<1x128xf32>
    %243 = vector.broadcast %242 : vector<1x128xf32> to vector<24x128xf32>
    %244 = arith.addf %240, %243 : vector<24x128xf32>
    %245 = arith.addf %191, %244 : vector<24x128xf32>
    %c1 = arith.constant 1 : index
    %c0_103 = arith.constant 0 : index
    %c0_104 = arith.constant 0 : index
    %246 = vector.load %arg11[%c1, %c0_103, %c0_104] : memref<2x1x128xf32, #tpu.memory_space<vmem>>, vector<1x1x128xf32>
    %247 = vector.shape_cast %246 : vector<1x1x128xf32> to vector<1x128xf32>
    %c1_105 = arith.constant 1 : index
    %c0_106 = arith.constant 0 : index
    %c0_107 = arith.constant 0 : index
    %248 = vector.load %arg12[%c1_105, %c0_106, %c0_107] : memref<2x1x128xf32, #tpu.memory_space<vmem>>, vector<1x1x128xf32>
    %249 = vector.shape_cast %248 : vector<1x1x128xf32> to vector<1x128xf32>
    %cst_108 = arith.constant dense<0.000000e+00> : vector<24xf32>
    %250 = vector.multi_reduction <add>, %245, %cst_108 [1] : vector<24x128xf32> to vector<24xf32>
    %251 = vector.shape_cast %250 : vector<24xf32> to vector<24x1xf32>
    %cst_109 = arith.constant 1.280000e+02 : f32
    %252 = vector.broadcast %cst_109 : f32 to vector<24x1xf32>
    %253 = arith.divf %251, %252 : vector<24x1xf32>
    %254 = vector.broadcast %253 : vector<24x1xf32> to vector<24x128xf32>
    %255 = arith.subf %245, %254 : vector<24x128xf32>
    %256 = arith.mulf %255, %255 : vector<24x128xf32>
    %cst_110 = arith.constant dense<0.000000e+00> : vector<24xf32>
    %257 = vector.multi_reduction <add>, %256, %cst_110 [1] : vector<24x128xf32> to vector<24xf32>
    %258 = vector.shape_cast %257 : vector<24xf32> to vector<24x1xf32>
    %cst_111 = arith.constant 1.280000e+02 : f32
    %259 = vector.broadcast %cst_111 : f32 to vector<24x1xf32>
    %260 = arith.divf %258, %259 : vector<24x1xf32>
    %261 = vector.broadcast %253 : vector<24x1xf32> to vector<24x128xf32>
    %262 = arith.subf %245, %261 : vector<24x128xf32>
    %cst_112 = arith.constant 9.99999974E-6 : f32
    %263 = vector.broadcast %cst_112 : f32 to vector<24x1xf32>
    %264 = arith.addf %260, %263 : vector<24x1xf32>
    %265 = math.rsqrt %264 : vector<24x1xf32>
    %266 = vector.broadcast %265 : vector<24x1xf32> to vector<24x128xf32>
    %267 = arith.mulf %262, %266 : vector<24x128xf32>
    %268 = vector.broadcast %247 : vector<1x128xf32> to vector<24x128xf32>
    %269 = arith.mulf %267, %268 : vector<24x128xf32>
    %270 = vector.broadcast %249 : vector<1x128xf32> to vector<24x128xf32>
    %271 = arith.addf %269, %270 : vector<24x128xf32>
    %c1_113 = arith.constant 1 : index
    %c0_114 = arith.constant 0 : index
    %c0_115 = arith.constant 0 : index
    %272 = vector.load %arg13[%c1_113, %c0_114, %c0_115] : memref<2x128x384xf32, #tpu.memory_space<vmem>>, vector<1x128x384xf32>
    %273 = vector.shape_cast %272 : vector<1x128x384xf32> to vector<128x384xf32>
    %cst_116 = arith.constant dense<0.000000e+00> : vector<24x384xf32>
    %274 = tpu.matmul %271, %273, %cst_116 {dimension_numbers = #tpu.dot_dimension_numbers<[1], [0], [0], [1], [0, 0, 1, 1], [], []>} : vector<24x128xf32>, vector<128x384xf32>, vector<24x384xf32> -> vector<24x384xf32>
    %c1_117 = arith.constant 1 : index
    %c0_118 = arith.constant 0 : index
    %c0_119 = arith.constant 0 : index
    %275 = vector.load %arg14[%c1_117, %c0_118, %c0_119] : memref<2x1x384xf32, #tpu.memory_space<vmem>>, vector<1x1x384xf32>
    %276 = vector.shape_cast %275 : vector<1x1x384xf32> to vector<1x384xf32>
    %277 = vector.broadcast %276 : vector<1x384xf32> to vector<24x384xf32>
    %278 = arith.addf %274, %277 : vector<24x384xf32>
    %279 = vector.extract_strided_slice %278 {offsets = [0, 0], sizes = [24, 128], strides = [1, 1]} : vector<24x384xf32> to vector<24x128xf32>
    %cst_120 = arith.constant 0.176776692 : f32
    %280 = vector.broadcast %cst_120 : f32 to vector<24x128xf32>
    %281 = arith.mulf %279, %280 : vector<24x128xf32>
    %282 = vector.extract_strided_slice %278 {offsets = [0, 128], sizes = [24, 128], strides = [1, 1]} : vector<24x384xf32> to vector<24x128xf32>
    %283 = vector.extract_strided_slice %278 {offsets = [0, 256], sizes = [24, 128], strides = [1, 1]} : vector<24x384xf32> to vector<24x128xf32>
    %cst_121 = arith.constant 0.000000e+00 : f32
    %284 = vector.broadcast %cst_121 : f32 to vector<24x128xf32>
    %285 = vector.broadcast %47 : vector<1x128xf32> to vector<24x128xf32>
    %286 = arith.mulf %282, %285 : vector<24x128xf32>
    "tpu.trace_start"() <{level = 10 : i32, message = "md,nd->mn"}> : () -> ()
    %cst_122 = arith.constant dense<0.000000e+00> : vector<24x24xf32>
    %287 = tpu.matmul %281, %286, %cst_122 {dimension_numbers = #tpu.dot_dimension_numbers<[1], [1], [0], [0], [0, 0, 1, 0], [], []>} : vector<24x128xf32>, vector<24x128xf32>, vector<24x24xf32> -> vector<24x24xf32>
    "tpu.trace_stop"() : () -> ()
    %288 = arith.addf %287, %39 : vector<24x24xf32>
    %cst_123 = arith.constant dense<0xFF800000> : vector<24xf32>
    %289 = vector.multi_reduction <maximumf>, %288, %cst_123 [1] : vector<24x24xf32> to vector<24xf32>
    %cst_124 = arith.constant 0xFF800000 : f32
    %290 = vector.broadcast %cst_124 : f32 to vector<24xf32>
    %291 = arith.maximumf %290, %289 : vector<24xf32>
    %292 = vector.shape_cast %291 : vector<24xf32> to vector<24x1xf32>
    %293 = vector.broadcast %292 : vector<24x1xf32> to vector<24x24xf32>
    %294 = arith.subf %288, %293 : vector<24x24xf32>
    %295 = math.exp %294 : vector<24x24xf32>
    %cst_125 = arith.constant dense<0.000000e+00> : vector<24xf32>
    %296 = vector.multi_reduction <add>, %295, %cst_125 [1] : vector<24x24xf32> to vector<24xf32>
    %297 = vector.shape_cast %296 : vector<24xf32> to vector<24x1xf32>
    %298 = vector.broadcast %297 : vector<24x1xf32> to vector<24x24xf32>
    %299 = arith.divf %295, %298 : vector<24x24xf32>
    %300 = vector.broadcast %47 : vector<1x128xf32> to vector<24x128xf32>
    %301 = arith.mulf %283, %300 : vector<24x128xf32>
    %cst_126 = arith.constant dense<0.000000e+00> : vector<24x128xf32>
    %302 = tpu.matmul %299, %301, %cst_126 {dimension_numbers = #tpu.dot_dimension_numbers<[1], [0], [0], [1], [0, 0, 1, 1], [], []>} : vector<24x24xf32>, vector<24x128xf32>, vector<24x128xf32> -> vector<24x128xf32>
    %303 = arith.addf %284, %302 : vector<24x128xf32>
    %304 = vector.broadcast %54 : vector<1x128xf32> to vector<24x128xf32>
    %305 = arith.mulf %282, %304 : vector<24x128xf32>
    "tpu.trace_start"() <{level = 10 : i32, message = "md,nd->mn"}> : () -> ()
    %cst_127 = arith.constant dense<0.000000e+00> : vector<24x24xf32>
    %306 = tpu.matmul %281, %305, %cst_127 {dimension_numbers = #tpu.dot_dimension_numbers<[1], [1], [0], [0], [0, 0, 1, 0], [], []>} : vector<24x128xf32>, vector<24x128xf32>, vector<24x24xf32> -> vector<24x24xf32>
    "tpu.trace_stop"() : () -> ()
    %307 = arith.addf %306, %39 : vector<24x24xf32>
    %cst_128 = arith.constant dense<0xFF800000> : vector<24xf32>
    %308 = vector.multi_reduction <maximumf>, %307, %cst_128 [1] : vector<24x24xf32> to vector<24xf32>
    %cst_129 = arith.constant 0xFF800000 : f32
    %309 = vector.broadcast %cst_129 : f32 to vector<24xf32>
    %310 = arith.maximumf %309, %308 : vector<24xf32>
    %311 = vector.shape_cast %310 : vector<24xf32> to vector<24x1xf32>
    %312 = vector.broadcast %311 : vector<24x1xf32> to vector<24x24xf32>
    %313 = arith.subf %307, %312 : vector<24x24xf32>
    %314 = math.exp %313 : vector<24x24xf32>
    %cst_130 = arith.constant dense<0.000000e+00> : vector<24xf32>
    %315 = vector.multi_reduction <add>, %314, %cst_130 [1] : vector<24x24xf32> to vector<24xf32>
    %316 = vector.shape_cast %315 : vector<24xf32> to vector<24x1xf32>
    %317 = vector.broadcast %316 : vector<24x1xf32> to vector<24x24xf32>
    %318 = arith.divf %314, %317 : vector<24x24xf32>
    %319 = vector.broadcast %54 : vector<1x128xf32> to vector<24x128xf32>
    %320 = arith.mulf %283, %319 : vector<24x128xf32>
    %cst_131 = arith.constant dense<0.000000e+00> : vector<24x128xf32>
    %321 = tpu.matmul %318, %320, %cst_131 {dimension_numbers = #tpu.dot_dimension_numbers<[1], [0], [0], [1], [0, 0, 1, 1], [], []>} : vector<24x24xf32>, vector<24x128xf32>, vector<24x128xf32> -> vector<24x128xf32>
    %322 = arith.addf %303, %321 : vector<24x128xf32>
    %323 = vector.broadcast %61 : vector<1x128xf32> to vector<24x128xf32>
    %324 = arith.mulf %282, %323 : vector<24x128xf32>
    "tpu.trace_start"() <{level = 10 : i32, message = "md,nd->mn"}> : () -> ()
    %cst_132 = arith.constant dense<0.000000e+00> : vector<24x24xf32>
    %325 = tpu.matmul %281, %324, %cst_132 {dimension_numbers = #tpu.dot_dimension_numbers<[1], [1], [0], [0], [0, 0, 1, 0], [], []>} : vector<24x128xf32>, vector<24x128xf32>, vector<24x24xf32> -> vector<24x24xf32>
    "tpu.trace_stop"() : () -> ()
    %326 = arith.addf %325, %39 : vector<24x24xf32>
    %cst_133 = arith.constant dense<0xFF800000> : vector<24xf32>
    %327 = vector.multi_reduction <maximumf>, %326, %cst_133 [1] : vector<24x24xf32> to vector<24xf32>
    %cst_134 = arith.constant 0xFF800000 : f32
    %328 = vector.broadcast %cst_134 : f32 to vector<24xf32>
    %329 = arith.maximumf %328, %327 : vector<24xf32>
    %330 = vector.shape_cast %329 : vector<24xf32> to vector<24x1xf32>
    %331 = vector.broadcast %330 : vector<24x1xf32> to vector<24x24xf32>
    %332 = arith.subf %326, %331 : vector<24x24xf32>
    %333 = math.exp %332 : vector<24x24xf32>
    %cst_135 = arith.constant dense<0.000000e+00> : vector<24xf32>
    %334 = vector.multi_reduction <add>, %333, %cst_135 [1] : vector<24x24xf32> to vector<24xf32>
    %335 = vector.shape_cast %334 : vector<24xf32> to vector<24x1xf32>
    %336 = vector.broadcast %335 : vector<24x1xf32> to vector<24x24xf32>
    %337 = arith.divf %333, %336 : vector<24x24xf32>
    %338 = vector.broadcast %61 : vector<1x128xf32> to vector<24x128xf32>
    %339 = arith.mulf %283, %338 : vector<24x128xf32>
    %cst_136 = arith.constant dense<0.000000e+00> : vector<24x128xf32>
    %340 = tpu.matmul %337, %339, %cst_136 {dimension_numbers = #tpu.dot_dimension_numbers<[1], [0], [0], [1], [0, 0, 1, 1], [], []>} : vector<24x24xf32>, vector<24x128xf32>, vector<24x128xf32> -> vector<24x128xf32>
    %341 = arith.addf %322, %340 : vector<24x128xf32>
    %342 = vector.broadcast %68 : vector<1x128xf32> to vector<24x128xf32>
    %343 = arith.mulf %282, %342 : vector<24x128xf32>
    "tpu.trace_start"() <{level = 10 : i32, message = "md,nd->mn"}> : () -> ()
    %cst_137 = arith.constant dense<0.000000e+00> : vector<24x24xf32>
    %344 = tpu.matmul %281, %343, %cst_137 {dimension_numbers = #tpu.dot_dimension_numbers<[1], [1], [0], [0], [0, 0, 1, 0], [], []>} : vector<24x128xf32>, vector<24x128xf32>, vector<24x24xf32> -> vector<24x24xf32>
    "tpu.trace_stop"() : () -> ()
    %345 = arith.addf %344, %39 : vector<24x24xf32>
    %cst_138 = arith.constant dense<0xFF800000> : vector<24xf32>
    %346 = vector.multi_reduction <maximumf>, %345, %cst_138 [1] : vector<24x24xf32> to vector<24xf32>
    %cst_139 = arith.constant 0xFF800000 : f32
    %347 = vector.broadcast %cst_139 : f32 to vector<24xf32>
    %348 = arith.maximumf %347, %346 : vector<24xf32>
    %349 = vector.shape_cast %348 : vector<24xf32> to vector<24x1xf32>
    %350 = vector.broadcast %349 : vector<24x1xf32> to vector<24x24xf32>
    %351 = arith.subf %345, %350 : vector<24x24xf32>
    %352 = math.exp %351 : vector<24x24xf32>
    %cst_140 = arith.constant dense<0.000000e+00> : vector<24xf32>
    %353 = vector.multi_reduction <add>, %352, %cst_140 [1] : vector<24x24xf32> to vector<24xf32>
    %354 = vector.shape_cast %353 : vector<24xf32> to vector<24x1xf32>
    %355 = vector.broadcast %354 : vector<24x1xf32> to vector<24x24xf32>
    %356 = arith.divf %352, %355 : vector<24x24xf32>
    %357 = vector.broadcast %68 : vector<1x128xf32> to vector<24x128xf32>
    %358 = arith.mulf %283, %357 : vector<24x128xf32>
    %cst_141 = arith.constant dense<0.000000e+00> : vector<24x128xf32>
    %359 = tpu.matmul %356, %358, %cst_141 {dimension_numbers = #tpu.dot_dimension_numbers<[1], [0], [0], [1], [0, 0, 1, 1], [], []>} : vector<24x24xf32>, vector<24x128xf32>, vector<24x128xf32> -> vector<24x128xf32>
    %360 = arith.addf %341, %359 : vector<24x128xf32>
    %c1_142 = arith.constant 1 : index
    %c0_143 = arith.constant 0 : index
    %c0_144 = arith.constant 0 : index
    %361 = vector.load %arg15[%c1_142, %c0_143, %c0_144] : memref<2x128x128xf32, #tpu.memory_space<vmem>>, vector<1x128x128xf32>
    %362 = vector.shape_cast %361 : vector<1x128x128xf32> to vector<128x128xf32>
    %cst_145 = arith.constant dense<0.000000e+00> : vector<24x128xf32>
    %363 = tpu.matmul %360, %362, %cst_145 {dimension_numbers = #tpu.dot_dimension_numbers<[1], [0], [0], [1], [0, 0, 1, 1], [], []>} : vector<24x128xf32>, vector<128x128xf32>, vector<24x128xf32> -> vector<24x128xf32>
    %c1_146 = arith.constant 1 : index
    %c0_147 = arith.constant 0 : index
    %c0_148 = arith.constant 0 : index
    %364 = vector.load %arg16[%c1_146, %c0_147, %c0_148] : memref<2x1x128xf32, #tpu.memory_space<vmem>>, vector<1x1x128xf32>
    %365 = vector.shape_cast %364 : vector<1x1x128xf32> to vector<1x128xf32>
    %366 = vector.broadcast %365 : vector<1x128xf32> to vector<24x128xf32>
    %367 = arith.addf %363, %366 : vector<24x128xf32>
    %368 = arith.addf %245, %367 : vector<24x128xf32>
    %c1_149 = arith.constant 1 : index
    %c0_150 = arith.constant 0 : index
    %c0_151 = arith.constant 0 : index
    %369 = vector.load %arg17[%c1_149, %c0_150, %c0_151] : memref<2x1x128xf32, #tpu.memory_space<vmem>>, vector<1x1x128xf32>
    %370 = vector.shape_cast %369 : vector<1x1x128xf32> to vector<1x128xf32>
    %c1_152 = arith.constant 1 : index
    %c0_153 = arith.constant 0 : index
    %c0_154 = arith.constant 0 : index
    %371 = vector.load %arg18[%c1_152, %c0_153, %c0_154] : memref<2x1x128xf32, #tpu.memory_space<vmem>>, vector<1x1x128xf32>
    %372 = vector.shape_cast %371 : vector<1x1x128xf32> to vector<1x128xf32>
    %cst_155 = arith.constant dense<0.000000e+00> : vector<24xf32>
    %373 = vector.multi_reduction <add>, %368, %cst_155 [1] : vector<24x128xf32> to vector<24xf32>
    %374 = vector.shape_cast %373 : vector<24xf32> to vector<24x1xf32>
    %cst_156 = arith.constant 1.280000e+02 : f32
    %375 = vector.broadcast %cst_156 : f32 to vector<24x1xf32>
    %376 = arith.divf %374, %375 : vector<24x1xf32>
    %377 = vector.broadcast %376 : vector<24x1xf32> to vector<24x128xf32>
    %378 = arith.subf %368, %377 : vector<24x128xf32>
    %379 = arith.mulf %378, %378 : vector<24x128xf32>
    %cst_157 = arith.constant dense<0.000000e+00> : vector<24xf32>
    %380 = vector.multi_reduction <add>, %379, %cst_157 [1] : vector<24x128xf32> to vector<24xf32>
    %381 = vector.shape_cast %380 : vector<24xf32> to vector<24x1xf32>
    %cst_158 = arith.constant 1.280000e+02 : f32
    %382 = vector.broadcast %cst_158 : f32 to vector<24x1xf32>
    %383 = arith.divf %381, %382 : vector<24x1xf32>
    %384 = vector.broadcast %376 : vector<24x1xf32> to vector<24x128xf32>
    %385 = arith.subf %368, %384 : vector<24x128xf32>
    %cst_159 = arith.constant 9.99999974E-6 : f32
    %386 = vector.broadcast %cst_159 : f32 to vector<24x1xf32>
    %387 = arith.addf %383, %386 : vector<24x1xf32>
    %388 = math.rsqrt %387 : vector<24x1xf32>
    %389 = vector.broadcast %388 : vector<24x1xf32> to vector<24x128xf32>
    %390 = arith.mulf %385, %389 : vector<24x128xf32>
    %391 = vector.broadcast %370 : vector<1x128xf32> to vector<24x128xf32>
    %392 = arith.mulf %390, %391 : vector<24x128xf32>
    %393 = vector.broadcast %372 : vector<1x128xf32> to vector<24x128xf32>
    %394 = arith.addf %392, %393 : vector<24x128xf32>
    %c1_160 = arith.constant 1 : index
    %c0_161 = arith.constant 0 : index
    %c0_162 = arith.constant 0 : index
    %395 = vector.load %arg19[%c1_160, %c0_161, %c0_162] : memref<2x128x512xf32, #tpu.memory_space<vmem>>, vector<1x128x512xf32>
    %396 = vector.shape_cast %395 : vector<1x128x512xf32> to vector<128x512xf32>
    %cst_163 = arith.constant dense<0.000000e+00> : vector<24x512xf32>
    %397 = tpu.matmul %394, %396, %cst_163 {dimension_numbers = #tpu.dot_dimension_numbers<[1], [0], [0], [1], [0, 0, 1, 1], [], []>} : vector<24x128xf32>, vector<128x512xf32>, vector<24x512xf32> -> vector<24x512xf32>
    %c1_164 = arith.constant 1 : index
    %c0_165 = arith.constant 0 : index
    %c0_166 = arith.constant 0 : index
    %398 = vector.load %arg20[%c1_164, %c0_165, %c0_166] : memref<2x1x512xf32, #tpu.memory_space<vmem>>, vector<1x1x512xf32>
    %399 = vector.shape_cast %398 : vector<1x1x512xf32> to vector<1x512xf32>
    %400 = vector.broadcast %399 : vector<1x512xf32> to vector<24x512xf32>
    %401 = arith.addf %397, %400 : vector<24x512xf32>
    %cst_167 = arith.constant 5.000000e-01 : f32
    %402 = vector.broadcast %cst_167 : f32 to vector<24x512xf32>
    %403 = arith.mulf %402, %401 : vector<24x512xf32>
    %cst_168 = arith.constant 4.471500e-02 : f32
    %404 = vector.broadcast %cst_168 : f32 to vector<24x512xf32>
    %405 = arith.mulf %404, %401 : vector<24x512xf32>
    %406 = arith.mulf %405, %401 : vector<24x512xf32>
    %407 = arith.mulf %406, %401 : vector<24x512xf32>
    %408 = arith.addf %401, %407 : vector<24x512xf32>
    %cst_169 = arith.constant 0.797884583 : f32
    %409 = vector.broadcast %cst_169 : f32 to vector<24x512xf32>
    %410 = arith.mulf %409, %408 : vector<24x512xf32>
    %411 = math.tanh %410 : vector<24x512xf32>
    %cst_170 = arith.constant 1.000000e+00 : f32
    %412 = vector.broadcast %cst_170 : f32 to vector<24x512xf32>
    %413 = arith.addf %412, %411 : vector<24x512xf32>
    %414 = arith.mulf %403, %413 : vector<24x512xf32>
    %c1_171 = arith.constant 1 : index
    %c0_172 = arith.constant 0 : index
    %c0_173 = arith.constant 0 : index
    %415 = vector.load %arg21[%c1_171, %c0_172, %c0_173] : memref<2x512x128xf32, #tpu.memory_space<vmem>>, vector<1x512x128xf32>
    %416 = vector.shape_cast %415 : vector<1x512x128xf32> to vector<512x128xf32>
    %cst_174 = arith.constant dense<0.000000e+00> : vector<24x128xf32>
    %417 = tpu.matmul %414, %416, %cst_174 {dimension_numbers = #tpu.dot_dimension_numbers<[1], [0], [0], [1], [0, 0, 1, 1], [], []>} : vector<24x512xf32>, vector<512x128xf32>, vector<24x128xf32> -> vector<24x128xf32>
    %c1_175 = arith.constant 1 : index
    %c0_176 = arith.constant 0 : index
    %c0_177 = arith.constant 0 : index
    %418 = vector.load %arg22[%c1_175, %c0_176, %c0_177] : memref<2x1x128xf32, #tpu.memory_space<vmem>>, vector<1x1x128xf32>
    %419 = vector.shape_cast %418 : vector<1x1x128xf32> to vector<1x128xf32>
    %420 = vector.broadcast %419 : vector<1x128xf32> to vector<24x128xf32>
    %421 = arith.addf %417, %420 : vector<24x128xf32>
    %422 = arith.addf %368, %421 : vector<24x128xf32>
    %423 = vector.extract_strided_slice %422 {offsets = [0, 0], sizes = [8, 128], strides = [1, 1]} : vector<24x128xf32> to vector<8x128xf32>
    %c0_178 = arith.constant 0 : index
    %c0_179 = arith.constant 0 : index
    %424 = vector.load %arg23[%c0_178, %c0_179] : memref<1x128xf32, #tpu.memory_space<vmem>>, vector<1x128xf32>
    %c0_180 = arith.constant 0 : index
    %c0_181 = arith.constant 0 : index
    %425 = vector.load %arg24[%c0_180, %c0_181] : memref<1x128xf32, #tpu.memory_space<vmem>>, vector<1x128xf32>
    %cst_182 = arith.constant dense<0.000000e+00> : vector<8xf32>
    %426 = vector.multi_reduction <add>, %423, %cst_182 [1] : vector<8x128xf32> to vector<8xf32>
    %427 = vector.shape_cast %426 : vector<8xf32> to vector<8x1xf32>
    %cst_183 = arith.constant 1.280000e+02 : f32
    %428 = vector.broadcast %cst_183 : f32 to vector<8x1xf32>
    %429 = arith.divf %427, %428 : vector<8x1xf32>
    %430 = vector.broadcast %429 : vector<8x1xf32> to vector<8x128xf32>
    %431 = arith.subf %423, %430 : vector<8x128xf32>
    %432 = arith.mulf %431, %431 : vector<8x128xf32>
    %cst_184 = arith.constant dense<0.000000e+00> : vector<8xf32>
    %433 = vector.multi_reduction <add>, %432, %cst_184 [1] : vector<8x128xf32> to vector<8xf32>
    %434 = vector.shape_cast %433 : vector<8xf32> to vector<8x1xf32>
    %cst_185 = arith.constant 1.280000e+02 : f32
    %435 = vector.broadcast %cst_185 : f32 to vector<8x1xf32>
    %436 = arith.divf %434, %435 : vector<8x1xf32>
    %437 = vector.broadcast %429 : vector<8x1xf32> to vector<8x128xf32>
    %438 = arith.subf %423, %437 : vector<8x128xf32>
    %cst_186 = arith.constant 9.99999974E-6 : f32
    %439 = vector.broadcast %cst_186 : f32 to vector<8x1xf32>
    %440 = arith.addf %436, %439 : vector<8x1xf32>
    %441 = math.rsqrt %440 : vector<8x1xf32>
    %442 = vector.broadcast %441 : vector<8x1xf32> to vector<8x128xf32>
    %443 = arith.mulf %438, %442 : vector<8x128xf32>
    %444 = vector.broadcast %424 : vector<1x128xf32> to vector<8x128xf32>
    %445 = arith.mulf %443, %444 : vector<8x128xf32>
    %446 = vector.broadcast %425 : vector<1x128xf32> to vector<8x128xf32>
    %447 = arith.addf %445, %446 : vector<8x128xf32>
    %c0_187 = arith.constant 0 : index
    %c0_188 = arith.constant 0 : index
    %448 = vector.load %arg25[%c0_187, %c0_188] : memref<128x128xf32, #tpu.memory_space<vmem>>, vector<128x128xf32>
    %cst_189 = arith.constant dense<0.000000e+00> : vector<8x128xf32>
    %449 = tpu.matmul %447, %448, %cst_189 {dimension_numbers = #tpu.dot_dimension_numbers<[1], [0], [0], [1], [0, 0, 1, 1], [], []>} : vector<8x128xf32>, vector<128x128xf32>, vector<8x128xf32> -> vector<8x128xf32>
    %c0_190 = arith.constant 0 : index
    %c0_191 = arith.constant 0 : index
    %450 = vector.load %arg26[%c0_190, %c0_191] : memref<1x128xf32, #tpu.memory_space<vmem>>, vector<1x128xf32>
    %451 = vector.broadcast %450 : vector<1x128xf32> to vector<8x128xf32>
    %452 = arith.addf %449, %451 : vector<8x128xf32>
    %cst_192 = arith.constant 0.000000e+00 : f32
    %453 = vector.broadcast %cst_192 : f32 to vector<8x128xf32>
    %454 = arith.maximumf %452, %453 : vector<8x128xf32>
    %c0_193 = arith.constant 0 : index
    %c0_194 = arith.constant 0 : index
    %455 = vector.load %arg27[%c0_193, %c0_194] : memref<128x3xf32, #tpu.memory_space<vmem>>, vector<128x3xf32>
    %cst_195 = arith.constant dense<0.000000e+00> : vector<8x3xf32>
    %456 = tpu.matmul %454, %455, %cst_195 {dimension_numbers = #tpu.dot_dimension_numbers<[1], [0], [0], [1], [0, 0, 1, 1], [], []>} : vector<8x128xf32>, vector<128x3xf32>, vector<8x3xf32> -> vector<8x3xf32>
    %c0_196 = arith.constant 0 : index
    %c0_197 = arith.constant 0 : index
    %457 = vector.load %arg28[%c0_196, %c0_197] : memref<1x3xf32, #tpu.memory_space<vmem>>, vector<1x3xf32>
    %458 = vector.broadcast %457 : vector<1x3xf32> to vector<8x3xf32>
    %459 = arith.addf %456, %458 : vector<8x3xf32>
    %c0_198 = arith.constant 0 : index
    %c0_199 = arith.constant 0 : index
    %460 = vector.load %arg29[%c0_198, %c0_199] : memref<8x3xf32, #tpu.memory_space<vmem>>, vector<8x3xf32>
    tpu.vector_store %arg29[%c0_198, %c0_199], %459 {strides = array<i32>} : memref<8x3xf32, #tpu.memory_space<vmem>>, vector<8x3xf32>,
    return
  }
}

</mosaic_0001>

<bundles_post_ra>
// kernel: tpu_custom_call.1
= control target key start
LH: loop header
LB: loop body
LE: loop exit
PB: predicated region body
PF: predicated region fallthrough
CT: control target
= control target key end

     0   :  { %s6026_s6 = smov 1   ;;  %s6027_s10 = smov 2   ;;  %s7296_s0 = inlined_call_operand.smem [shape: u32[30], index: -1, kind: input, shape index: {}] }
   0x1   :  { %s6091_s5 = sld [smem:[%s7296_s0]]   ;;  %s6028_s14 = smov 3  }
   0x2   :  { %s6096_s9 = sld [smem:[%s7296_s0 + %s6026_s6]]   ;;  %s6029_s18 = smov 4  }
   0x3   :  { %s6101_s13 = sld [smem:[%s7296_s0 + %s6027_s10]]   ;;  %s6030_s22 = smov 5  }
   0x4   :  { %s6106_s17 = sld [smem:[%s7296_s0 + %s6028_s14]]   ;;  %s6031_s26 = smov 6  }
   0x5   :  { %s6111_s21 = sld [smem:[%s7296_s0 + %s6029_s18]]   ;;  %s6032_s30 = smov 7  }
   0x6   :  { %s6116_s25 = sld [smem:[%s7296_s0 + %s6030_s22]]   ;;  %s6033_s4 = smov 8  }
   0x7   :  { %7302 = sst [smem:[#allocation37_spill]] %s6091_s5  ;;  %s6034_s10 = smov 9  }
   0x8   :  { %7303 = sst [smem:[#allocation38_spill]] %s6096_s9  ;;  %s6035_s15 = smov 10  }
   0x9   :  { %7304 = sst [smem:[#allocation39_spill]] %s6101_s13  ;;  %s6036_s20 = smov 11  }
   0xa   :  { %7305 = sst [smem:[#allocation40_spill]] %s6106_s17  ;;  %s6038_s1 = smov 13  }
   0xb   :  { %7306 = sst [smem:[#allocation41_spill]] %s6111_s21  ;;  %s6039_s7 = smov 14  }
   0xc   :  { %7307 = sst [smem:[#allocation42_spill]] %s6116_s25  ;;  %s6041_s22 = smov 16  }
   0xd   :  { %s6121_s29 = sld [smem:[%s7296_s0 + %s6031_s26]]   ;;  %s6037_s26 = smov 12  }
   0xe   :  { %s6126_s3 = sld [smem:[%s7296_s0 + %s6032_s30]]   ;;  %s6042_s28 = smov 17  }
   0xf   :  { %s6131_s8 = sld [smem:[%s7296_s0 + %s6033_s4]]  }
  0x10   :  { %s6136_s14 = sld [smem:[%s7296_s0 + %s6034_s10]]  }
  0x11   :  { %s6141_s19 = sld [smem:[%s7296_s0 + %s6035_s15]]   ;;  %s6040_s15 = smov 15  }
  0x12   :  { %s6146_s24 = sld [smem:[%s7296_s0 + %s6036_s20]]  }
  0x13   :  { %s6151_s30 = sld [smem:[%s7296_s0 + %s6037_s26]]  }
  0x14   :  { %s6156_s6 = sld [smem:[%s7296_s0 + %s6038_s1]]  }
  0x15   :  { %s6161_s12 = sld [smem:[%s7296_s0 + %s6039_s7]]   ;;  %s6043_s7 = smov 18  }
  0x16   :  { %s6166_s20 = sld [smem:[%s7296_s0 + %s6040_s15]]   ;;  %s6044_s15 = smov 19  }
  0x17   :  { %7308 = sst [smem:[#allocation43_spill]] %s6141_s19 }
  0x18   :  { %s6171_s27 = sld [smem:[%s7296_s0 + %s6041_s22]]   ;;  %s6045_s22 = smov 20  }
  0x19   :  { %s6176_s4 = sld [smem:[%s7296_s0 + %s6042_s28]]   ;;  %s6046_s28 = smov 21  }
  0x1a   :  { %s6181_s17 = sld [smem:[%s7296_s0 + %s6043_s7]]   ;;  %s6047_s7 = smov 22  }
  0x1b   :  { %7309 = sst [smem:[#allocation44_spill]] %s6161_s12 }
  0x1c   :  { %s6186_s12 = sld [smem:[%s7296_s0 + %s6044_s15]]   ;;  %s6048_s15 = smov 23  }
  0x1d   :  { %s6191_s25 = sld [smem:[%s7296_s0 + %s6045_s22]]   ;;  %s6049_s22 = smov 24  }
  0x1e   :  { %s6196_s19 = sld [smem:[%s7296_s0 + %s6046_s28]]   ;;  %s6050_s28 = smov 25  }
  0x1f   :  { %s6201_s13 = sld [smem:[%s7296_s0 + %s6047_s7]]   ;;  %s6051_s7 = smov 26  }
  0x20   :  { %s6206_s9 = sld [smem:[%s7296_s0 + %s6048_s15]]   ;;  %s6052_s15 = smov 27  }
  0x21   :  { %s6216_s5 = sld [smem:[%s7296_s0 + %s6050_s28]]   ;;  %s6054_s28 = smov 29  }
  0x22   :  { %s6221_s21 = sld [smem:[%s7296_s0 + %s6051_s7]]  }
  0x23   :  { %7310 = sst [smem:[#allocation45_spill]] %s6191_s25 }
  0x24   :  { %7311 = sst [smem:[#allocation46_spill]] %s6196_s19 }
  0x25   :  { %s6211_s25 = sld [smem:[%s7296_s0 + %s6049_s22]]   ;;  %s6053_s22 = smov 28  }
  0x26   :  { %7312 = sst [smem:[#allocation47_spill]] %s6206_s9 }
  0x27   :  { %7313 = sst [smem:[#allocation48_spill]] %s6216_s5 }
  0x28   :  { %s6226_s9 = sld [smem:[%s7296_s0 + %s6052_s15]]  }
  0x29   :  { %s6231_s19 = sld [smem:[%s7296_s0 + %s6053_s22]]  }
  0x2a   :  { %s6236_s5 = sld [smem:[%s7296_s0 + %s6054_s28]]  }
  0x2b   :  { %64 = vsyncpa [#allocation3], 0 }
  0x2c   :  { %65 = vsyncpa [#allocation5], 0 }
  0x2d   :  { %66 = vsyncpa [#allocation8], 0 }
  0x2e   :  { %67 = vsyncpa [#allocation11], 0 }
  0x2f   :  { %68 = vsyncpa [#allocation14], 0 }
  0x30   :  { %69 = vsyncpa [#allocation17], 0 }
  0x31   :  { %70 = vsyncpa [#allocation20], 0 }
  0x32   :  { %71 = vsyncpa [#allocation23], 0 }
  0x33   :  { %72 = vsyncpa [#allocation26], 0  ;;  %s6055_s7 = smov [#allocation4]   ;;  %s6056_s11 = smov [#allocation7]  }
  0x34   :  { %s101_s10 = sshll.u32 %s6055_s7, 4  ;;  %s121_s15 = sshll.u32 %s6056_s11, 4  ;;  %s102_s10 = int_to_ptr.vmem [resolvable:$true] %s101_s10  ;;  %s122_s15 = int_to_ptr.vmem [resolvable:$true] %s121_s15 }
  0x35   :  { %s5676_s16 = scalar_lea.vmem %s102_s10, 16  ;;  %s5680_s18 = scalar_lea.vmem %s102_s10, 32 }
  0x36   :  { %p5677_p0 = scmp.ne.s32.totalorder %s102_s10, %s5676_s16  ;;  %p5681_p1 = scmp.lt.s32.totalorder %s102_s10, %s102_s10 }
  0x37   :  { %p5682_p2 = scmp.lt.s32.totalorder %s5680_s18, %s5676_s16 }
  0x39   :  { %p5683_p3 = por %p5682_p2, %p5681_p1 }
  0x3b   :  { %p5684_p4 = pnand %p5683_p3, %p5677_p0 }
  0x3d   :  { %5687 = shalt.err (!%p5684_p4)
}
  0x3e   :  { %104 = dma.hbm_to_vmem [thread:$0]  %s6126_s3, 16, %s102_s10, [#allocation5]  }
  0x3f   :  { %s5696_s0 = scalar_lea.vmem %s122_s15, 16  ;;  %s5700_s22 = scalar_lea.vmem %s122_s15, 32 }
  0x40   :  { %p5697_p5 = scmp.ne.s32.totalorder %s122_s15, %s5696_s0  ;;  %p5701_p6 = scmp.lt.s32.totalorder %s122_s15, %s122_s15 }
  0x41   :  { %p5702_p7 = scmp.lt.s32.totalorder %s5700_s22, %s5696_s0 }
  0x43   :  { %p5703_p8 = por %p5702_p7, %p5701_p6 }
  0x45   :  { %p5704_p9 = pnand %p5703_p8, %p5697_p5 }
  0x47   :  { %5707 = shalt.err (!%p5704_p9)
}
  0x48   :  { %124 = dma.hbm_to_vmem [thread:$0]  %s6136_s14, 16, %s122_s15, [#allocation8]  }
  0x49   :  { %s6057_s23 = smov [#allocation10]   ;;  %s6058_s28 = smov [#allocation13]  }
  0x4a   :  { %s144_s26 = sshll.u32 %s6057_s23, 4  ;;  %s170_s1 = sshll.u32 %s6058_s28, 4  ;;  %s145_s26 = int_to_ptr.vmem [resolvable:$true] %s144_s26  ;;  %s171_s1 = int_to_ptr.vmem [resolvable:$true] %s170_s1 }
  0x4b   :  { %s5716_s2 = scalar_lea.vmem %s145_s26, 32  ;;  %p5721_p11 = scmp.lt.s32.totalorder %s145_s26, %s145_s26 }
  0x4c   :  { %p5717_p10 = scmp.ne.s32.totalorder %s145_s26, %s5716_s2  ;;  %p5722_p12 = scmp.lt.s32.totalorder %s5716_s2, %s5716_s2 }
  0x4e   :  { %p5723_p13 = por %p5722_p12, %p5721_p11 }
  0x50   :  { %p5724_p0 = pnand %p5723_p13, %p5717_p10 }
  0x52   :  { %5727 = shalt.err (!%p5724_p0)
}
  0x53   :  { %s6059_s3 = smov 16   ;;  %s6060_s7 = smov 1  }
  0x54   :  { %150 = dma.hbm_to_vmem [thread:$0]  %s6151_s30, 32, %s145_s26, [#allocation11], %s6059_s3, %s6059_s3, %s6060_s7  }
  0x55   :  { %s5736_s14 = scalar_lea.vmem %s171_s1, 4096  ;;  %p5741_p2 = scmp.lt.s32.totalorder %s171_s1, %s171_s1 }
  0x56   :  { %p5737_p1 = scmp.ne.s32.totalorder %s171_s1, %s5736_s14  ;;  %p5742_p3 = scmp.lt.s32.totalorder %s5736_s14, %s5736_s14 }
  0x58   :  { %p5743_p4 = por %p5742_p3, %p5741_p2 }
  0x5a   :  { %p5744_p5 = pnand %p5743_p4, %p5737_p1 }
  0x5c   :  { %5747 = shalt.err (!%p5744_p5)
}
  0x5d   :  { %s6061_s10 = smov 128   ;;  %s6062_s11 = smov 8  }
  0x5e   :  { %176 = dma.hbm_to_vmem [thread:$0]  %s6166_s20, 4096, %s171_s1, [#allocation14], %s6061_s10, %s6061_s10, %s6062_s11  }
  0x5f   :  { %s6063_s15 = smov [#allocation16]   ;;  %s6064_s18 = smov [#allocation19]  }
  0x60   :  { %s194_s16 = sshll.u32 %s6063_s15, 4  ;;  %s218_s0 = sshll.u32 %s6064_s18, 4  ;;  %s195_s16 = int_to_ptr.vmem [resolvable:$true] %s194_s16  ;;  %s219_s0 = int_to_ptr.vmem [resolvable:$true] %s218_s0 }
  0x61   :  { %s5756_s30 = scalar_lea.vmem %s195_s16, 32  ;;  %p5761_p7 = scmp.lt.s32.totalorder %s195_s16, %s195_s16 }
  0x62   :  { %p5757_p6 = scmp.ne.s32.totalorder %s195_s16, %s5756_s30  ;;  %p5762_p8 = scmp.lt.s32.totalorder %s5756_s30, %s5756_s30 }
  0x64   :  { %p5763_p9 = por %p5762_p8, %p5761_p7 }
  0x66   :  { %p5764_p10 = pnand %p5763_p9, %p5757_p6 }
  0x68   :  { %5767 = shalt.err (!%p5764_p10)
}
  0x69   :  { %200 = dma.hbm_to_vmem [thread:$0]  %s6176_s4, 32, %s195_s16, [#allocation17], %s6059_s3, %s6059_s3, %s6060_s7  }
  0x6a   :  { %s5776_s22 = scalar_lea.vmem %s219_s0, 16384  ;;  %p5781_p12 = scmp.lt.s32.totalorder %s219_s0, %s219_s0 }
  0x6b   :  { %p5777_p11 = scmp.ne.s32.totalorder %s219_s0, %s5776_s22  ;;  %p5782_p13 = scmp.lt.s32.totalorder %s5776_s22, %s5776_s22 }
  0x6d   :  { %p5783_p0 = por %p5782_p13, %p5781_p12 }
  0x6f   :  { %p5784_p1 = pnand %p5783_p0, %p5777_p11 }
  0x71   :  { %5787 = shalt.err (!%p5784_p1)
}
  0x72   :  { %s6065_s20 = smov 512   ;;  %s6066_s23 = smov 32  }
  0x73   :  { %224 = dma.hbm_to_vmem [thread:$0]  %s6186_s12, 16384, %s219_s0, [#allocation20], %s6065_s20, %s6065_s20, %s6066_s23  }
  0x74   :  { %s6067_s26 = smov [#allocation22]   ;;  %s6068_s1 = smov [#allocation25]  }
  0x75   :  { %s244_s28 = sshll.u32 %s6067_s26, 4  ;;  %s267_s2 = sshll.u32 %s6068_s1, 4  ;;  %s245_s28 = int_to_ptr.vmem [resolvable:$true] %s244_s28  ;;  %s268_s2 = int_to_ptr.vmem [resolvable:$true] %s267_s2 }
  0x76   :  { %s5796_s14 = scalar_lea.vmem %s245_s28, 32  ;;  %p5801_p3 = scmp.lt.s32.totalorder %s245_s28, %s245_s28 }
  0x77   :  { %p5797_p2 = scmp.ne.s32.totalorder %s245_s28, %s5796_s14  ;;  %p5802_p4 = scmp.lt.s32.totalorder %s5796_s14, %s5796_s14 }
  0x79   :  { %p5803_p5 = por %p5802_p4, %p5801_p3 }
  0x7b   :  { %p5804_p6 = pnand %p5803_p5, %p5797_p2 }
  0x7d   :  { %5807 = shalt.err (!%p5804_p6)
}
  0x7e   :  { %250 = dma.hbm_to_vmem [thread:$0]  %s6201_s13, 32, %s245_s28, [#allocation23], %s6059_s3, %s6059_s3, %s6060_s7  }
  0x7f   :  { %s5816_s4 = scalar_lea.vmem %s268_s2, 16  ;;  %s5820_s12 = scalar_lea.vmem %s268_s2, 32 }
  0x80   :  { %p5817_p7 = scmp.ne.s32.totalorder %s268_s2, %s5816_s4  ;;  %p5821_p8 = scmp.lt.s32.totalorder %s268_s2, %s268_s2 }
  0x81   :  { %p5822_p9 = scmp.lt.s32.totalorder %s5820_s12, %s5816_s4 }
  0x83   :  { %p5823_p10 = por %p5822_p9, %p5821_p8 }
  0x85   :  { %p5824_p11 = pnand %p5823_p10, %p5817_p7 }
  0x87   :  { %5827 = shalt.err (!%p5824_p11)
}
  0x88   :  { %270 = dma.hbm_to_vmem [thread:$0]  %s6211_s25, 16, %s268_s2, [#allocation26]  }
  0x89   :  { %s6069_s15 = smov [#allocation2]   ;;  %s6070_s18 = smov [#allocation6]  }
  0x8a   :  { %s91_s16 = sshll.u32 %s6069_s15, 4  ;;  %s111_s0 = sshll.u32 %s6070_s18, 4  ;;  %s92_s16 = int_to_ptr.vmem [resolvable:$true] %s91_s16  ;;  %s112_s0 = int_to_ptr.vmem [resolvable:$true] %s111_s0 }
  0x8b   :  { %s5836_s30 = scalar_lea.vmem %s92_s16, 16  ;;  %s5840_s22 = scalar_lea.vmem %s92_s16, 32 }
  0x8c   :  { %p5837_p12 = scmp.ne.s32.totalorder %s92_s16, %s5836_s30  ;;  %p5841_p13 = scmp.lt.s32.totalorder %s92_s16, %s92_s16 }
  0x8d   :  { %p5842_p0 = scmp.lt.s32.totalorder %s5840_s22, %s5836_s30 }
  0x8f   :  { %p5843_p1 = por %p5842_p0, %p5841_p13 }
  0x91   :  { %p5844_p2 = pnand %p5843_p1, %p5837_p12 }
  0x93   :  { %5847 = shalt.err (!%p5844_p2)
}
  0x94   :  { %94 = dma.hbm_to_vmem [thread:$0]  %s6121_s29, 16, %s92_s16, [#allocation3]  }
  0x95   :  { %s5856_s13 = scalar_lea.vmem %s112_s0, 16  ;;  %s5860_s20 = scalar_lea.vmem %s112_s0, 32 }
  0x96   :  { %p5857_p3 = scmp.ne.s32.totalorder %s112_s0, %s5856_s13  ;;  %p5861_p4 = scmp.lt.s32.totalorder %s112_s0, %s112_s0 }
  0x97   :  { %p5862_p5 = scmp.lt.s32.totalorder %s5860_s20, %s5856_s13 }
  0x99   :  { %p5863_p6 = por %p5862_p5, %p5861_p4 }
  0x9b   :  { %p5864_p7 = pnand %p5863_p6, %p5857_p3 }
  0x9d   :  { %5867 = shalt.err (!%p5864_p7)
}
  0x9e   :  { %114 = dma.hbm_to_vmem [thread:$0]  %s6131_s8, 16, %s112_s0, [#allocation5]  }
  0x9f   :  { %s6071_s25 = smov [#allocation9]   ;;  %s6072_s26 = smov [#allocation12]  }
  0xa0   :  { %s132_s23 = sshll.u32 %s6071_s25, 4  ;;  %s156_s28 = sshll.u32 %s6072_s26, 4  ;;  %s133_s23 = int_to_ptr.vmem [resolvable:$true] %s132_s23  ;;  %s157_s28 = int_to_ptr.vmem [resolvable:$true] %s156_s28 }
  0xa1   :  { %s5876_s1 = scalar_lea.vmem %s133_s23, 32  ;;  %p5881_p9 = scmp.lt.s32.totalorder %s133_s23, %s133_s23 }
  0xa2   :  { %p5877_p8 = scmp.ne.s32.totalorder %s133_s23, %s5876_s1  ;;  %p5882_p10 = scmp.lt.s32.totalorder %s5876_s1, %s5876_s1 }
  0xa4   :  { %p5883_p11 = por %p5882_p10, %p5881_p9 }
  0xa6   :  { %p5884_p12 = pnand %p5883_p11, %p5877_p8 }
  0xa8   :  { %5887 = shalt.err (!%p5884_p12)
}
  0xa9   :  { %138 = dma.hbm_to_vmem [thread:$0]  %s6146_s24, 32, %s133_s23, [#allocation8], %s6059_s3, %s6059_s3, %s6060_s7  }
  0xaa   :  { %s5896_s29 = scalar_lea.vmem %s157_s28, 12288  ;;  %p5901_p0 = scmp.lt.s32.totalorder %s157_s28, %s157_s28 }
  0xab   :  { %p5897_p13 = scmp.ne.s32.totalorder %s157_s28, %s5896_s29  ;;  %p5902_p1 = scmp.lt.s32.totalorder %s5896_s29, %s5896_s29 }
  0xad   :  { %p5903_p2 = por %p5902_p1, %p5901_p0 }
  0xaf   :  { %p5904_p3 = pnand %p5903_p2, %p5897_p13 }
  0xb1   :  { %5907 = shalt.err (!%p5904_p3)
}
  0xb2   :  { %s6073_s8 = smov 384   ;;  %s6074_s2 = smov 24  }
  0xb3   :  { %162 = dma.hbm_to_vmem [thread:$0]  %s6156_s6, 12288, %s157_s28, [#allocation11], %s6073_s8, %s6073_s8, %s6074_s2  }
  0xb4   :  { %s6075_s14 = smov [#allocation15]   ;;  %s6076_s12 = smov [#allocation18]  }
  0xb5   :  { %s182_s4 = sshll.u32 %s6075_s14, 4  ;;  %s206_s15 = sshll.u32 %s6076_s12, 4  ;;  %s183_s4 = int_to_ptr.vmem [resolvable:$true] %s182_s4  ;;  %s207_s15 = int_to_ptr.vmem [resolvable:$true] %s206_s15 }
  0xb6   :  { %s5916_s16 = scalar_lea.vmem %s183_s4, 32  ;;  %p5921_p5 = scmp.lt.s32.totalorder %s183_s4, %s183_s4 }
  0xb7   :  { %p5917_p4 = scmp.ne.s32.totalorder %s183_s4, %s5916_s16  ;;  %p5922_p6 = scmp.lt.s32.totalorder %s5916_s16, %s5916_s16 }
  0xb9   :  { %p5923_p7 = por %p5922_p6, %p5921_p5 }
  0xbb   :  { %p5924_p8 = pnand %p5923_p7, %p5917_p4 }
  0xbd   :  { %5927 = shalt.err (!%p5924_p8)
}
  0xbe   :  { %188 = dma.hbm_to_vmem [thread:$0]  %s6171_s27, 32, %s183_s4, [#allocation14], %s6059_s3, %s6059_s3, %s6060_s7  }
  0xbf   :  { %s5936_s24 = scalar_lea.vmem %s207_s15, 32  ;;  %p5941_p10 = scmp.lt.s32.totalorder %s207_s15, %s207_s15 }
  0xc0   :  { %p5937_p9 = scmp.ne.s32.totalorder %s207_s15, %s5936_s24  ;;  %p5942_p11 = scmp.lt.s32.totalorder %s5936_s24, %s5936_s24 }
  0xc2   :  { %p5943_p12 = por %p5942_p11, %p5941_p10 }
  0xc4   :  { %p5944_p13 = pnand %p5943_p12, %p5937_p9 }
  0xc6   :  { %5947 = shalt.err (!%p5944_p13)
}
  0xc7   :  { %212 = dma.hbm_to_vmem [thread:$0]  %s6181_s17, 32, %s207_s15, [#allocation17], %s6059_s3, %s6059_s3, %s6060_s7  }
  0xc8   :  { %s6077_s6 = smov [#allocation21]   ;;  %s6078_s0 = smov [#allocation24]  }
  0xc9   :  { %s232_s18 = sshll.u32 %s6077_s6, 4  ;;  %s257_s30 = sshll.u32 %s6078_s0, 4  ;;  %s233_s18 = int_to_ptr.vmem [resolvable:$true] %s232_s18  ;;  %s258_s30 = int_to_ptr.vmem [resolvable:$true] %s257_s30 }
  0xca   :  { %s5956_s22 = scalar_lea.vmem %s233_s18, 16384  ;;  %p5961_p1 = scmp.lt.s32.totalorder %s233_s18, %s233_s18 }
  0xcb   :  { %p5957_p0 = scmp.ne.s32.totalorder %s233_s18, %s5956_s22  ;;  %p5962_p2 = scmp.lt.s32.totalorder %s5956_s22, %s5956_s22 }
  0xcd   :  { %p5963_p3 = por %p5962_p2, %p5961_p1 }
  0xcf   :  { %p5964_p4 = pnand %p5963_p3, %p5957_p0 }
  0xd1   :  { %5967 = shalt.err (!%p5964_p4)
}
  0xd2   :  { %s7314_s27 = sld [smem:[#allocation46_spill]]  ;;  %s5976_s13 = scalar_lea.vmem %s258_s30, 16 }
  0xd3   :  { %p5977_p5 = scmp.ne.s32.totalorder %s258_s30, %s5976_s13  ;;  %s5980_s17 = scalar_lea.vmem %s258_s30, 32 }
  0xd4   :  { %p5981_p6 = scmp.lt.s32.totalorder %s258_s30, %s258_s30  ;;  %p5982_p7 = scmp.lt.s32.totalorder %s5980_s17, %s5976_s13 }
  0xd6   :  { %p5983_p8 = por %p5982_p7, %p5981_p6 }
  0xd8   :  { %238 = dma.hbm_to_vmem [thread:$0]  %s7314_s27, 16384, %s233_s18, [#allocation20], %s6061_s10, %s6061_s10, %s6062_s11  }
  0xd9   :  { %p5984_p9 = pnand %p5983_p8, %p5977_p5 }
  0xdb   :  { %5987 = shalt.err (!%p5984_p9)
}
  0xdc   :  { %s7315_s3 = sld [smem:[#allocation47_spill]]  ;;  %s6079_s7 = smov [#allocation27]  }
  0xdd   :  { %s279_s20 = sshll.u32 %s6079_s7, 4  ;;  %s280_s20 = int_to_ptr.vmem [resolvable:$true] %s279_s20 }
  0xde   :  { %s5996_s25 = scalar_lea.vmem %s280_s20, 16  ;;  %s6000_s23 = scalar_lea.vmem %s280_s20, 32 }
  0xdf   :  { %p5997_p10 = scmp.ne.s32.totalorder %s280_s20, %s5996_s25  ;;  %p6001_p11 = scmp.lt.s32.totalorder %s280_s20, %s280_s20 }
  0xe0   :  { %p6002_p12 = scmp.lt.s32.totalorder %s6000_s23, %s5996_s25 }
  0xe2   :  { %260 = dma.hbm_to_vmem [thread:$0]  %s7315_s3, 16, %s258_s30, [#allocation23]  }
  0xe3   :  { %p6003_p13 = por %p6002_p12, %p6001_p11 }
  0xe5   :  { %p6004_p0 = pnand %p6003_p13, %p5997_p10 }
  0xe7   :  { %6007 = shalt.err (!%p6004_p0)
}
  0xe8   :  { %282 = dma.hbm_to_vmem [thread:$0]  %s6221_s21, 16, %s280_s20, [#allocation26]  }
  0xe9   :  { %6008 = dma.done.wait [#allocation3], 16  }
  0xea   :  { %6009 = vsyncadd [#allocation3], 4294967280 }
  0xeb   :  { %6010 = dma.done.wait [#allocation5], 32  }
  0xec   :  { %6011 = vsyncadd [#allocation5], 4294967264 }
  0xed   :  { %6012 = dma.done.wait [#allocation8], 48  }
  0xee   :  { %6013 = vsyncadd [#allocation8], 4294967248 }
  0xef   :  { %6014 = dma.done.wait [#allocation11], 12320  }
  0xf0   :  { %6015 = vsyncadd [#allocation11], 4294954976 }
  0xf1   :  { %6016 = dma.done.wait [#allocation14], 4128  }
  0xf2   :  { %6017 = vsyncadd [#allocation14], 4294963168 }
  0xf3   :  { %6018 = dma.done.wait [#allocation17], 64  }
  0xf4   :  { %6019 = vsyncadd [#allocation17], 4294967232 }
  0xf5   :  { %6020 = dma.done.wait [#allocation20], 32768  }
  0xf6   :  { %6021 = vsyncadd [#allocation20], 4294934528 }
  0xf7   :  { %6022 = dma.done.wait [#allocation23], 48  }
  0xf8   :  { %6023 = vsyncadd [#allocation23], 4294967248 }
  0xf9   :  { %6024 = dma.done.wait [#allocation26], 32  }
  0xfa   :  { %6025 = vsyncadd [#allocation26], 4294967264  ;;  %s7316_s10 = sld [smem:[#allocation41_spill]]  ;;  %v6080_v0 = vmov 0.0   ;;  %v6081_v1 = vmov 0   ;;  %vm6082_vm0 = vmmov 0   ;;  %v362_v7 = vlaneseq }
  0xfb   :  { %s7317_s21 = sld [smem:[#allocation37_spill]]  ;;  %4956 = vmatprep.subr.mxu0 %v6080_v0  ;;  %5494 = vset.pattern.permute.xlu0 %v6081_v1  ;;  %vm381_vm1 = vcmask 1041408   ;;  %vm377_vm2 = vcmask 80896   ;;  %v4530_v9 = vld [vmem:[#allocation6] ss:$0 sm:$0xff]  ;;  %v614_v36 = vld [vmem:[#allocation12 + $0x170] sm:$0xff] }
  0xfc   :  { %s7318_s11 = sld [smem:[#allocation38_spill]]  ;;  %4960 = vmatprep.mubr.msk.f32.mxu0 %vm6082_vm0, %v6080_v0  ;;  %697 = vmatprep.mubr.f32.mxu1 %v6080_v0  ;;  %v6293_v8 = vshrl.u32 %v362_v7, 7  ;;  %v4531_v11 = vld [vmem:[#allocation7] ss:$0 sm:$0xff]  ;;  %v4535_v15 = vld [vmem:[#allocation2] ss:$0 sm:$0xff] }
  0xfd   :  { %s7319_s26 = sld [smem:[#allocation39_spill]]  ;;  %v4536_v19 = vld [vmem:[#allocation4] ss:$0 sm:$0xff]  ;;  %v613_v37 = vld [vmem:[#allocation12 + $0x168] sm:$0xff]  ;;  %v615_v38 = vld [vmem:[#allocation12 + $0x178] sm:$0xff]  ;;  %633 = vmatprep.subr.mxu1 %v614_v36  ;;  %vm882_vm7 = vcmask 195584  }
  0xfe   :  { %s7320_s28 = sld [smem:[#allocation43_spill]]  ;;  %v6296_v10 = vsub.s32 0, %v6293_v8  ;;  %v6301_v18 = vsub.s32 2, %v6293_v8  ;;  %v6311_v28 = vsub.s32 1, %v6293_v8  ;;  %v611_v39 = vld [vmem:[#allocation12 + $0x158] sm:$0xff]  ;;  %v610_v40 = vld [vmem:[#allocation12 + $0x150] sm:$0xff]  ;;  %634 = vmatpush1.msra.mxu1 %v613_v37 }
  0xff   :  { %s7321_s1 = sld [smem:[#allocation42_spill]]  ;;  %v612_v41 = vld [vmem:[#allocation12 + $0x160] sm:$0xff]  ;;  %v609_v43 = vld [vmem:[#allocation12 + $0x148] sm:$0xff]  ;;  %635 = vmatprep.subr.mxu1 %v611_v39  ;;  %v607_v44 = vld [vmem:[#allocation12 + $0x138] sm:$0xff]  ;;  %vm4486_vm12 = vcmask 23552  }
 0x100   :  { %v369_v2 = vld [vmem:[%s7316_s10 + $0x8] sm:$0x3]  ;;  %v368_v4 = vld [vmem:[%s7316_s10] sm:$0xff]  ;;  %636 = vmatpush1.msra.mxu1 %v610_v40  ;;  %v606_v46 = vld [vmem:[#allocation12 + $0x130] sm:$0xff]  ;;  %s7322_s29 = sld [smem:[#allocation44_spill]] }
 0x101   :  { %v339_v3 = vld [vmem:[%s7317_s21] sm:$0xff]  ;;  %4957 = vmatpush3.msk.msra.mxu0 %vm381_vm1, %v369_v2  ;;  %v602_v52 = vld [vmem:[#allocation12 + $0x110] sm:$0xff]  ;;  %v603_v54 = vld [vmem:[#allocation12 + $0x118] sm:$0xff]  ;;  %s7323_s8 = sld [smem:[#allocation40_spill]] }
 0x102   :  { %343 = vperm.xlu0 %5494, %v339_v3   ;;  %v367_v5 = vld [vmem:[%s7318_s11] sm:$0xff]  ;;  %4958 = vmatprep.subr.mxu0 %v6080_v0  ;;  %v599_v55 = vld [vmem:[#allocation12 + $0xf8] sm:$0xff]  ;;  %v598_v56 = vld [vmem:[#allocation12 + $0xf0] sm:$0xff]  ;;  %s7324_s2 = sld [smem:[#allocation45_spill]] }
 0x103   :  { %v461_v6 = vld [vmem:[%s7319_s26] sm:$0xff]  ;;  %4959 = vmatpush3.msra.mxu0 %v368_v4  ;;  %v595_v59 = vld [vmem:[#allocation12 + $0xd8] sm:$0xff]  ;;  %v594_v63 = vld [vmem:[#allocation12 + $0xd0] sm:$0xff]  ;;  %s7325_s14 = sld [smem:[#allocation48_spill]] }
 0x104   :  { %4961 = vmatmul.mubr.msk.f32.vlgmr.msra.gmra.mxu0 %vm377_vm2, %v367_v5  ;;  %4963 = vmatprep.subr.mxu0 %v6080_v0  ;;  %v338_v13 = vld [vmem:[%s7320_s28] sm:$0x7]  ;;  %v605_v45 = vld [vmem:[#allocation12 + $0x128] sm:$0xff]  ;;  %v590_v1 = vld [vmem:[#allocation12 + $0xb0] sm:$0xff] }
 0x105   :  { %4995 = vmatprep.mubr.msk.f32.mxu0 %vm6082_vm0, %v6080_v0  ;;  %v365_v17 = vrot.slane %v338_v13, %v6296_v10  ;;  %v487_v25 = vrot.slane %v338_v13, %v6301_v18  ;;  %v4532_v29 = vld [vmem:[%s7321_s1] ss:$0 sm:$0xff]  ;;  %v459_v32 = vrot.slane %v338_v13, %v6311_v28  ;;  %4964 = vmatpush3.msra.mxu0 %v615_v38  ;;  %v601_v53 = vld [vmem:[#allocation12 + $0x108] sm:$0xff]  ;;  %v591_v3 = vld [vmem:[#allocation12 + $0xb8] sm:$0xff] }
 0x106   :  { %465 = vperm.xlu0 %5494, %v461_v6   ;;  %4965 = vmatprep.subr.mxu0 %v6080_v0  ;;  %v608_v42 = vld [vmem:[#allocation12 + $0x140] sm:$0xff]  ;;  %v597_v60 = vld [vmem:[#allocation12 + $0xe8] sm:$0xff]  ;;  %v587_v4 = vld [vmem:[#allocation12 + $0x98] sm:$0xff] }
 0x107   :  { %4966 = vmatpush3.msra.mxu0 %v612_v41  ;;  %637 = vmatprep.subr.mxu1 %v608_v42  ;;  %v604_v47 = vld [vmem:[#allocation12 + $0x120] sm:$0xff]  ;;  %v593_v61 = vld [vmem:[#allocation12 + $0xc8] sm:$0xff]  ;;  %v586_v5 = vld [vmem:[#allocation12 + $0x90] sm:$0xff] }
 0x108   :  { %4967 = vmatprep.subr.mxu0 %v6080_v0  ;;  %638 = vmatpush1.msra.mxu1 %v607_v44  ;;  %v600_v57 = vld [vmem:[#allocation12 + $0x100] sm:$0xff]  ;;  %v589_v2 = vld [vmem:[#allocation12 + $0xa8] sm:$0xff] }
 0x109   :  { %4968 = vmatpush3.msra.mxu0 %v609_v43  ;;  %639 = vmatprep.subr.mxu1 %v605_v45  ;;  %v596_v58 = vld [vmem:[#allocation12 + $0xe0] sm:$0xff]  ;;  %v581_v13 = vld [vmem:[#allocation12 + $0x68] sm:$0xff]  ;;  %v4541_v45 = vld [vmem:[#allocation9] ss:$0 sm:$0xff] }
 0x10a   :  { %4969 = vmatprep.subr.mxu0 %v6080_v0  ;;  %640 = vmatpush1.msra.mxu1 %v604_v47  ;;  %v592_v62 = vld [vmem:[#allocation12 + $0xc0] sm:$0xff]  ;;  %v4542_v47 = vld [vmem:[#allocation10] ss:$0 sm:$0xff] }
 0x10b   :  { %4970 = vmatpush3.msra.mxu0 %v606_v46  ;;  %641 = vmatprep.subr.mxu1 %v602_v52  ;;  %v588_v6 = vld [vmem:[#allocation12 + $0xa0] sm:$0xff] }
 0x10c   :  { %4971 = vmatprep.subr.mxu0 %v6080_v0  ;;  %642 = vmatpush1.msra.mxu1 %v601_v53 }
 0x10d   :  { %4972 = vmatpush3.msra.mxu0 %v603_v54  ;;  %643 = vmatprep.subr.mxu1 %v599_v55 }
 0x10e   :  { %4973 = vmatprep.subr.mxu0 %v6080_v0  ;;  %644 = vmatpush1.msra.mxu1 %v598_v56 }
 0x10f   :  { %4974 = vmatpush3.msra.mxu0 %v600_v57  ;;  %645 = vmatprep.subr.mxu1 %v596_v58 }
 0x110   :  { %4975 = vmatprep.subr.mxu0 %v6080_v0  ;;  %646 = vmatpush1.msra.mxu1 %v595_v59 }
 0x111   :  { %4976 = vmatpush3.msra.mxu0 %v597_v60  ;;  %647 = vmatprep.subr.mxu1 %v593_v61 }
 0x112   :  { %4977 = vmatprep.subr.mxu0 %v6080_v0  ;;  %648 = vmatpush1.msra.mxu1 %v592_v62 }
 0x113   :  { %4978 = vmatpush3.msra.mxu0 %v594_v63  ;;  %649 = vmatprep.subr.mxu1 %v590_v1 }
 0x114   :  { %4979 = vmatprep.subr.mxu0 %v6080_v0  ;;  %650 = vmatpush1.msra.mxu1 %v589_v2 }
 0x115   :  { %4980 = vmatpush3.msra.mxu0 %v591_v3  ;;  %651 = vmatprep.subr.mxu1 %v587_v4 }
 0x116   :  { %4981 = vmatprep.subr.mxu0 %v6080_v0  ;;  %652 = vmatpush1.msra.mxu1 %v586_v5  ;;  %v6354_v5 = vand.u32 127, %v362_v7 }
 0x117   :  { %4982 = vmatpush3.msra.mxu0 %v588_v6  ;;  %v616_v6 = vld [vmem:[%s7322_s29] sm:$0x7] }
 0x118   :  { %4983 = vmatprep.subr.mxu0 %v6080_v0  ;;  %vm495_vm3 = vcmp.lt.s32.totalorder %v6354_v5, 32  ;;  %vm499_vm4 = vcmp.ge.s32.totalorder %v6354_v5, 32  ;;  %vm500_vm5 = vcmp.lt.s32.totalorder %v6354_v5, 64  ;;  %vm504_vm8 = vcmp.ge.s32.totalorder %v6354_v5, 64 }
 0x119   :  { %vm501_vm6 = vmand %vm499_vm4, %vm500_vm5  ;;  %vm505_vm9 = vcmp.lt.s32.totalorder %v6354_v5, 96  ;;  %vm509_vm11 = vcmp.ge.s32.totalorder %v6354_v5, 96 }
 0x11a   :  { %vm506_vm10 = vmand %vm504_vm8, %vm505_vm9 }
 0x17d   :  { %v344_v12 = vpop.permute.xlu0 %343 }
 0x17e   :  { %v352_v14 = vmul.f32 %v4530_v9, %v344_v12  ;;  %v584_v9 = vld [vmem:[#allocation12 + $0x80] sm:$0xff]  ;;  %v585_v12 = vld [vmem:[#allocation12 + $0x88] sm:$0xff] }
 0x17f   :  { %653 = vmatprep.subr.mxu1 %v584_v9  ;;  %4984 = vmatpush3.msra.mxu0 %v585_v12 }
 0x180   :  { %v360_v16 = vadd.f32 %v4531_v11, %v352_v14  ;;  %v583_v11 = vld [vmem:[#allocation12 + $0x78] sm:$0xff]  ;;  %v580_v14 = vld [vmem:[#allocation12 + $0x60] sm:$0xff]  ;;  %4985 = vmatprep.subr.mxu0 %v6080_v0 }
 0x181   :  { %v466_v20 = vpop.permute.xlu0 %465  ;;  %654 = vmatpush1.msra.mxu1 %v583_v11 }
 0x182   :  { %v361_v21 = vmax.f32 %v360_v16, 0.0  ;;  %v474_v22 = vmul.f32 %v4535_v15, %v466_v20  ;;  %v582_v15 = vld [vmem:[#allocation12 + $0x70] sm:$0xff]  ;;  %655 = vmatprep.subr.mxu1 %v581_v13  ;;  %v575_v20 = vld [vmem:[#allocation12 + $0x38] sm:$0xff] }
 0x183   :  { %v578_v16 = vld [vmem:[#allocation12 + $0x50] sm:$0xff]  ;;  %656 = vmatpush1.msra.mxu1 %v580_v14  ;;  %4986 = vmatpush3.msra.mxu0 %v582_v15  ;;  %v629_v14 = vrot.slane %v616_v6, %v6301_v18 }
 0x184   :  { %v482_v23 = vadd.f32 %v4536_v19, %v474_v22  ;;  %v6303_v24 = vadd.f32 %v365_v17, %v361_v21  ;;  %v577_v17 = vld [vmem:[#allocation12 + $0x48] sm:$0xff]  ;;  %v579_v19 = vld [vmem:[#allocation12 + $0x58] sm:$0xff]  ;;  %657 = vmatprep.subr.mxu1 %v578_v16  ;;  %4987 = vmatprep.subr.mxu0 %v6080_v0  ;;  %v574_v21 = vld [vmem:[#allocation12 + $0x30] sm:$0xff] }
 0x185   :  { %v576_v22 = vld [vmem:[#allocation12 + $0x40] sm:$0xff]  ;;  %658 = vmatpush1.msra.mxu1 %v577_v17  ;;  %4988 = vmatpush3.msra.mxu0 %v579_v19  ;;  %v625_v17 = vrot.slane %v616_v6, %v6311_v28 }
 0x186   :  { %v483_v26 = vmax.f32 %v482_v23, 0.0  ;;  %516 = vadd.xlane.f32.xlu1 %v6303_v24  ;;  %v572_v23 = vld [vmem:[#allocation12 + $0x20] sm:$0xff]  ;;  %659 = vmatprep.subr.mxu1 %v575_v20 }
 0x187   :  { %4989 = vmatprep.subr.mxu0 %v6080_v0  ;;  %660 = vmatpush1.msra.mxu1 %v574_v21 }
 0x188   :  { %v6307_v27 = vadd.f32 %v487_v25, %v483_v26  ;;  %v571_v25 = vld [vmem:[#allocation12 + $0x18] sm:$0xff]  ;;  %v573_v26 = vld [vmem:[#allocation12 + $0x28] sm:$0xff]  ;;  %4990 = vmatpush3.msra.mxu0 %v576_v22  ;;  %661 = vmatprep.subr.mxu1 %v572_v23  ;;  %v6365_v22 = vsel %vm495_vm3, 1.0, %v6080_v0 }
 0x189   :  { %4991 = vmatprep.subr.mxu0 %v6080_v0  ;;  %662 = vmatpush1.msra.mxu1 %v571_v25 }
 0x18a   :  { %520 = vadd.xlane.f32.xlu0 %v6307_v27  ;;  %4992 = vmatpush3.msra.mxu0 %v573_v26 }
 0x18b   :  { %4993 = vmatprep.subr.mxu0 %v6080_v0 }
 0x1c4   :  { %v451_v30 = vpop.f32.mrf.mxu0 }
 0x1c5   :  { %v452_v31 = vadd.f32 %v4532_v29, %v451_v30  ;;  %v569_v29 = vld [vmem:[#allocation12 + $0x8] sm:$0xff]  ;;  %v568_v30 = vld [vmem:[#allocation12] sm:$0xff] }
 0x1c6   :  { %v4962_v33 = vpop.f32.mrf.mxu0  ;;  %663 = vmatprep.subr.mxu1 %v569_v29 }
 0x1c7   :  { %v455_v34 = vmax.f32 %v452_v31, 0.0  ;;  %v570_v31 = vld [vmem:[#allocation12 + $0x10] sm:$0xff]  ;;  %664 = vmatpush1.msra.mxu1 %v568_v30 }
 0x1c8   :  { %4994 = vmatpush3.msra.mxu0 %v570_v31  ;;  %5004 = vmatprep.subr.mxu1 %v6080_v0 }
 0x1c9   :  { %v6315_v35 = vadd.f32 %v459_v32, %v455_v34  ;;  %5049 = vmatprep.subr.mxu0 %v6080_v0 }
 0x1cb   :  { %518 = vadd.xlane.f32.xlu1 %v6315_v35 }
 0x20f   :  { %v517_v48 = vpop.xlane.xlu1 %516 }
 0x210   :  { %v523_v49 = vmul.f32 0.0078125, %v517_v48 }
 0x212   :  { %v6323_v50 = vsub.f32 %v6303_v24, %v523_v49 }
 0x213   :  { %v521_v32 = vpop.xlane.xlu0 %520 }
 0x214   :  { %v529_v51 = vmul.f32 %v6323_v50, %v6323_v50  ;;  %v525_v34 = vmul.f32 0.0078125, %v521_v32 }
 0x216   :  { %532 = vadd.xlane.f32.xlu1 %v529_v51  ;;  %v528_v38 = vsub.f32 %v6307_v27, %v525_v34 }
 0x218   :  { %v531_v40 = vmul.f32 %v528_v38, %v528_v38 }
 0x254   :  { %v519_v33 = vpop.xlane.xlu1 %518 }
 0x255   :  { %v524_v36 = vmul.f32 0.0078125, %v519_v33  ;;  %v621_v33 = vrot.slane %v616_v6, %v6296_v10 }
 0x257   :  { %v527_v37 = vsub.f32 %v6315_v35, %v524_v36 }
 0x259   :  { %v530_v39 = vmul.f32 %v527_v37, %v527_v37 }
 0x25b   :  { %534 = vadd.xlane.f32.xlu1 %v530_v39 }
 0x25f   :  { %536 = vadd.xlane.f32.xlu1 %v531_v40 }
 0x29f   :  { %v533_v41 = vpop.xlane.xlu1 %532 }
 0x2a0   :  { %v538_v42 = vmul.f32 0.0078125, %v533_v41  ;;  %v6399_v41 = vsel %vm501_vm6, 1.0, %v6080_v0 }
 0x2a2   :  { %v541_v43 = vadd.f32 1e-05, %v538_v42 }
 0x2a4   :  { %5495 = vrsqrt.f32 %v541_v43 }
 0x2b1   :  { %v5496_v44 = vpop.eup %5495 }
 0x2b2   :  { %v547_v46 = vmul.f32 %v5496_v44, %v6323_v50 }
 0x2b4   :  { %v556_v48 = vmul.f32 %v4541_v45, %v547_v46 }
 0x2b6   :  { %v565_v49 = vadd.f32 %v4542_v47, %v556_v48 }
 0x2b8   :  { %698 = vmatmul.mubr.f32.vlgmr.msra.gmra.mxu1 %v565_v49  ;;  %4996 = vmatmul.mubr.f32.vlgmr.msra.gmra.mxu0 %v565_v49 }
 0x2b9   :  { %703 = vmatprep.mubr.f32.mxu1 %v6080_v0  ;;  %4998 = vmatprep.mubr.msk.f32.mxu0 %vm6082_vm0, %v6080_v0 }
 0x2e4   :  { %v535_v51 = vpop.xlane.xlu1 %534 }
 0x2e5   :  { %v539_v52 = vmul.f32 0.0078125, %v535_v51 }
 0x2e7   :  { %v542_v53 = vadd.f32 1e-05, %v539_v52 }
 0x2e8   :  { %v537_v54 = vpop.xlane.xlu1 %536 }
 0x2e9   :  { %5497 = vrsqrt.f32 %v542_v53  ;;  %v540_v55 = vmul.f32 0.0078125, %v537_v54 }
 0x2eb   :  { %v543_v56 = vadd.f32 1e-05, %v540_v55 }
 0x2ed   :  { %5499 = vrsqrt.f32 %v543_v56 }
 0x2f6   :  { %v5498_v57 = vpop.eup %5497 }
 0x2f7   :  { %v548_v50 = vmul.f32 %v5498_v57, %v527_v37 }
 0x2f9   :  { %v557_v58 = vmul.f32 %v4541_v45, %v548_v50  ;;  %v6442_v50 = vld [vmem:[%s7323_s8] sm:$0xff] }
 0x2fa   :  { %v5500_v59 = vpop.eup %5499 }
 0x2fb   :  { %v566_v60 = vadd.f32 %v4542_v47, %v557_v58  ;;  %v549_v61 = vmul.f32 %v5500_v59, %v528_v38 }
 0x2fd   :  { %704 = vmatmul.mubr.f32.gmra.mxu1 %v566_v60  ;;  %4999 = vmatmul.mubr.f32.gmra.mxu0 %v566_v60  ;;  %v558_v62 = vmul.f32 %v4541_v45, %v549_v61 }
 0x2fe   :  { %709 = vmatprep.mubr.f32.mxu1 %v6080_v0  ;;  %5001 = vmatprep.mubr.msk.f32.mxu0 %vm6082_vm0, %v6080_v0 }
 0x2ff   :  { %v567_v63 = vadd.f32 %v4542_v47, %v558_v62  ;;  %v6447_v62 = vld [vmem:[%s7323_s8 + $0x8] sm:$0xff] }
 0x301   :  { %710 = vmatmul.mubr.f32.gmra.mxu1 %v567_v63  ;;  %5002 = vmatmul.mubr.f32.gmra.mxu0 %v567_v63 }
 0x302   :  { %5010 = vmatprep.mubr.msk.f32.mxu1 %vm6082_vm0, %v6080_v0  ;;  %5055 = vmatprep.mubr.msk.f32.mxu0 %vm6082_vm0, %v6080_v0 }
 0x378   :  { %v782_v1 = vpop.f32.mrf.mxu0  ;;  %v699_v3 = vpop.f32.mrf.mxu1 }
 0x379   :  { %v6367_v23 = vadd.f32 %v782_v1, %v629_v14  ;;  %v700_v37 = vadd.f32 %v699_v3, %v621_v33 }
 0x37a   :  { %v4997_v2 = vpop.f32.mrf.mxu0  ;;  %v701_v4 = vpop.f32.mrf.mxu1 }
 0x37b   :  { %v916_v32 = vmul.f32 %v6365_v22, %v6367_v23  ;;  %v6385_v34 = vadd.f32 %v701_v4, %v625_v17  ;;  %v6395_v39 = vmul.f32 0.17677669, %v700_v37  ;;  %v1035_v51 = vmul.f32 %v6399_v41, %v6367_v23  ;;  %v6452_v4 = vld [vmem:[%s7323_s8 + $0x10] sm:$0xff] }
 0x37d   :  { %v799_v38 = vmul.f32 %v6365_v22, %v6385_v34  ;;  %v919_v47 = vmul.f32 %v6399_v41, %v6385_v34 }
 0x3bd   :  { %v705_v9 = vpop.f32.mrf.mxu1  ;;  %v787_v11 = vpop.f32.mrf.mxu0 }
 0x3be   :  { %v6360_v19 = vadd.f32 %v787_v11, %v629_v14  ;;  %v706_v40 = vadd.f32 %v705_v9, %v621_v33 }
 0x3bf   :  { %v707_v12 = vpop.f32.mrf.mxu1  ;;  %v5000_v13 = vpop.f32.mrf.mxu0 }
 0x3c0   :  { %v6373_v29 = vadd.f32 %v707_v12, %v625_v17  ;;  %v917_v31 = vmul.f32 %v6365_v22, %v6360_v19  ;;  %v6406_v43 = vmul.f32 0.17677669, %v706_v40  ;;  %v1036_v49 = vmul.f32 %v6399_v41, %v6360_v19 }
 0x3c1   :  { %v711_v15 = vpop.f32.mrf.mxu1  ;;  %v792_v16 = vpop.f32.mrf.mxu0 }
 0x3c2   :  { %v6362_v20 = vadd.f32 %v792_v16, %v629_v14  ;;  %v800_v36 = vmul.f32 %v6365_v22, %v6373_v29  ;;  %v712_v44 = vadd.f32 %v711_v15, %v621_v33  ;;  %v920_v45 = vmul.f32 %v6399_v41, %v6373_v29 }
 0x3c3   :  { %v713_v21 = vpop.f32.mrf.mxu1  ;;  %v5003_v7 = vpop.f32.mrf.mxu0 }
 0x3c4   :  { %v6369_v25 = vadd.f32 %v713_v21, %v625_v17  ;;  %v918_v26 = vmul.f32 %v6365_v22, %v6362_v20  ;;  %v6414_v46 = vmul.f32 0.17677669, %v712_v44  ;;  %v1037_v48 = vmul.f32 %v6399_v41, %v6362_v20 }
 0x3c6   :  { %5050 = vmatpush3.msra.mxu0 %v918_v26  ;;  %v801_v30 = vmul.f32 %v6365_v22, %v6369_v25  ;;  %v921_v42 = vmul.f32 %v6399_v41, %v6369_v25 }
 0x3c7   :  { %5051 = vmatprep.subr.mxu0 %v6080_v0 }
 0x3c8   :  { %5005 = vmatpush3.xpose.msra.mxu1 %v801_v30  ;;  %5052 = vmatpush3.msra.mxu0 %v917_v31 }
 0x3c9   :  { %5053 = vmatprep.subr.mxu0 %v6080_v0  ;;  %5006 = vmatprep.subr.mxu1 %v6080_v0 }
 0x3ca   :  { %5054 = vmatpush3.msra.mxu0 %v916_v32 }
 0x3cb   :  { %5079 = vmatprep.subr.mxu0 %v6080_v0 }
 0x3cc   :  { %5007 = vmatpush3.xpose.msra.mxu1 %v800_v36 }
 0x3cd   :  { %5008 = vmatprep.subr.mxu1 %v6080_v0 }
 0x3d0   :  { %5009 = vmatpush3.xpose.msra.mxu1 %v799_v38 }
 0x3d1   :  { %5019 = vmatprep.subr.mxu1 %v6080_v0 }
 0x3d3   :  { %5011 = vmatmul.mubr.f32.vlgmr.msra.gmra.mxu1 %v6395_v39 }
 0x3d4   :  { %5020 = vmatpush3.xpose.msra.mxu1 %v921_v42  ;;  %5013 = vmatprep.mubr.msk.f32.mxu1 %vm6082_vm0, %v6080_v0 }
 0x3d5   :  { %5021 = vmatprep.subr.mxu1 %v6080_v0 }
 0x3d7   :  { %5014 = vmatmul.mubr.f32.gmra.mxu1 %v6406_v43 }
 0x3d8   :  { %5022 = vmatpush3.xpose.msra.mxu1 %v920_v45  ;;  %5016 = vmatprep.mubr.msk.f32.mxu1 %vm6082_vm0, %v6080_v0 }
 0x3d9   :  { %5023 = vmatprep.subr.mxu1 %v6080_v0 }
 0x3db   :  { %5017 = vmatmul.mubr.f32.gmra.mxu1 %v6414_v46 }
 0x3dc   :  { %5024 = vmatpush3.xpose.msra.mxu1 %v919_v47  ;;  %5025 = vmatprep.mubr.msk.f32.mxu1 %vm6082_vm0, %v6080_v0 }
 0x3dd   :  { %5034 = vmatprep.subr.mxu1 %v6080_v0 }
 0x3df   :  { %5026 = vmatmul.mubr.f32.vlgmr.msra.gmra.mxu1 %v6395_v39 }
 0x3e0   :  { %5035 = vmatpush3.msra.mxu1 %v1037_v48  ;;  %5028 = vmatprep.mubr.msk.f32.mxu1 %vm6082_vm0, %v6080_v0 }
 0x3e1   :  { %5036 = vmatprep.subr.mxu1 %v6080_v0 }
 0x3e2   :  { %5037 = vmatpush3.msra.mxu1 %v1036_v49 }
 0x3e3   :  { %5029 = vmatmul.mubr.f32.gmra.mxu1 %v6406_v43  ;;  %5038 = vmatprep.subr.mxu1 %v6080_v0 }
 0x3e4   :  { %5039 = vmatpush3.msra.mxu1 %v1035_v51  ;;  %5031 = vmatprep.mubr.msk.f32.mxu1 %vm6082_vm0, %v6080_v0 }
 0x3e5   :  { %5064 = vmatprep.subr.mxu1 %v6080_v0 }
 0x3e7   :  { %5032 = vmatmul.mubr.f32.gmra.mxu1 %v6414_v46 }
 0x3e8   :  { %5040 = vmatprep.mubr.msk.f32.mxu1 %vm6082_vm0, %v6080_v0 }
 0x493   :  { %v868_v52 = vpop.f32.mrf.mxu1 }
 0x494   :  { %v6458_v36 = vadd.f32 %v868_v52, %v6442_v50 }
 0x495   :  { %v5012_v53 = vpop.f32.mrf.mxu1 }
 0x496   :  { %v883_v44 = vsel %vm882_vm7, %v6458_v36, -inf }
 0x497   :  { %v873_v54 = vpop.f32.mrf.mxu1 }
 0x498   :  { %v6462_v40 = vadd.f32 %v873_v54, %v6447_v62 }
 0x499   :  { %v5015_v55 = vpop.f32.mrf.mxu1 }
 0x49a   :  { %v886_v48 = vsel %vm882_vm7, %v6462_v40, -inf  ;;  %v6477_v55 = vsel %vm506_vm10, 1.0, %v6080_v0 }
 0x49b   :  { %v878_v56 = vpop.f32.mrf.mxu1 }
 0x49c   :  { %v6465_v42 = vadd.f32 %v878_v56, %v6452_v4  ;;  %v1218_v56 = vmul.f32 %v6477_v55, %v6369_v25 }
 0x49d   :  { %v5018_v57 = vpop.f32.mrf.mxu1 }
 0x49e   :  { %v889_v47 = vsel %vm882_vm7, %v6465_v42, -inf }
 0x49f   :  { %v988_v58 = vpop.f32.mrf.mxu1 }
 0x4a0   :  { %v989_v59 = vadd.f32 %v988_v58, %v6442_v50 }
 0x4a1   :  { %v5027_v60 = vpop.f32.mrf.mxu1 }
 0x4a2   :  { %v1002_v61 = vsel %vm882_vm7, %v989_v59, -inf }
 0x4a3   :  { %1003 = vmax.xlane.f32.xlu1 %v1002_v61  ;;  %v993_v63 = vpop.f32.mrf.mxu1 }
 0x4a4   :  { %v994_v1 = vadd.f32 %v993_v63, %v6447_v62  ;;  %v1216_v63 = vmul.f32 %v6477_v55, %v6385_v34 }
 0x4a5   :  { %v5030_v2 = vpop.f32.mrf.mxu1 }
 0x4a6   :  { %v1005_v3 = vsel %vm882_vm7, %v994_v1, -inf }
 0x4a7   :  { %1006 = vmax.xlane.f32.xlu1 %v1005_v3  ;;  %v998_v6 = vpop.f32.mrf.mxu1 }
 0x4a8   :  { %v999_v9 = vadd.f32 %v998_v6, %v6452_v4 }
 0x4a9   :  { %v5033_v11 = vpop.f32.mrf.mxu1 }
 0x4aa   :  { %v1008_v12 = vsel %vm882_vm7, %v999_v9, -inf }
 0x4ab   :  { %1009 = vmax.xlane.f32.xlu1 %v1008_v12 }
 0x52c   :  { %v1004_v13 = vpop.xlane.xlu1 %1003 }
 0x52d   :  { %v1011_v14 = vsub.f32 %v989_v59, %v1004_v13  ;;  %v1217_v59 = vmul.f32 %v6477_v55, %v6373_v29 }
 0x52f   :  { %v1014_v15 = vmul.f32 1.442695, %v1011_v14 }
 0x530   :  { %v1007_v16 = vpop.xlane.xlu1 %1006 }
 0x531   :  { %5501 = vpow2.f32 %v1014_v15  ;;  %v1012_v17 = vsub.f32 %v994_v1, %v1007_v16  ;;  %v6499_v1 = vsel %vm509_vm11, 1.0, %v6080_v0 }
 0x532   :  { %v1429_v2 = vmul.f32 %v6499_v1, %v6369_v25  ;;  %v1428_v5 = vmul.f32 %v6499_v1, %v6373_v29  ;;  %v1427_v25 = vmul.f32 %v6499_v1, %v6385_v34 }
 0x533   :  { %v1016_v21 = vmul.f32 1.442695, %v1012_v17 }
 0x534   :  { %v1010_v7 = vpop.xlane.xlu1 %1009 }
 0x535   :  { %5503 = vpow2.f32 %v1016_v21  ;;  %v1013_v26 = vsub.f32 %v999_v9, %v1010_v7 }
 0x537   :  { %v1018_v30 = vmul.f32 1.442695, %v1013_v26 }
 0x539   :  { %5505 = vpow2.f32 %v1018_v30 }
 0x53e   :  { %v5502_v31 = vpop.eup %5501 }
 0x53f   :  { %v1020_v32 = vsel %vm882_vm7, %v5502_v31, 0.0 }
 0x540   :  { %1021 = vadd.xlane.f32.xlu1 %v1020_v32 }
 0x542   :  { %v5504_v33 = vpop.eup %5503 }
 0x543   :  { %v1023_v37 = vsel %vm882_vm7, %v5504_v33, 0.0 }
 0x544   :  { %1024 = vadd.xlane.f32.xlu1 %v1023_v37 }
 0x546   :  { %v5506_v38 = vpop.eup %5505 }
 0x547   :  { %v1026_v45 = vsel %vm882_vm7, %v5506_v38, 0.0 }
 0x548   :  { %884 = vmax.xlane.f32.xlu1 %v883_v44  ;;  %1027 = vadd.xlane.f32.xlu0 %v1026_v45 }
 0x54c   :  { %890 = vmax.xlane.f32.xlu1 %v889_v47  ;;  %887 = vmax.xlane.f32.xlu0 %v886_v48 }
 0x5c9   :  { %v1022_v49 = vpop.xlane.xlu1 %1021 }
 0x5ca   :  { %5507 = vrcp.f32 %v1022_v49 }
 0x5cd   :  { %v1025_v51 = vpop.xlane.xlu1 %1024 }
 0x5ce   :  { %5509 = vrcp.f32 %v1025_v51 }
 0x5d1   :  { %v1028_v52 = vpop.xlane.xlu0 %1027  ;;  %v885_v6 = vpop.xlane.xlu1 %884 }
 0x5d2   :  { %5511 = vrcp.f32 %v1028_v52 }
 0x5d5   :  { %v888_v12 = vpop.xlane.xlu0 %887  ;;  %v891_v13 = vpop.xlane.xlu1 %890 }
 0x5d6   :  { %v893_v15 = vsub.f32 %v6462_v40, %v888_v12  ;;  %v894_v21 = vsub.f32 %v6465_v42, %v891_v13 }
 0x5d7   :  { %v5508_v53 = vpop.eup %5507 }
 0x5d8   :  { %v1030_v54 = vmul.f32 %v5508_v53, %v5502_v31  ;;  %v897_v31 = vmul.f32 1.442695, %v893_v15 }
 0x5da   :  { %5041 = vmatmul.mubr.msk.f32.vlgmr.msra.gmra.mxu1 %vm882_vm7, %v1030_v54 }
 0x5db   :  { %v5510_v57 = vpop.eup %5509  ;;  %5065 = vmatpush3.xpose.msra.mxu1 %v1218_v56  ;;  %5043 = vmatprep.mubr.msk.f32.mxu1 %vm6082_vm0, %v6080_v0 }
 0x5dc   :  { %5066 = vmatprep.subr.mxu1 %v6080_v0  ;;  %v1032_v58 = vmul.f32 %v5510_v57, %v5504_v33  ;;  %v899_v33 = vmul.f32 1.442695, %v894_v21 }
 0x5de   :  { %5044 = vmatmul.mubr.msk.f32.gmra.mxu1 %vm882_vm7, %v1032_v58 }
 0x5df   :  { %v5512_v60 = vpop.eup %5511  ;;  %5067 = vmatpush3.xpose.msra.mxu1 %v1217_v59  ;;  %5046 = vmatprep.mubr.msk.f32.mxu1 %vm6082_vm0, %v6080_v0 }
 0x5e0   :  { %5068 = vmatprep.subr.mxu1 %v6080_v0  ;;  %v1034_v61 = vmul.f32 %v5512_v60, %v5506_v38 }
 0x5e2   :  { %5047 = vmatmul.mubr.msk.f32.gmra.mxu1 %vm882_vm7, %v1034_v61 }
 0x5e3   :  { %5069 = vmatpush3.xpose.msra.mxu1 %v1216_v63  ;;  %5070 = vmatprep.mubr.msk.f32.mxu1 %vm6082_vm0, %v6080_v0 }
 0x5e4   :  { %5094 = vmatprep.subr.mxu1 %v6080_v0 }
 0x5e6   :  { %5071 = vmatmul.mubr.f32.vlgmr.msra.gmra.mxu1 %v6395_v39 }
 0x5e7   :  { %5095 = vmatpush3.xpose.msra.mxu1 %v1429_v2  ;;  %5073 = vmatprep.mubr.msk.f32.mxu1 %vm6082_vm0, %v6080_v0 }
 0x5e8   :  { %5096 = vmatprep.subr.mxu1 %v6080_v0 }
 0x5ea   :  { %5074 = vmatmul.mubr.f32.gmra.mxu1 %v6406_v43 }
 0x5eb   :  { %5097 = vmatpush3.xpose.msra.mxu1 %v1428_v5  ;;  %5076 = vmatprep.mubr.msk.f32.mxu1 %vm6082_vm0, %v6080_v0 }
 0x5ec   :  { %5098 = vmatprep.subr.mxu1 %v6080_v0 }
 0x5ee   :  { %5077 = vmatmul.mubr.f32.gmra.mxu1 %v6414_v46 }
 0x5ef   :  { %5099 = vmatpush3.xpose.msra.mxu1 %v1427_v25  ;;  %5100 = vmatprep.mubr.msk.f32.mxu1 %vm6082_vm0, %v6080_v0 }
 0x5f0   :  { %5124 = vmatprep.subr.mxu1 %v6080_v0 }
 0x5f2   :  { %5101 = vmatmul.mubr.f32.vlgmr.msra.gmra.mxu1 %v6395_v39 }
 0x5f3   :  { %5103 = vmatprep.mubr.msk.f32.mxu1 %vm6082_vm0, %v6080_v0 }
 0x5f6   :  { %5104 = vmatmul.mubr.f32.gmra.mxu1 %v6406_v43  ;;  %v892_v43 = vsub.f32 %v6458_v36, %v885_v6 }
 0x5f7   :  { %5106 = vmatprep.mubr.msk.f32.mxu1 %vm6082_vm0, %v6080_v0 }
 0x5f8   :  { %v895_v17 = vmul.f32 1.442695, %v892_v43 }
 0x5fa   :  { %5107 = vmatmul.mubr.f32.gmra.mxu1 %v6414_v46  ;;  %5513 = vpow2.f32 %v895_v17 }
 0x5fb   :  { %5156 = vmatprep.mubr.msk.f32.mxu1 %vm6082_vm0, %v6080_v0  ;;  %5515 = vpow2.f32 %v897_v31 }
 0x5fc   :  { %5517 = vpow2.f32 %v899_v33 }
 0x607   :  { %v5514_v54 = vpop.eup %5513 }
 0x608   :  { %v6548_v59 = vpop.eup %5515 }
 0x609   :  { %v6552_v61 = vpop.eup %5517  ;;  %v904_v63 = vsel %vm882_vm7, %v6548_v59, 0.0 }
 0x69a   :  { %v6528_v29 = vpop.f32.mrf.mxu1 }
 0x69c   :  { %v5042_v34 = vpop.f32.mrf.mxu1 }
 0x69e   :  { %v6530_v3 = vpop.f32.mrf.mxu1 }
 0x6a0   :  { %v5045_v39 = vpop.f32.mrf.mxu1 }
 0x6a2   :  { %v6532_v9 = vpop.f32.mrf.mxu1 }
 0x6a4   :  { %v5048_v11 = vpop.f32.mrf.mxu1 }
 0x6a6   :  { %v1285_v14 = vpop.f32.mrf.mxu1 }
 0x6a7   :  { %v1286_v46 = vadd.f32 %v1285_v14, %v6442_v50 }
 0x6a8   :  { %v5072_v16 = vpop.f32.mrf.mxu1 }
 0x6a9   :  { %v1299_v7 = vsel %vm882_vm7, %v1286_v46, -inf }
 0x6aa   :  { %1300 = vmax.xlane.f32.xlu0 %v1299_v7  ;;  %v1290_v26 = vpop.f32.mrf.mxu1 }
 0x6ab   :  { %v1291_v30 = vadd.f32 %v1290_v26, %v6447_v62 }
 0x6ac   :  { %v5075_v32 = vpop.f32.mrf.mxu1 }
 0x6ad   :  { %v1302_v36 = vsel %vm882_vm7, %v1291_v30, -inf }
 0x6ae   :  { %1303 = vmax.xlane.f32.xlu1 %v1302_v36  ;;  %v1295_v37 = vpop.f32.mrf.mxu1 }
 0x6af   :  { %v1296_v38 = vadd.f32 %v1295_v37, %v6452_v4 }
 0x6b0   :  { %v5078_v40 = vpop.f32.mrf.mxu1 }
 0x6b1   :  { %v1305_v42 = vsel %vm882_vm7, %v1296_v38, -inf }
 0x6b2   :  { %1306 = vmax.xlane.f32.xlu0 %v1305_v42  ;;  %v1496_v44 = vpop.f32.mrf.mxu1 }
 0x6b3   :  { %v1497_v45 = vadd.f32 %v1496_v44, %v6442_v50  ;;  %v901_v50 = vsel %vm882_vm7, %v5514_v54, 0.0 }
 0x6b4   :  { %v5102_v47 = vpop.f32.mrf.mxu1 }
 0x6b5   :  { %v1510_v48 = vsel %vm882_vm7, %v1497_v45, -inf }
 0x6b6   :  { %1511 = vmax.xlane.f32.xlu1 %v1510_v48  ;;  %v1501_v49 = vpop.f32.mrf.mxu1 }
 0x6b7   :  { %v1502_v51 = vadd.f32 %v1501_v49, %v6447_v62  ;;  %v907_v62 = vsel %vm882_vm7, %v6552_v61, 0.0 }
 0x6b8   :  { %v5105_v52 = vpop.f32.mrf.mxu1 }
 0x6b9   :  { %v1513_v53 = vsel %vm882_vm7, %v1502_v51, -inf }
 0x6ba   :  { %1514 = vmax.xlane.f32.xlu0 %v1513_v53  ;;  %v1506_v56 = vpop.f32.mrf.mxu1  ;;  %v1333_v53 = vmul.f32 %v6477_v55, %v6360_v19 }
 0x6bb   :  { %v1507_v57 = vadd.f32 %v1506_v56, %v6452_v4 }
 0x6bc   :  { %v5108_v58 = vpop.f32.mrf.mxu1 }
 0x6bd   :  { %v1516_v60 = vsel %vm882_vm7, %v1507_v57, -inf }
 0x6be   :  { %902 = vadd.xlane.f32.xlu0 %v901_v50  ;;  %1517 = vmax.xlane.f32.xlu1 %v1516_v60  ;;  %v1332_v50 = vmul.f32 %v6477_v55, %v6367_v23 }
 0x6c2   :  { %908 = vadd.xlane.f32.xlu0 %v907_v62  ;;  %905 = vadd.xlane.f32.xlu1 %v904_v63  ;;  %v1652_v62 = vld [vmem:[#allocation13 + $0x70] sm:$0xff]  ;;  %v1651_v63 = vld [vmem:[#allocation13 + $0x68] sm:$0xff] }
 0x733   :  { %v1301_v4 = vpop.xlane.xlu0 %1300 }
 0x734   :  { %v1308_v2 = vsub.f32 %v1286_v46, %v1301_v4  ;;  %v1650_v4 = vld [vmem:[#allocation13 + $0x60] sm:$0xff] }
 0x736   :  { %v1311_v5 = vmul.f32 1.442695, %v1308_v2  ;;  %v1648_v2 = vld [vmem:[#allocation13 + $0x50] sm:$0xff] }
 0x737   :  { %v1304_v25 = vpop.xlane.xlu1 %1303 }
 0x738   :  { %5519 = vpow2.f32 %v1311_v5  ;;  %v1309_v34 = vsub.f32 %v1291_v30, %v1304_v25  ;;  %v1647_v5 = vld [vmem:[#allocation13 + $0x48] sm:$0xff]  ;;  %v1646_v25 = vld [vmem:[#allocation13 + $0x40] sm:$0xff] }
 0x73a   :  { %v1313_v6 = vmul.f32 1.442695, %v1309_v34 }
 0x73b   :  { %v1307_v39 = vpop.xlane.xlu0 %1306 }
 0x73c   :  { %5521 = vpow2.f32 %v1313_v6  ;;  %v1310_v11 = vsub.f32 %v1296_v38, %v1307_v39 }
 0x73e   :  { %v1315_v43 = vmul.f32 1.442695, %v1310_v11 }
 0x73f   :  { %v1512_v12 = vpop.xlane.xlu1 %1511 }
 0x740   :  { %5523 = vpow2.f32 %v1315_v43  ;;  %v1519_v13 = vsub.f32 %v1497_v45, %v1512_v12 }
 0x742   :  { %v1522_v14 = vmul.f32 1.442695, %v1519_v13 }
 0x743   :  { %v1515_v15 = vpop.xlane.xlu0 %1514 }
 0x744   :  { %5525 = vpow2.f32 %v1522_v14  ;;  %v1520_v16 = vsub.f32 %v1502_v51, %v1515_v15  ;;  %v1334_v51 = vmul.f32 %v6477_v55, %v6362_v20  ;;  %v1545_v14 = vmul.f32 %v6499_v1, %v6362_v20 }
 0x745   :  { %v6558_v17 = vpop.eup %5519  ;;  %v1543_v20 = vmul.f32 %v6499_v1, %v6367_v23 }
 0x746   :  { %v1524_v21 = vmul.f32 1.442695, %v1520_v16  ;;  %v1317_v46 = vsel %vm882_vm7, %v6558_v17, 0.0  ;;  %v1544_v16 = vmul.f32 %v6499_v1, %v6360_v19 }
 0x747   :  { %v903_v7 = vpop.xlane.xlu0 %902  ;;  %1318 = vadd.xlane.f32.xlu1 %v1317_v46  ;;  %v1518_v26 = vpop.xlane.xlu1 %1517 }
 0x748   :  { %5527 = vpow2.f32 %v1524_v21  ;;  %v1521_v30 = vsub.f32 %v1507_v57, %v1518_v26 }
 0x749   :  { %v6562_v31 = vpop.eup %5521  ;;  %5529 = vrcp.f32 %v903_v7 }
 0x74a   :  { %v1526_v32 = vmul.f32 1.442695, %v1521_v30  ;;  %v1320_v33 = vsel %vm882_vm7, %v6562_v31, 0.0 }
 0x74b   :  { %1321 = vadd.xlane.f32.xlu0 %v1320_v33  ;;  %v906_v36 = vpop.xlane.xlu1 %905  ;;  %v909_v38 = vpop.xlane.xlu0 %908 }
 0x74c   :  { %5531 = vpow2.f32 %v1526_v32 }
 0x74d   :  { %v6566_v37 = vpop.eup %5523  ;;  %5533 = vrcp.f32 %v906_v36 }
 0x74e   :  { %v1323_v40 = vsel %vm882_vm7, %v6566_v37, 0.0  ;;  %5535 = vrcp.f32 %v909_v38 }
 0x74f   :  { %1324 = vadd.xlane.f32.xlu1 %v1323_v40 }
 0x751   :  { %v6570_v42 = vpop.eup %5525 }
 0x752   :  { %v1528_v44 = vsel %vm882_vm7, %v6570_v42, 0.0 }
 0x753   :  { %1529 = vadd.xlane.f32.xlu0 %v1528_v44  ;;  %v1644_v44 = vld [vmem:[#allocation13 + $0x30] sm:$0xff] }
 0x755   :  { %v6574_v45 = vpop.eup %5527 }
 0x756   :  { %v5530_v47 = vpop.eup %5529  ;;  %v1531_v48 = vsel %vm882_vm7, %v6574_v45, 0.0 }
 0x757   :  { %v911_v49 = vmul.f32 %v5530_v47, %v5514_v54  ;;  %1532 = vadd.xlane.f32.xlu1 %v1531_v48  ;;  %v1643_v47 = vld [vmem:[#allocation13 + $0x28] sm:$0xff]  ;;  %v1642_v48 = vld [vmem:[#allocation13 + $0x20] sm:$0xff] }
 0x759   :  { %v6580_v52 = vpop.eup %5531  ;;  %5056 = vmatmul.mubr.msk.f32.vlgmr.msra.gmra.mxu0 %vm882_vm7, %v911_v49  ;;  %v1641_v49 = vld [vmem:[#allocation13 + $0x18] sm:$0xff] }
 0x75a   :  { %5080 = vmatpush3.msra.mxu0 %v1334_v51  ;;  %5058 = vmatprep.mubr.msk.f32.mxu0 %vm6082_vm0, %v6080_v0  ;;  %v1534_v56 = vsel %vm882_vm7, %v6580_v52, 0.0  ;;  %v5534_v57 = vpop.eup %5533  ;;  %v1640_v51 = vld [vmem:[#allocation13 + $0x10] sm:$0xff] }
 0x75b   :  { %5081 = vmatprep.subr.mxu0 %v6080_v0  ;;  %1535 = vadd.xlane.f32.xlu0 %v1534_v56  ;;  %v913_v54 = vmul.f32 %v5534_v57, %v6548_v59  ;;  %v5536_v58 = vpop.eup %5535  ;;  %v1653_v59 = vld [vmem:[#allocation13 + $0x78] sm:$0xff] }
 0x75c   :  { %5082 = vmatpush3.msra.mxu0 %v1333_v53  ;;  %v915_v60 = vmul.f32 %v5536_v58, %v6552_v61  ;;  %5125 = vmatpush3.msra.mxu1 %v1653_v59  ;;  %v1649_v61 = vld [vmem:[#allocation13 + $0x58] sm:$0xff]  ;;  %v1638_v53 = vld [vmem:[#allocation13] sm:$0xff] }
 0x75d   :  { %5083 = vmatprep.subr.mxu0 %v6080_v0  ;;  %5059 = vmatmul.mubr.msk.f32.gmra.mxu0 %vm882_vm7, %v913_v54 }
 0x75e   :  { %5084 = vmatpush3.msra.mxu0 %v1332_v50  ;;  %5061 = vmatprep.mubr.msk.f32.mxu0 %vm6082_vm0, %v6080_v0 }
 0x75f   :  { %5109 = vmatprep.subr.mxu0 %v6080_v0  ;;  %5126 = vmatprep.subr.mxu1 %v6080_v0 }
 0x760   :  { %5127 = vmatpush3.msra.mxu1 %v1652_v62 }
 0x761   :  { %5062 = vmatmul.mubr.msk.f32.gmra.mxu0 %vm882_vm7, %v915_v60  ;;  %5128 = vmatprep.subr.mxu1 %v6080_v0 }
 0x762   :  { %5085 = vmatprep.mubr.msk.f32.mxu0 %vm6082_vm0, %v6080_v0  ;;  %5129 = vmatpush3.msra.mxu1 %v1651_v63 }
 0x763   :  { %5130 = vmatprep.subr.mxu1 %v6080_v0 }
 0x764   :  { %5131 = vmatpush3.msra.mxu1 %v1650_v4 }
 0x765   :  { %5132 = vmatprep.subr.mxu1 %v6080_v0 }
 0x766   :  { %5133 = vmatpush3.msra.mxu1 %v1649_v61 }
 0x767   :  { %5134 = vmatprep.subr.mxu1 %v6080_v0 }
 0x768   :  { %5135 = vmatpush3.msra.mxu1 %v1648_v2 }
 0x769   :  { %5136 = vmatprep.subr.mxu1 %v6080_v0 }
 0x76a   :  { %5137 = vmatpush3.msra.mxu1 %v1647_v5 }
 0x76b   :  { %5138 = vmatprep.subr.mxu1 %v6080_v0 }
 0x76c   :  { %5139 = vmatpush3.msra.mxu1 %v1646_v25 }
 0x76d   :  { %5140 = vmatprep.subr.mxu1 %v6080_v0 }
 0x7d0   :  { %v1319_v34 = vpop.xlane.xlu1 %1318 }
 0x7d1   :  { %5537 = vrcp.f32 %v1319_v34 }
 0x7d4   :  { %v1322_v6 = vpop.xlane.xlu0 %1321 }
 0x7d5   :  { %5539 = vrcp.f32 %v1322_v6 }
 0x7d8   :  { %v1325_v39 = vpop.xlane.xlu1 %1324 }
 0x7d9   :  { %5541 = vrcp.f32 %v1325_v39 }
 0x7dc   :  { %v1530_v11 = vpop.xlane.xlu0 %1529 }
 0x7dd   :  { %5543 = vrcp.f32 %v1530_v11 }
 0x7de   :  { %v5538_v43 = vpop.eup %5537 }
 0x7df   :  { %v1327_v12 = vmul.f32 %v5538_v43, %v6558_v17 }
 0x7e0   :  { %v1533_v13 = vpop.xlane.xlu1 %1532 }
 0x7e1   :  { %5545 = vrcp.f32 %v1533_v13  ;;  %5086 = vmatmul.mubr.msk.f32.vlgmr.msra.gmra.mxu0 %vm882_vm7, %v1327_v12  ;;  %v4555_v12 = vld [vmem:[#allocation15] ss:$0 sm:$0xff] }
 0x7e2   :  { %v5540_v15 = vpop.eup %5539  ;;  %5110 = vmatpush3.msra.mxu0 %v1545_v14  ;;  %5088 = vmatprep.mubr.msk.f32.mxu0 %vm6082_vm0, %v6080_v0 }
 0x7e3   :  { %5111 = vmatprep.subr.mxu0 %v6080_v0  ;;  %v1329_v21 = vmul.f32 %v5540_v15, %v6562_v31 }
 0x7e4   :  { %5112 = vmatpush3.msra.mxu0 %v1544_v16  ;;  %v1536_v17 = vpop.xlane.xlu0 %1535 }
 0x7e5   :  { %5547 = vrcp.f32 %v1536_v17  ;;  %5113 = vmatprep.subr.mxu0 %v6080_v0  ;;  %5089 = vmatmul.mubr.msk.f32.gmra.mxu0 %vm882_vm7, %v1329_v21 }
 0x7e6   :  { %v5542_v46 = vpop.eup %5541  ;;  %5114 = vmatpush3.msra.mxu0 %v1543_v20  ;;  %5091 = vmatprep.mubr.msk.f32.mxu0 %vm6082_vm0, %v6080_v0 }
 0x7e7   :  { %v1331_v19 = vmul.f32 %v5542_v46, %v6566_v37 }
 0x7e9   :  { %5092 = vmatmul.mubr.msk.f32.gmra.mxu0 %vm882_vm7, %v1331_v19 }
 0x7ea   :  { %v5544_v7 = vpop.eup %5543  ;;  %5115 = vmatprep.mubr.msk.f32.mxu0 %vm6082_vm0, %v6080_v0 }
 0x7eb   :  { %v1538_v23 = vmul.f32 %v5544_v7, %v6570_v42  ;;  %v1645_v42 = vld [vmem:[#allocation13 + $0x38] sm:$0xff] }
 0x7ec   :  { %5141 = vmatpush3.msra.mxu1 %v1645_v42  ;;  %v1846_v42 = vld [vmem:[#allocation19 + $0x188] sm:$0xff] }
 0x7ed   :  { %5116 = vmatmul.mubr.msk.f32.vlgmr.msra.gmra.mxu0 %vm882_vm7, %v1538_v23  ;;  %5142 = vmatprep.subr.mxu1 %v6080_v0 }
 0x7ee   :  { %v5546_v26 = vpop.eup %5545  ;;  %5118 = vmatprep.mubr.msk.f32.mxu0 %vm6082_vm0, %v6080_v0  ;;  %5143 = vmatpush3.msra.mxu1 %v1644_v44  ;;  %v1848_v44 = vld [vmem:[#allocation19 + $0x198] sm:$0xff] }
 0x7ef   :  { %v1540_v30 = vmul.f32 %v5546_v26, %v6574_v45  ;;  %5144 = vmatprep.subr.mxu1 %v6080_v0  ;;  %v1860_v26 = vld [vmem:[#allocation19 + $0x1f8] sm:$0xff] }
 0x7f0   :  { %5145 = vmatpush3.msra.mxu1 %v1643_v47  ;;  %v1847_v47 = vld [vmem:[#allocation19 + $0x190] sm:$0xff] }
 0x7f1   :  { %5119 = vmatmul.mubr.msk.f32.gmra.mxu0 %vm882_vm7, %v1540_v30  ;;  %5146 = vmatprep.subr.mxu1 %v6080_v0  ;;  %v1857_v30 = vld [vmem:[#allocation19 + $0x1e0] sm:$0xff] }
 0x7f2   :  { %v5548_v31 = vpop.eup %5547  ;;  %5121 = vmatprep.mubr.msk.f32.mxu0 %vm6082_vm0, %v6080_v0  ;;  %5147 = vmatpush3.msra.mxu1 %v1642_v48 }
 0x7f3   :  { %v1542_v32 = vmul.f32 %v5548_v31, %v6580_v52  ;;  %5148 = vmatprep.subr.mxu1 %v6080_v0  ;;  %v1639_v52 = vld [vmem:[#allocation13 + $0x8] sm:$0xff]  ;;  %v1859_v31 = vld [vmem:[#allocation19 + $0x1f0] sm:$0xff] }
 0x7f4   :  { %5149 = vmatpush3.msra.mxu1 %v1641_v49 }
 0x7f5   :  { %5122 = vmatmul.mubr.msk.f32.gmra.mxu0 %vm882_vm7, %v1542_v32  ;;  %5150 = vmatprep.subr.mxu1 %v6080_v0  ;;  %v1854_v32 = vld [vmem:[#allocation19 + $0x1c8] sm:$0xff] }
 0x7f6   :  { %1947 = vmatprep.mubr.f32.mxu0 %v6080_v0  ;;  %5151 = vmatpush3.msra.mxu1 %v1640_v51 }
 0x7f7   :  { %5152 = vmatprep.subr.mxu1 %v6080_v0 }
 0x7f8   :  { %5153 = vmatpush3.msra.mxu1 %v1639_v52 }
 0x7f9   :  { %5154 = vmatprep.subr.mxu1 %v6080_v0 }
 0x7fa   :  { %5155 = vmatpush3.msra.mxu1 %v1638_v53 }
 0x7fb   :  { %1966 = vmatprep.subr.mxu1 %v1860_v26  ;;  %v1820_v26 = vld [vmem:[#allocation19 + $0xb8] sm:$0xff] }
 0x819   :  { %v1202_v33 = vpop.f32.mrf.mxu0 }
 0x81a   :  { %v1203_v60 = vadd.f32 %v1202_v33, %v6528_v29  ;;  %v1856_v33 = vld [vmem:[#allocation19 + $0x1d8] sm:$0xff] }
 0x81b   :  { %v5057_v36 = vpop.f32.mrf.mxu0 }
 0x81c   :  { %v1855_v36 = vld [vmem:[#allocation19 + $0x1d0] sm:$0xff] }
 0x81d   :  { %v1207_v37 = vpop.f32.mrf.mxu0 }
 0x81e   :  { %v1208_v4 = vadd.f32 %v1207_v37, %v6530_v3  ;;  %v1850_v37 = vld [vmem:[#allocation19 + $0x1a8] sm:$0xff] }
 0x81f   :  { %v5060_v38 = vpop.f32.mrf.mxu0 }
 0x820   :  { %v1852_v38 = vld [vmem:[#allocation19 + $0x1b8] sm:$0xff] }
 0x821   :  { %v1212_v40 = vpop.f32.mrf.mxu0 }
 0x822   :  { %v1213_v34 = vadd.f32 %v1212_v40, %v6532_v9  ;;  %v1851_v40 = vld [vmem:[#allocation19 + $0x1b0] sm:$0xff] }
 0x823   :  { %v5063_v45 = vpop.f32.mrf.mxu0 }
 0x824   :  { %v1845_v45 = vld [vmem:[#allocation19 + $0x180] sm:$0xff] }
 0x8a1   :  { %v1410_v56 = vpop.f32.mrf.mxu0 }
 0x8a2   :  { %v1424_v62 = vadd.f32 %v1410_v56, %v1203_v60 }
 0x8a3   :  { %v5087_v57 = vpop.f32.mrf.mxu0 }
 0x8a5   :  { %v1415_v54 = vpop.f32.mrf.mxu0 }
 0x8a6   :  { %v1425_v5 = vadd.f32 %v1415_v54, %v1208_v4  ;;  %v1841_v4 = vld [vmem:[#allocation19 + $0x160] sm:$0xff] }
 0x8a7   :  { %v5090_v58 = vpop.f32.mrf.mxu0 }
 0x8a9   :  { %v1420_v50 = vpop.f32.mrf.mxu0 }
 0x8aa   :  { %v1426_v11 = vadd.f32 %v1420_v50, %v1213_v34  ;;  %v1839_v34 = vld [vmem:[#allocation19 + $0x150] sm:$0xff] }
 0x8ab   :  { %v5093_v59 = vpop.f32.mrf.mxu0 }
 0x8ad   :  { %v1621_v63 = vpop.f32.mrf.mxu0 }
 0x8ae   :  { %v1635_v61 = vadd.f32 %v1621_v63, %v1424_v62  ;;  %v1842_v62 = vld [vmem:[#allocation19 + $0x168] sm:$0xff]  ;;  %v1844_v63 = vld [vmem:[#allocation19 + $0x178] sm:$0xff] }
 0x8af   :  { %v5117_v2 = vpop.f32.mrf.mxu0 }
 0x8b0   :  { %5157 = vmatmul.mubr.f32.vlgmr.msra.gmra.mxu1 %v1635_v61  ;;  %v1843_v61 = vld [vmem:[#allocation19 + $0x170] sm:$0xff]  ;;  %v1838_v2 = vld [vmem:[#allocation19 + $0x148] sm:$0xff] }
 0x8b1   :  { %v1626_v25 = vpop.f32.mrf.mxu0  ;;  %5159 = vmatprep.mubr.msk.f32.mxu1 %vm6082_vm0, %v6080_v0  ;;  %1967 = vmatpush1.msra.mxu1 %v1859_v31  ;;  %v1819_v31 = vld [vmem:[#allocation19 + $0xb0] sm:$0xff] }
 0x8b2   :  { %v1636_v6 = vadd.f32 %v1626_v25, %v1425_v5  ;;  %1968 = vmatprep.subr.mxu1 %v1856_v33  ;;  %v1840_v5 = vld [vmem:[#allocation19 + $0x158] sm:$0xff]  ;;  %v1837_v25 = vld [vmem:[#allocation19 + $0x140] sm:$0xff] }
 0x8b3   :  { %v5120_v39 = vpop.f32.mrf.mxu0  ;;  %1969 = vmatpush1.msra.mxu1 %v1855_v36  ;;  %v1816_v33 = vld [vmem:[#allocation19 + $0x98] sm:$0xff]  ;;  %v1815_v36 = vld [vmem:[#allocation19 + $0x90] sm:$0xff] }
 0x8b4   :  { %5160 = vmatmul.mubr.f32.gmra.mxu1 %v1636_v6  ;;  %1970 = vmatprep.subr.mxu1 %v1852_v38  ;;  %v1834_v6 = vld [vmem:[#allocation19 + $0x128] sm:$0xff]  ;;  %v1836_v39 = vld [vmem:[#allocation19 + $0x138] sm:$0xff] }
 0x8b5   :  { %v1631_v29 = vpop.f32.mrf.mxu0  ;;  %5162 = vmatprep.mubr.msk.f32.mxu1 %vm6082_vm0, %v6080_v0  ;;  %1971 = vmatpush1.msra.mxu1 %v1851_v40  ;;  %v1812_v38 = vld [vmem:[#allocation19 + $0x78] sm:$0xff]  ;;  %v1811_v40 = vld [vmem:[#allocation19 + $0x70] sm:$0xff] }
 0x8b6   :  { %v1637_v43 = vadd.f32 %v1631_v29, %v1426_v11  ;;  %1972 = vmatprep.subr.mxu1 %v1848_v44  ;;  %v1833_v11 = vld [vmem:[#allocation19 + $0x120] sm:$0xff]  ;;  %v1835_v29 = vld [vmem:[#allocation19 + $0x130] sm:$0xff]  ;;  %v1808_v44 = vld [vmem:[#allocation19 + $0x58] sm:$0xff] }
 0x8b7   :  { %v5123_v3 = vpop.f32.mrf.mxu0  ;;  %1973 = vmatpush1.msra.mxu1 %v1847_v47  ;;  %v1807_v47 = vld [vmem:[#allocation19 + $0x50] sm:$0xff] }
 0x8b8   :  { %5163 = vmatmul.mubr.f32.gmra.mxu1 %v1637_v43  ;;  %1974 = vmatprep.subr.mxu1 %v1844_v63  ;;  %v1830_v43 = vld [vmem:[#allocation19 + $0x108] sm:$0xff]  ;;  %v1832_v3 = vld [vmem:[#allocation19 + $0x118] sm:$0xff] }
 0x8b9   :  { %2030 = vmatprep.mubr.f32.mxu1 %v6080_v0  ;;  %1975 = vmatpush1.msra.mxu1 %v1843_v61 }
 0x8ba   :  { %1976 = vmatprep.subr.mxu1 %v1840_v5 }
 0x8bb   :  { %1977 = vmatpush1.msra.mxu1 %v1839_v34 }
 0x8bc   :  { %1978 = vmatprep.subr.mxu1 %v1836_v39  ;;  %v4556_v39 = vld [vmem:[#allocation16] ss:$0 sm:$0xff] }
 0x8bd   :  { %1979 = vmatpush1.msra.mxu1 %v1835_v29  ;;  %v4557_v29 = vld [vmem:[#allocation18] ss:$0 sm:$0xff] }
 0x8be   :  { %1980 = vmatprep.subr.mxu1 %v1832_v3 }
 0x970   :  { %v1727_v13 = vpop.f32.mrf.mxu1 }
 0x971   :  { %v1728_v14 = vadd.f32 %v4555_v12, %v1727_v13  ;;  %v1831_v13 = vld [vmem:[#allocation19 + $0x110] sm:$0xff] }
 0x972   :  { %v5158_v15 = vpop.f32.mrf.mxu1  ;;  %1981 = vmatpush1.msra.mxu1 %v1831_v13 }
 0x973   :  { %v6657_v16 = vadd.f32 %v1728_v14, %v6303_v24  ;;  %v1858_v24 = vld [vmem:[#allocation19 + $0x1e8] sm:$0xff]  ;;  %v1828_v15 = vld [vmem:[#allocation19 + $0xf8] sm:$0xff] }
 0x974   :  { %v1732_v9 = vpop.f32.mrf.mxu1  ;;  %1883 = vmatprep.subr.mxu0 %v1858_v24  ;;  %v1826_v14 = vld [vmem:[#allocation19 + $0xe8] sm:$0xff]  ;;  %1982 = vmatprep.subr.mxu1 %v1828_v15 }
 0x975   :  { %v1733_v21 = vadd.f32 %v4555_v12, %v1732_v9  ;;  %1746 = vadd.xlane.f32.xlu1 %v6657_v16  ;;  %1884 = vmatpush1.msra.mxu0 %v1857_v30  ;;  %v1825_v9 = vld [vmem:[#allocation19 + $0xe0] sm:$0xff]  ;;  %v1818_v24 = vld [vmem:[#allocation19 + $0xa8] sm:$0xff] }
 0x976   :  { %v5161_v17 = vpop.f32.mrf.mxu1  ;;  %1885 = vmatprep.subr.mxu0 %v1854_v32  ;;  %v1817_v30 = vld [vmem:[#allocation19 + $0xa0] sm:$0xff]  ;;  %v1814_v32 = vld [vmem:[#allocation19 + $0x88] sm:$0xff] }
 0x977   :  { %v6661_v20 = vadd.f32 %v1733_v21, %v6315_v35  ;;  %v1853_v35 = vld [vmem:[#allocation19 + $0x1c0] sm:$0xff]  ;;  %v1827_v21 = vld [vmem:[#allocation19 + $0xf0] sm:$0xff]  ;;  %v1822_v17 = vld [vmem:[#allocation19 + $0xc8] sm:$0xff] }
 0x978   :  { %v1737_v46 = vpop.f32.mrf.mxu1  ;;  %1886 = vmatpush1.msra.mxu0 %v1853_v35  ;;  %1983 = vmatpush1.msra.mxu1 %v1827_v21  ;;  %v1813_v35 = vld [vmem:[#allocation19 + $0x80] sm:$0xff] }
 0x979   :  { %v1738_v19 = vadd.f32 %v4555_v12, %v1737_v46  ;;  %1748 = vadd.xlane.f32.xlu0 %v6661_v20  ;;  %1887 = vmatprep.subr.mxu0 %v1850_v37  ;;  %v1829_v12 = vld [vmem:[#allocation19 + $0x100] sm:$0xff]  ;;  %v1824_v46 = vld [vmem:[#allocation19 + $0xd8] sm:$0xff]  ;;  %v1810_v37 = vld [vmem:[#allocation19 + $0x68] sm:$0xff] }
 0x97a   :  { %v5164_v7 = vpop.f32.mrf.mxu1  ;;  %1984 = vmatprep.subr.mxu1 %v1824_v46  ;;  %v2220_v46 = vld [vmem:[#allocation21 + $0x1f8] sm:$0xff] }
 0x97b   :  { %v6665_v23 = vadd.f32 %v1738_v19, %v6307_v27  ;;  %v1849_v27 = vld [vmem:[#allocation19 + $0x1a0] sm:$0xff]  ;;  %v1823_v7 = vld [vmem:[#allocation19 + $0xd0] sm:$0xff] }
 0x97c   :  { %1888 = vmatpush1.msra.mxu0 %v1849_v27  ;;  %v1821_v19 = vld [vmem:[#allocation19 + $0xc0] sm:$0xff]  ;;  %1985 = vmatpush1.msra.mxu1 %v1823_v7  ;;  %v2204_v7 = vld [vmem:[#allocation21 + $0x178] sm:$0xff] }
 0x97d   :  { %1750 = vadd.xlane.f32.xlu1 %v6665_v23  ;;  %1889 = vmatprep.subr.mxu0 %v1846_v42  ;;  %v1809_v27 = vld [vmem:[#allocation19 + $0x60] sm:$0xff]  ;;  %v1806_v42 = vld [vmem:[#allocation19 + $0x48] sm:$0xff] }
 0x97e   :  { %1890 = vmatpush1.msra.mxu0 %v1845_v45  ;;  %1986 = vmatprep.subr.mxu1 %v1820_v26  ;;  %v1805_v45 = vld [vmem:[#allocation19 + $0x40] sm:$0xff]  ;;  %v2171_v26 = vld [vmem:[#allocation21 + $0x70] sm:$0xff] }
 0x97f   :  { %1891 = vmatprep.subr.mxu0 %v1842_v62  ;;  %1987 = vmatpush1.msra.mxu1 %v1819_v31  ;;  %v2186_v31 = vld [vmem:[#allocation21 + $0xe8] sm:$0xff] }
 0x980   :  { %1892 = vmatpush1.msra.mxu0 %v1841_v4  ;;  %1988 = vmatprep.subr.mxu1 %v1816_v33  ;;  %v2170_v33 = vld [vmem:[#allocation21 + $0x68] sm:$0xff] }
 0x981   :  { %1893 = vmatprep.subr.mxu0 %v1838_v2  ;;  %1989 = vmatpush1.msra.mxu1 %v1815_v36  ;;  %v2185_v36 = vld [vmem:[#allocation21 + $0xe0] sm:$0xff] }
 0x982   :  { %1894 = vmatpush1.msra.mxu0 %v1837_v25  ;;  %1990 = vmatprep.subr.mxu1 %v1812_v38  ;;  %v2169_v38 = vld [vmem:[#allocation21 + $0x60] sm:$0xff] }
 0x983   :  { %1895 = vmatprep.subr.mxu0 %v1834_v6  ;;  %1991 = vmatpush1.msra.mxu1 %v1811_v40  ;;  %v2184_v40 = vld [vmem:[#allocation21 + $0xd8] sm:$0xff] }
 0x984   :  { %1896 = vmatpush1.msra.mxu0 %v1833_v11  ;;  %1992 = vmatprep.subr.mxu1 %v1808_v44  ;;  %v2168_v44 = vld [vmem:[#allocation21 + $0x58] sm:$0xff] }
 0x985   :  { %1897 = vmatprep.subr.mxu0 %v1830_v43  ;;  %1993 = vmatpush1.msra.mxu1 %v1807_v47  ;;  %v2183_v47 = vld [vmem:[#allocation21 + $0xd0] sm:$0xff] }
 0x986   :  { %1898 = vmatpush1.msra.mxu0 %v1829_v12 }
 0x987   :  { %1899 = vmatprep.subr.mxu0 %v1826_v14 }
 0x988   :  { %1900 = vmatpush1.msra.mxu0 %v1825_v9 }
 0x989   :  { %1901 = vmatprep.subr.mxu0 %v1822_v17 }
 0x98a   :  { %1902 = vmatpush1.msra.mxu0 %v1821_v19  ;;  %v2172_v19 = vld [vmem:[#allocation21 + $0x78] sm:$0xff] }
 0x98b   :  { %1903 = vmatprep.subr.mxu0 %v1818_v24  ;;  %v2187_v24 = vld [vmem:[#allocation21 + $0xf0] sm:$0xff] }
 0x98c   :  { %1904 = vmatpush1.msra.mxu0 %v1817_v30  ;;  %v2203_v30 = vld [vmem:[#allocation21 + $0x170] sm:$0xff] }
 0x98d   :  { %1905 = vmatprep.subr.mxu0 %v1814_v32  ;;  %v2218_v32 = vld [vmem:[#allocation21 + $0x1e8] sm:$0xff] }
 0x98e   :  { %1906 = vmatpush1.msra.mxu0 %v1813_v35  ;;  %v2202_v35 = vld [vmem:[#allocation21 + $0x168] sm:$0xff] }
 0x98f   :  { %1907 = vmatprep.subr.mxu0 %v1810_v37  ;;  %v2217_v37 = vld [vmem:[#allocation21 + $0x1e0] sm:$0xff] }
 0x990   :  { %1908 = vmatpush1.msra.mxu0 %v1809_v27  ;;  %v2201_v27 = vld [vmem:[#allocation21 + $0x160] sm:$0xff] }
 0x991   :  { %1909 = vmatprep.subr.mxu0 %v1806_v42  ;;  %v2216_v42 = vld [vmem:[#allocation21 + $0x1d8] sm:$0xff] }
 0x992   :  { %1910 = vmatpush1.msra.mxu0 %v1805_v45  ;;  %v2200_v45 = vld [vmem:[#allocation21 + $0x158] sm:$0xff] }
 0x9fe   :  { %v1747_v48 = vpop.xlane.xlu1 %1746 }
 0x9ff   :  { %v1752_v49 = vmul.f32 0.0078125, %v1747_v48  ;;  %v1802_v48 = vld [vmem:[#allocation19 + $0x28] sm:$0xff] }
 0xa00   :  { %1911 = vmatprep.subr.mxu0 %v1802_v48  ;;  %v2215_v48 = vld [vmem:[#allocation21 + $0x1d0] sm:$0xff] }
 0xa01   :  { %v6669_v51 = vsub.f32 %v6657_v16, %v1752_v49  ;;  %v1804_v49 = vld [vmem:[#allocation19 + $0x38] sm:$0xff] }
 0xa02   :  { %v1749_v52 = vpop.xlane.xlu0 %1748  ;;  %1994 = vmatprep.subr.mxu1 %v1804_v49  ;;  %v2167_v49 = vld [vmem:[#allocation21 + $0x50] sm:$0xff] }
 0xa03   :  { %v1753_v53 = vmul.f32 0.0078125, %v1749_v52  ;;  %v1758_v56 = vmul.f32 %v6669_v51, %v6669_v51  ;;  %v1801_v52 = vld [vmem:[#allocation19 + $0x20] sm:$0xff] }
 0xa04   :  { %1912 = vmatpush1.msra.mxu0 %v1801_v52  ;;  %v2199_v52 = vld [vmem:[#allocation21 + $0x150] sm:$0xff] }
 0xa05   :  { %v6674_v57 = vsub.f32 %v6661_v20, %v1753_v53  ;;  %1761 = vadd.xlane.f32.xlu0 %v1758_v56  ;;  %v1803_v53 = vld [vmem:[#allocation19 + $0x30] sm:$0xff]  ;;  %v1798_v56 = vld [vmem:[#allocation19 + $0x8] sm:$0xff] }
 0xa06   :  { %v1751_v54 = vpop.xlane.xlu1 %1750  ;;  %1995 = vmatpush1.msra.mxu1 %v1803_v53  ;;  %1913 = vmatprep.subr.mxu0 %v1798_v56  ;;  %v2182_v53 = vld [vmem:[#allocation21 + $0xc8] sm:$0xff] }
 0xa07   :  { %v1754_v58 = vmul.f32 0.0078125, %v1751_v54  ;;  %v1759_v50 = vmul.f32 %v6674_v57, %v6674_v57  ;;  %v1800_v54 = vld [vmem:[#allocation19 + $0x18] sm:$0xff]  ;;  %v2214_v56 = vld [vmem:[#allocation21 + $0x1c8] sm:$0xff] }
 0xa08   :  { %1996 = vmatprep.subr.mxu1 %v1800_v54  ;;  %v2166_v54 = vld [vmem:[#allocation21 + $0x48] sm:$0xff] }
 0xa09   :  { %v6679_v60 = vsub.f32 %v6665_v23, %v1754_v58  ;;  %1763 = vadd.xlane.f32.xlu1 %v1759_v50  ;;  %v1797_v58 = vld [vmem:[#allocation19] sm:$0xff]  ;;  %v1799_v50 = vld [vmem:[#allocation19 + $0x10] sm:$0xff] }
 0xa0a   :  { %1914 = vmatpush1.msra.mxu0 %v1797_v58  ;;  %1997 = vmatpush1.msra.mxu1 %v1799_v50  ;;  %v2198_v58 = vld [vmem:[#allocation21 + $0x148] sm:$0xff]  ;;  %v2181_v50 = vld [vmem:[#allocation21 + $0xc0] sm:$0xff] }
 0xa0b   :  { %v1760_v59 = vmul.f32 %v6679_v60, %v6679_v60  ;;  %4713 = vmatprep.subr.mxu1 %v2220_v46  ;;  %v2207_v46 = vld [vmem:[#allocation21 + $0x190] sm:$0xff] }
 0xa0d   :  { %1765 = vadd.xlane.f32.xlu0 %v1760_v59 }
 0xa8e   :  { %v1762_v59 = vpop.xlane.xlu0 %1761 }
 0xa8f   :  { %v1767_v62 = vmul.f32 0.0078125, %v1762_v59  ;;  %v2213_v59 = vld [vmem:[#allocation21 + $0x1c0] sm:$0xff] }
 0xa91   :  { %v1770_v63 = vadd.f32 1e-05, %v1767_v62  ;;  %v2165_v62 = vld [vmem:[#allocation21 + $0x40] sm:$0xff] }
 0xa92   :  { %v1764_v4 = vpop.xlane.xlu1 %1763 }
 0xa93   :  { %5549 = vrsqrt.f32 %v1770_v63  ;;  %v1768_v61 = vmul.f32 0.0078125, %v1764_v4  ;;  %v2197_v63 = vld [vmem:[#allocation21 + $0x140] sm:$0xff]  ;;  %v2180_v4 = vld [vmem:[#allocation21 + $0xb8] sm:$0xff] }
 0xa95   :  { %v1771_v2 = vadd.f32 1e-05, %v1768_v61  ;;  %v2212_v61 = vld [vmem:[#allocation21 + $0x1b8] sm:$0xff] }
 0xa96   :  { %v1766_v5 = vpop.xlane.xlu0 %1765 }
 0xa97   :  { %5551 = vrsqrt.f32 %v1771_v2  ;;  %v1769_v25 = vmul.f32 0.0078125, %v1766_v5  ;;  %v2164_v2 = vld [vmem:[#allocation21 + $0x38] sm:$0xff] }
 0xa98   :  { %v2196_v5 = vld [vmem:[#allocation21 + $0x138] sm:$0xff] }
 0xa99   :  { %v1772_v34 = vadd.f32 1e-05, %v1769_v25  ;;  %v2179_v25 = vld [vmem:[#allocation21 + $0xb0] sm:$0xff] }
 0xa9b   :  { %5553 = vrsqrt.f32 %v1772_v34  ;;  %v2211_v34 = vld [vmem:[#allocation21 + $0x1b0] sm:$0xff] }
 0xaa0   :  { %v5550_v6 = vpop.eup %5549 }
 0xaa1   :  { %v1776_v11 = vmul.f32 %v5550_v6, %v6669_v51  ;;  %v2163_v6 = vld [vmem:[#allocation21 + $0x30] sm:$0xff] }
 0xaa3   :  { %v1785_v43 = vmul.f32 %v4556_v39, %v1776_v11  ;;  %v2178_v11 = vld [vmem:[#allocation21 + $0xa8] sm:$0xff] }
 0xaa4   :  { %v5552_v3 = vpop.eup %5551 }
 0xaa5   :  { %v1794_v12 = vadd.f32 %v4557_v29, %v1785_v43  ;;  %v1777_v13 = vmul.f32 %v5552_v3, %v6674_v57  ;;  %v2188_v57 = vld [vmem:[#allocation21 + $0xf8] sm:$0xff]  ;;  %v2162_v43 = vld [vmem:[#allocation21 + $0x28] sm:$0xff] }
 0xaa6   :  { %4672 = vmatprep.subr.mxu0 %v2188_v57  ;;  %v2194_v3 = vld [vmem:[#allocation21 + $0x128] sm:$0xff]  ;;  %v2175_v57 = vld [vmem:[#allocation21 + $0x90] sm:$0xff] }
 0xaa7   :  { %1948 = vmatmul.mubr.f32.vlgmr.msra.gmra.mxu0 %v1794_v12  ;;  %2031 = vmatmul.mubr.f32.vlgmr.msra.gmra.mxu1 %v1794_v12  ;;  %v1786_v14 = vmul.f32 %v4556_v39, %v1777_v13  ;;  %v2177_v12 = vld [vmem:[#allocation21 + $0xa0] sm:$0xff] }
 0xaa8   :  { %v5554_v15 = vpop.eup %5553  ;;  %1953 = vmatprep.mubr.f32.mxu0 %v6080_v0  ;;  %2036 = vmatprep.mubr.f32.mxu1 %v6080_v0  ;;  %v2209_v13 = vld [vmem:[#allocation21 + $0x1a0] sm:$0xff] }
 0xaa9   :  { %v1795_v9 = vadd.f32 %v4557_v29, %v1786_v14  ;;  %v1778_v21 = vmul.f32 %v5554_v15, %v6679_v60  ;;  %4673 = vmatpush3.msra.mxu0 %v2172_v19  ;;  %4714 = vmatpush3.msra.mxu1 %v2204_v7  ;;  %v2219_v60 = vld [vmem:[#allocation21 + $0x1f0] sm:$0xff]  ;;  %v2161_v14 = vld [vmem:[#allocation21 + $0x20] sm:$0xff] }
 0xaaa   :  { %4674 = vmatprep.subr.mxu0 %v2187_v24  ;;  %4715 = vmatprep.subr.mxu1 %v2219_v60  ;;  %v2193_v15 = vld [vmem:[#allocation21 + $0x120] sm:$0xff]  ;;  %v2159_v19 = vld [vmem:[#allocation21 + $0x10] sm:$0xff]  ;;  %v2174_v24 = vld [vmem:[#allocation21 + $0x88] sm:$0xff] }
 0xaab   :  { %1954 = vmatmul.mubr.f32.gmra.mxu0 %v1795_v9  ;;  %2037 = vmatmul.mubr.f32.gmra.mxu1 %v1795_v9  ;;  %v1787_v51 = vmul.f32 %v4556_v39, %v1778_v21  ;;  %v2195_v39 = vld [vmem:[#allocation21 + $0x130] sm:$0xff]  ;;  %v2176_v9 = vld [vmem:[#allocation21 + $0x98] sm:$0xff]  ;;  %v2206_v60 = vld [vmem:[#allocation21 + $0x188] sm:$0xff] }
 0xaac   :  { %1959 = vmatprep.mubr.f32.mxu0 %v6080_v0  ;;  %2042 = vmatprep.mubr.f32.mxu1 %v6080_v0  ;;  %v2208_v21 = vld [vmem:[#allocation21 + $0x198] sm:$0xff]  ;;  %v2191_v7 = vld [vmem:[#allocation21 + $0x110] sm:$0xff] }
 0xaad   :  { %v1796_v17 = vadd.f32 %v4557_v29, %v1787_v51  ;;  %4675 = vmatpush3.msra.mxu0 %v2171_v26  ;;  %4716 = vmatpush3.msra.mxu1 %v2203_v30  ;;  %v2210_v29 = vld [vmem:[#allocation21 + $0x1a8] sm:$0xff]  ;;  %v2160_v51 = vld [vmem:[#allocation21 + $0x18] sm:$0xff] }
 0xaae   :  { %4676 = vmatprep.subr.mxu0 %v2186_v31  ;;  %4717 = vmatprep.subr.mxu1 %v2218_v32  ;;  %v2158_v26 = vld [vmem:[#allocation21 + $0x8] sm:$0xff]  ;;  %v2173_v31 = vld [vmem:[#allocation21 + $0x80] sm:$0xff] }
 0xaaf   :  { %1960 = vmatmul.mubr.f32.gmra.mxu0 %v1796_v17  ;;  %2043 = vmatmul.mubr.f32.gmra.mxu1 %v1796_v17  ;;  %v2192_v17 = vld [vmem:[#allocation21 + $0x118] sm:$0xff]  ;;  %v2190_v30 = vld [vmem:[#allocation21 + $0x108] sm:$0xff]  ;;  %v2205_v32 = vld [vmem:[#allocation21 + $0x180] sm:$0xff] }
 0xab0   :  { %4677 = vmatpush3.msra.mxu0 %v2170_v33  ;;  %4718 = vmatpush3.msra.mxu1 %v2202_v35  ;;  %v2157_v33 = vld [vmem:[#allocation21] sm:$0xff] }
 0xab1   :  { %4678 = vmatprep.subr.mxu0 %v2185_v36  ;;  %4719 = vmatprep.subr.mxu1 %v2217_v37  ;;  %v2189_v35 = vld [vmem:[#allocation21 + $0x100] sm:$0xff]  ;;  %v1877_v37 = vsub.s32 3, %v6293_v8 }
 0xab2   :  { %4679 = vmatpush3.msra.mxu0 %v2169_v38  ;;  %4720 = vmatpush3.msra.mxu1 %v2201_v27  ;;  %v1861_v36 = vld [vmem:[%s7324_s2] sm:$0xf] }
 0xab3   :  { %4680 = vmatprep.subr.mxu0 %v2184_v40  ;;  %4721 = vmatprep.subr.mxu1 %v2216_v42  ;;  %v1866_v38 = vrot.slane %v1861_v36, %v6296_v10  ;;  %v1874_v27 = vrot.slane %v1861_v36, %v6301_v18 }
 0xab4   :  { %4681 = vmatpush3.msra.mxu0 %v2168_v44  ;;  %4722 = vmatpush3.msra.mxu1 %v2200_v45  ;;  %v1870_v44 = vrot.slane %v1861_v36, %v6311_v28  ;;  %v1878_v45 = vrot.slane %v1861_v36, %v1877_v37 }
 0xab5   :  { %4682 = vmatprep.subr.mxu0 %v2183_v47  ;;  %4723 = vmatprep.subr.mxu1 %v2215_v48 }
 0xab6   :  { %4683 = vmatpush3.msra.mxu0 %v2167_v49  ;;  %4724 = vmatpush3.msra.mxu1 %v2199_v52 }
 0xab7   :  { %4684 = vmatprep.subr.mxu0 %v2182_v53  ;;  %4725 = vmatprep.subr.mxu1 %v2214_v56 }
 0xab8   :  { %4685 = vmatpush3.msra.mxu0 %v2166_v54  ;;  %4726 = vmatpush3.msra.mxu1 %v2198_v58 }
 0xab9   :  { %4686 = vmatprep.subr.mxu0 %v2181_v50  ;;  %4727 = vmatprep.subr.mxu1 %v2213_v59 }
 0xaba   :  { %4687 = vmatpush3.msra.mxu0 %v2165_v62  ;;  %4728 = vmatpush3.msra.mxu1 %v2197_v63 }
 0xabb   :  { %4688 = vmatprep.subr.mxu0 %v2180_v4  ;;  %4729 = vmatprep.subr.mxu1 %v2212_v61 }
 0xabc   :  { %4689 = vmatpush3.msra.mxu0 %v2164_v2  ;;  %4730 = vmatpush3.msra.mxu1 %v2196_v5 }
 0xabd   :  { %4690 = vmatprep.subr.mxu0 %v2179_v25  ;;  %4731 = vmatprep.subr.mxu1 %v2211_v34 }
 0xabe   :  { %4691 = vmatpush3.msra.mxu0 %v2163_v6  ;;  %4732 = vmatpush3.msra.mxu1 %v2195_v39 }
 0xabf   :  { %4692 = vmatprep.subr.mxu0 %v2178_v11  ;;  %4733 = vmatprep.subr.mxu1 %v2210_v29 }
 0xac0   :  { %4693 = vmatpush3.msra.mxu0 %v2162_v43  ;;  %4734 = vmatpush3.msra.mxu1 %v2194_v3 }
 0xac1   :  { %4694 = vmatprep.subr.mxu0 %v2177_v12  ;;  %4735 = vmatprep.subr.mxu1 %v2209_v13 }
 0xac2   :  { %4695 = vmatpush3.msra.mxu0 %v2161_v14  ;;  %4736 = vmatpush3.msra.mxu1 %v2193_v15 }
 0xac3   :  { %4696 = vmatprep.subr.mxu0 %v2176_v9  ;;  %4737 = vmatprep.subr.mxu1 %v2208_v21 }
 0xac4   :  { %4697 = vmatpush3.msra.mxu0 %v2160_v51  ;;  %4738 = vmatpush3.msra.mxu1 %v2192_v17 }
 0xac5   :  { %4698 = vmatprep.subr.mxu0 %v2175_v57  ;;  %4739 = vmatprep.subr.mxu1 %v2207_v46 }
 0xac6   :  { %4699 = vmatpush3.msra.mxu0 %v2159_v19  ;;  %4740 = vmatpush3.msra.mxu1 %v2191_v7 }
 0xac7   :  { %4700 = vmatprep.subr.mxu0 %v2174_v24  ;;  %4741 = vmatprep.subr.mxu1 %v2206_v60 }
 0xac8   :  { %4701 = vmatpush3.msra.mxu0 %v2158_v26  ;;  %4742 = vmatpush3.msra.mxu1 %v2190_v30 }
 0xac9   :  { %4702 = vmatprep.subr.mxu0 %v2173_v31  ;;  %4743 = vmatprep.subr.mxu1 %v2205_v32 }
 0xaca   :  { %4703 = vmatpush3.msra.mxu0 %v2157_v33  ;;  %4744 = vmatpush3.msra.mxu1 %v2189_v35 }
 0xacb   :  { %5165 = vmatprep.subr.mxu1 %v6080_v0 }
 0xb67   :  { %v1949_v40 = vpop.f32.mrf.mxu0  ;;  %v2032_v42 = vpop.f32.mrf.mxu1 }
 0xb68   :  { %v6698_v47 = vadd.f32 %v1949_v40, %v1866_v38  ;;  %v6700_v48 = vadd.f32 %v2032_v42, %v1874_v27 }
 0xb69   :  { %v1951_v49 = vpop.f32.mrf.mxu0  ;;  %v2034_v52 = vpop.f32.mrf.mxu1 }
 0xb6a   :  { %v2061_v53 = vmul.f32 0.044715, %v6698_v47  ;;  %v2063_v56 = vmul.f32 0.044715, %v6700_v48  ;;  %v6704_v54 = vadd.f32 %v1951_v49, %v1870_v44  ;;  %v6706_v58 = vadd.f32 %v2034_v52, %v1878_v45 }
 0xb6b   :  { %v1955_v50 = vpop.f32.mrf.mxu0  ;;  %v2038_v59 = vpop.f32.mrf.mxu1 }
 0xb6c   :  { %v2073_v62 = vmul.f32 %v2061_v53, %v6698_v47  ;;  %v2075_v63 = vmul.f32 %v2063_v56, %v6700_v48  ;;  %v6710_v4 = vadd.f32 %v1955_v50, %v1866_v38  ;;  %v6712_v61 = vadd.f32 %v2038_v59, %v1874_v27 }
 0xb6d   :  { %v2062_v2 = vmul.f32 0.044715, %v6704_v54  ;;  %v2064_v5 = vmul.f32 0.044715, %v6706_v58  ;;  %v1957_v25 = vpop.f32.mrf.mxu0  ;;  %v2040_v34 = vpop.f32.mrf.mxu1 }
 0xb6e   :  { %v2085_v6 = vmul.f32 %v2073_v62, %v6698_v47  ;;  %v2087_v39 = vmul.f32 %v2075_v63, %v6700_v48  ;;  %v2065_v11 = vmul.f32 0.044715, %v6710_v4  ;;  %v6719_v29 = vadd.f32 %v1957_v25, %v1870_v44 }
 0xb6f   :  { %v6721_v43 = vadd.f32 %v2040_v34, %v1878_v45  ;;  %v1961_v3 = vpop.f32.mrf.mxu0  ;;  %v2044_v12 = vpop.f32.mrf.mxu1  ;;  %v2074_v15 = vmul.f32 %v2062_v2, %v6704_v54  ;;  %v2067_v9 = vmul.f32 0.044715, %v6712_v61  ;;  %v2076_v21 = vmul.f32 %v2064_v5, %v6706_v58 }
 0xb70   :  { %v2097_v13 = vadd.f32 %v2085_v6, %v6698_v47  ;;  %v2099_v14 = vadd.f32 %v2087_v39, %v6700_v48  ;;  %v2066_v51 = vmul.f32 0.044715, %v6719_v29  ;;  %v6730_v57 = vadd.f32 %v1961_v3, %v1866_v38 }
 0xb71   :  { %v2068_v17 = vmul.f32 0.044715, %v6721_v43  ;;  %v1963_v46 = vpop.f32.mrf.mxu0  ;;  %v2046_v19 = vpop.f32.mrf.mxu1  ;;  %v6732_v24 = vadd.f32 %v2044_v12, %v1874_v27  ;;  %v2077_v31 = vmul.f32 %v2065_v11, %v6710_v4  ;;  %v2086_v27 = vmul.f32 %v2074_v15, %v6704_v54 }
 0xb72   :  { %v2109_v7 = vmul.f32 0.7978846, %v2097_v13  ;;  %v6734_v60 = vadd.f32 %v1963_v46, %v1870_v44  ;;  %v6736_v26 = vadd.f32 %v2046_v19, %v1878_v45  ;;  %v2111_v30 = vmul.f32 0.7978846, %v2099_v14 }
 0xb73   :  { %v2078_v32 = vmul.f32 %v2066_v51, %v6719_v29  ;;  %v2080_v33 = vmul.f32 %v2068_v17, %v6721_v43  ;;  %v2069_v35 = vmul.f32 0.044715, %v6730_v57  ;;  %v2079_v40 = vmul.f32 %v2067_v9, %v6712_v61 }
 0xb74   :  { %v2070_v36 = vmul.f32 0.044715, %v6734_v60  ;;  %v2072_v38 = vmul.f32 0.044715, %v6736_v26  ;;  %v2088_v42 = vmul.f32 %v2076_v21, %v6706_v58  ;;  %5555 = vtanh.f32 %v2109_v7 }
 0xb75   :  { %v2071_v44 = vmul.f32 0.044715, %v6732_v24  ;;  %v2098_v49 = vadd.f32 %v2086_v27, %v6704_v54  ;;  %5557 = vtanh.f32 %v2111_v30  ;;  %v2090_v53 = vmul.f32 %v2078_v32, %v6719_v29 }
 0xb76   :  { %v2082_v45 = vmul.f32 %v2070_v36, %v6734_v60  ;;  %v2100_v52 = vadd.f32 %v2088_v42, %v6706_v58  ;;  %v2092_v56 = vmul.f32 %v2080_v33, %v6721_v43  ;;  %v2081_v50 = vmul.f32 %v2069_v35, %v6730_v57 }
 0xb77   :  { %v2084_v59 = vmul.f32 %v2072_v38, %v6736_v26  ;;  %v2110_v62 = vmul.f32 0.7978846, %v2098_v49  ;;  %v2089_v63 = vmul.f32 %v2077_v31, %v6710_v4  ;;  %v2102_v5 = vadd.f32 %v2090_v53, %v6719_v29 }
 0xb78   :  { %v2112_v2 = vmul.f32 0.7978846, %v2100_v52  ;;  %v2104_v25 = vadd.f32 %v2092_v56, %v6721_v43  ;;  %v2091_v34 = vmul.f32 %v2079_v40, %v6712_v61  ;;  %v2083_v6 = vmul.f32 %v2071_v44, %v6732_v24 }
 0xb79   :  { %5559 = vtanh.f32 %v2110_v62  ;;  %v2101_v39 = vadd.f32 %v2089_v63, %v6710_v4  ;;  %v2094_v11 = vmul.f32 %v2082_v45, %v6734_v60  ;;  %v2114_v3 = vmul.f32 0.7978846, %v2102_v5 }
 0xb7a   :  { %5561 = vtanh.f32 %v2112_v2  ;;  %v2116_v12 = vmul.f32 0.7978846, %v2104_v25  ;;  %v2103_v13 = vadd.f32 %v2091_v34, %v6712_v61  ;;  %v2096_v9 = vmul.f32 %v2084_v59, %v6736_v26 }
 0xb7b   :  { %v2113_v14 = vmul.f32 0.7978846, %v2101_v39  ;;  %v2106_v15 = vadd.f32 %v2094_v11, %v6734_v60  ;;  %5563 = vtanh.f32 %v2114_v3  ;;  %v2093_v51 = vmul.f32 %v2081_v50, %v6730_v57 }
 0xb7c   :  { %v2115_v21 = vmul.f32 0.7978846, %v2103_v13  ;;  %5565 = vtanh.f32 %v2116_v12  ;;  %v2108_v46 = vadd.f32 %v2096_v9, %v6736_v26  ;;  %v2095_v7 = vmul.f32 %v2083_v6, %v6732_v24 }
 0xb7d   :  { %v2118_v17 = vmul.f32 0.7978846, %v2106_v15  ;;  %5567 = vtanh.f32 %v2113_v14  ;;  %v2105_v19 = vadd.f32 %v2093_v51, %v6730_v57  ;;  %v2050_v42 = vmul.f32 0.5, %v6704_v54 }
 0xb7e   :  { %5569 = vtanh.f32 %v2115_v21  ;;  %v2120_v30 = vmul.f32 0.7978846, %v2108_v46  ;;  %v2107_v32 = vadd.f32 %v2095_v7, %v6732_v24  ;;  %v2049_v49 = vmul.f32 0.5, %v6698_v47 }
 0xb7f   :  { %5571 = vtanh.f32 %v2118_v17  ;;  %v2117_v31 = vmul.f32 0.7978846, %v2105_v19  ;;  %v2052_v52 = vmul.f32 0.5, %v6706_v58  ;;  %v2051_v50 = vmul.f32 0.5, %v6700_v48 }
 0xb80   :  { %5573 = vtanh.f32 %v2120_v30  ;;  %v2119_v35 = vmul.f32 0.7978846, %v2107_v32  ;;  %v2054_v5 = vmul.f32 0.5, %v6719_v29  ;;  %v2056_v6 = vmul.f32 0.5, %v6721_v43 }
 0xb81   :  { %v5556_v33 = vpop.eup %5555  ;;  %5575 = vtanh.f32 %v2117_v31  ;;  %v2053_v11 = vmul.f32 0.5, %v6710_v4  ;;  %v2055_v13 = vmul.f32 0.5, %v6712_v61  ;;  %v2058_v9 = vmul.f32 0.5, %v6734_v60 }
 0xb82   :  { %v5558_v36 = vpop.eup %5557  ;;  %5577 = vtanh.f32 %v2119_v35  ;;  %v2133_v27 = vadd.f32 1.0, %v5556_v33  ;;  %v2060_v17 = vmul.f32 0.5, %v6736_v26  ;;  %v2057_v19 = vmul.f32 0.5, %v6730_v57  ;;  %v4558_v35 = vld [vmem:[#allocation22] ss:$0 sm:$0xff] }
 0xb83   :  { %v2135_v45 = vadd.f32 1.0, %v5558_v36  ;;  %v2059_v32 = vmul.f32 0.5, %v6732_v24 }
 0xb84   :  { %v2145_v2 = vmul.f32 %v2133_v27, %v2049_v49 }
 0xb85   :  { %v2147_v54 = vmul.f32 %v2135_v45, %v2051_v50 }
 0xb86   :  { %v5560_v38 = vpop.eup %5559 }
 0xb87   :  { %v5562_v40 = vpop.eup %5561  ;;  %v2134_v44 = vadd.f32 1.0, %v5560_v38 }
 0xb88   :  { %v2136_v53 = vadd.f32 1.0, %v5562_v40  ;;  %v5564_v56 = vpop.eup %5563 }
 0xb89   :  { %v2146_v59 = vmul.f32 %v2134_v44, %v2050_v42  ;;  %v5566_v62 = vpop.eup %5565  ;;  %v2138_v25 = vadd.f32 1.0, %v5564_v56 }
 0xb8a   :  { %v2148_v63 = vmul.f32 %v2136_v53, %v2052_v52  ;;  %v5568_v34 = vpop.eup %5567  ;;  %v2140_v39 = vadd.f32 1.0, %v5566_v62 }
 0xb8b   :  { %2292 = vmatprep.mubr.f32.mxu0 %v2146_v59  ;;  %v5570_v47 = vpop.eup %5569  ;;  %v2150_v58 = vmul.f32 %v2138_v25, %v2054_v5  ;;  %v2137_v48 = vadd.f32 1.0, %v5568_v34 }
 0xb8c   :  { %2372 = vmatprep.mubr.f32.mxu1 %v2148_v63  ;;  %2293 = vmatmul.mubr.f32.vlgmr.msra.gmra.mxu0 %v2145_v2  ;;  %v5572_v3 = vpop.eup %5571  ;;  %v2152_v12 = vmul.f32 %v2140_v39, %v2056_v6  ;;  %v2139_v29 = vadd.f32 1.0, %v5570_v47 }
 0xb8d   :  { %2373 = vmatmul.mubr.f32.vlgmr.msra.gmra.mxu1 %v2147_v54  ;;  %v5574_v14 = vpop.eup %5573  ;;  %2297 = vmatprep.mubr.f32.mxu0 %v2150_v58  ;;  %v2149_v15 = vmul.f32 %v2137_v48, %v2053_v11  ;;  %v2142_v43 = vadd.f32 1.0, %v5572_v3  ;;  %v2492_v11 = vld [vmem:[#allocation12 + $0x2e8] sm:$0xff]  ;;  %v2494_v48 = vld [vmem:[#allocation12 + $0x2f8] sm:$0xff] }
 0xb8e   :  { %v5576_v21 = vpop.eup %5575  ;;  %2377 = vmatprep.mubr.f32.mxu1 %v2152_v12  ;;  %v2151_v51 = vmul.f32 %v2139_v29, %v2055_v13  ;;  %v2144_v46 = vadd.f32 1.0, %v5574_v14  ;;  %5166 = vmatpush3.msra.mxu1 %v2494_v48  ;;  %v2490_v3 = vld [vmem:[#allocation12 + $0x2d8] sm:$0xff]  ;;  %v2489_v12 = vld [vmem:[#allocation12 + $0x2d0] sm:$0xff]  ;;  %v2491_v13 = vld [vmem:[#allocation12 + $0x2e0] sm:$0xff] }
 0xb8f   :  { %v2154_v4 = vmul.f32 %v2142_v43, %v2058_v9  ;;  %v2141_v7 = vadd.f32 1.0, %v5576_v21  ;;  %v5578_v30 = vpop.eup %5577  ;;  %5167 = vmatprep.subr.mxu1 %v6080_v0  ;;  %v2488_v29 = vld [vmem:[#allocation12 + $0x2c8] sm:$0xff]  ;;  %v2486_v14 = vld [vmem:[#allocation12 + $0x2b8] sm:$0xff]  ;;  %v2483_v9 = vld [vmem:[#allocation12 + $0x2a0] sm:$0xff] }
 0xb90   :  { %2298 = vmatmul.mubr.f32.gmra.mxu0 %v2149_v15  ;;  %v2156_v61 = vmul.f32 %v2144_v46, %v2060_v17  ;;  %v2143_v60 = vadd.f32 1.0, %v5578_v30  ;;  %5168 = vmatpush3.msra.mxu1 %v2491_v13  ;;  %v2485_v15 = vld [vmem:[#allocation12 + $0x2b0] sm:$0xff]  ;;  %v2455_v48 = vld [vmem:[#allocation12 + $0x1c0] sm:$0xff]  ;;  %v2452_v13 = vld [vmem:[#allocation12 + $0x1a8] sm:$0xff] }
 0xb91   :  { %2378 = vmatmul.mubr.f32.gmra.mxu1 %v2151_v51  ;;  %2302 = vmatprep.mubr.f32.mxu0 %v2154_v4  ;;  %v2153_v31 = vmul.f32 %v2141_v7, %v2057_v19 }
 0xb92   :  { %2382 = vmatprep.mubr.f32.mxu1 %v2156_v61  ;;  %v2155_v33 = vmul.f32 %v2143_v60, %v2059_v32  ;;  %5169 = vmatprep.subr.mxu1 %v6080_v0  ;;  %v2481_v60 = vld [vmem:[#allocation12 + $0x290] sm:$0xff] }
 0xb93   :  { %5170 = vmatpush3.msra.mxu1 %v2488_v29  ;;  %v2447_v29 = vld [vmem:[#allocation12 + $0x180] sm:$0xff] }
 0xb94   :  { %2303 = vmatmul.mubr.f32.gmra.mxu0 %v2153_v31  ;;  %5171 = vmatprep.subr.mxu1 %v6080_v0 }
 0xb95   :  { %2577 = vmatprep.mubr.f32.mxu0 %v6080_v0  ;;  %2383 = vmatmul.mubr.f32.gmra.mxu1 %v2155_v33  ;;  %v2480_v33 = vld [vmem:[#allocation12 + $0x288] sm:$0xff] }
 0xb96   :  { %5197 = vmatprep.mubr.msk.f32.mxu1 %vm6082_vm0, %v6080_v0  ;;  %5172 = vmatpush3.msra.mxu1 %v2485_v15 }
 0xb97   :  { %5173 = vmatprep.subr.mxu1 %v6080_v0 }
 0xc4c   :  { %v4704_v26 = vpop.f32.mrf.mxu0 }
 0xc4d   :  { %v4745_v57 = vpop.f32.mrf.mxu1 }
 0xc4e   :  { %v4705_v36 = vpop.f32.mrf.mxu0 }
 0xc4f   :  { %v4706_v38 = vadd.f32 %v4705_v36, %v4704_v26  ;;  %v4746_v27 = vpop.f32.mrf.mxu1  ;;  %v2482_v26 = vld [vmem:[#allocation12 + $0x298] sm:$0xff]  ;;  %v2479_v36 = vld [vmem:[#allocation12 + $0x280] sm:$0xff] }
 0xc50   :  { %v4707_v40 = vpop.f32.mrf.mxu0  ;;  %v4747_v44 = vadd.f32 %v4746_v27, %v4745_v57  ;;  %5174 = vmatpush3.msra.mxu1 %v2482_v26  ;;  %v2478_v57 = vld [vmem:[#allocation12 + $0x278] sm:$0xff] }
 0xc51   :  { %v2295_v42 = vadd.f32 %v4706_v38, %v4558_v35  ;;  %v4748_v24 = vpop.f32.mrf.mxu1  ;;  %5175 = vmatprep.subr.mxu1 %v6080_v0  ;;  %v2475_v38 = vld [vmem:[#allocation12 + $0x260] sm:$0xff]  ;;  %v2474_v27 = vld [vmem:[#allocation12 + $0x258] sm:$0xff] }
 0xc52   :  { %v4708_v45 = vpop.f32.mrf.mxu0  ;;  %5176 = vmatpush3.msra.mxu1 %v2479_v36 }
 0xc53   :  { %v2375_v49 = vadd.f32 %v4747_v44, %v2295_v42  ;;  %v4709_v52 = vadd.f32 %v4708_v45, %v4707_v40  ;;  %v4749_v53 = vpop.f32.mrf.mxu1  ;;  %5177 = vmatprep.subr.mxu1 %v6080_v0  ;;  %v2476_v40 = vld [vmem:[#allocation12 + $0x268] sm:$0xff]  ;;  %v2471_v44 = vld [vmem:[#allocation12 + $0x240] sm:$0xff]  ;;  %v2469_v45 = vld [vmem:[#allocation12 + $0x230] sm:$0xff] }
 0xc54   :  { %v4710_v56 = vpop.f32.mrf.mxu0  ;;  %v4750_v59 = vadd.f32 %v4749_v53, %v4748_v24  ;;  %5178 = vmatpush3.msra.mxu1 %v2476_v40  ;;  %v2472_v42 = vld [vmem:[#allocation12 + $0x248] sm:$0xff]  ;;  %v2473_v24 = vld [vmem:[#allocation12 + $0x250] sm:$0xff]  ;;  %v2466_v53 = vld [vmem:[#allocation12 + $0x218] sm:$0xff] }
 0xc55   :  { %v2300_v50 = vadd.f32 %v4709_v52, %v4558_v35  ;;  %v6786_v62 = vadd.f32 %v2375_v49, %v6657_v16  ;;  %v4751_v63 = vpop.f32.mrf.mxu1  ;;  %v2493_v16 = vld [vmem:[#allocation12 + $0x2f0] sm:$0xff]  ;;  %5179 = vmatprep.subr.mxu1 %v6080_v0  ;;  %v2468_v49 = vld [vmem:[#allocation12 + $0x228] sm:$0xff]  ;;  %v2470_v52 = vld [vmem:[#allocation12 + $0x238] sm:$0xff] }
 0xc56   :  { %v4711_v2 = vpop.f32.mrf.mxu0  ;;  %2513 = vmatprep.subr.mxu0 %v2493_v16  ;;  %5180 = vmatpush3.msra.mxu1 %v2473_v24  ;;  %v2454_v16 = vld [vmem:[#allocation12 + $0x1b8] sm:$0xff] }
 0xc57   :  { %v2380_v5 = vadd.f32 %v4750_v59, %v2300_v50  ;;  %v4712_v25 = vadd.f32 %v4711_v2, %v4710_v56  ;;  %2395 = vadd.xlane.f32.xlu1 %v6786_v62  ;;  %v4752_v34 = vpop.f32.mrf.mxu1  ;;  %2514 = vmatpush1.msra.mxu0 %v2492_v11  ;;  %v2465_v56 = vld [vmem:[#allocation12 + $0x210] sm:$0xff]  ;;  %v2467_v50 = vld [vmem:[#allocation12 + $0x220] sm:$0xff]  ;;  %v2464_v2 = vld [vmem:[#allocation12 + $0x208] sm:$0xff] }
 0xc58   :  { %v4753_v6 = vadd.f32 %v4752_v34, %v4751_v63  ;;  %2515 = vmatprep.subr.mxu0 %v2490_v3  ;;  %5181 = vmatprep.subr.mxu1 %v6080_v0  ;;  %v2463_v59 = vld [vmem:[#allocation12 + $0x200] sm:$0xff]  ;;  %v2462_v63 = vld [vmem:[#allocation12 + $0x1f8] sm:$0xff]  ;;  %v2461_v34 = vld [vmem:[#allocation12 + $0x1f0] sm:$0xff] }
 0xc59   :  { %v2305_v54 = vadd.f32 %v4712_v25, %v4558_v35  ;;  %v6790_v39 = vadd.f32 %v2380_v5, %v6661_v20  ;;  %v2487_v20 = vld [vmem:[#allocation12 + $0x2c0] sm:$0xff]  ;;  %2516 = vmatpush1.msra.mxu0 %v2489_v12  ;;  %v2477_v35 = vld [vmem:[#allocation12 + $0x270] sm:$0xff]  ;;  %5182 = vmatpush3.msra.mxu1 %v2470_v52  ;;  %v2460_v5 = vld [vmem:[#allocation12 + $0x1e8] sm:$0xff] }
 0xc5a   :  { %2517 = vmatprep.subr.mxu0 %v2487_v20  ;;  %5183 = vmatprep.subr.mxu1 %v6080_v0  ;;  %v2459_v25 = vld [vmem:[#allocation12 + $0x1e0] sm:$0xff]  ;;  %v2453_v11 = vld [vmem:[#allocation12 + $0x1b0] sm:$0xff]  ;;  %v2450_v12 = vld [vmem:[#allocation12 + $0x198] sm:$0xff] }
 0xc5b   :  { %v2385_v47 = vadd.f32 %v4753_v6, %v2305_v54  ;;  %2397 = vadd.xlane.f32.xlu0 %v6790_v39  ;;  %2518 = vmatpush1.msra.mxu0 %v2486_v14  ;;  %v2457_v54 = vld [vmem:[#allocation12 + $0x1d0] sm:$0xff]  ;;  %v2456_v6 = vld [vmem:[#allocation12 + $0x1c8] sm:$0xff]  ;;  %v2451_v3 = vld [vmem:[#allocation12 + $0x1a0] sm:$0xff] }
 0xc5c   :  { %5184 = vmatpush3.msra.mxu1 %v2467_v50  ;;  %v2448_v20 = vld [vmem:[#allocation12 + $0x188] sm:$0xff]  ;;  %v2449_v14 = vld [vmem:[#allocation12 + $0x190] sm:$0xff] }
 0xc5d   :  { %v6794_v58 = vadd.f32 %v2385_v47, %v6665_v23  ;;  %v2484_v23 = vld [vmem:[#allocation12 + $0x2a8] sm:$0xff]  ;;  %5185 = vmatprep.subr.mxu1 %v6080_v0  ;;  %v2458_v47 = vld [vmem:[#allocation12 + $0x1d8] sm:$0xff] }
 0xc5e   :  { %2519 = vmatprep.subr.mxu0 %v2484_v23  ;;  %5186 = vmatpush3.msra.mxu1 %v2464_v2 }
 0xc5f   :  { %2399 = vadd.xlane.f32.xlu1 %v6794_v58  ;;  %2520 = vmatpush1.msra.mxu0 %v2483_v9 }
 0xc60   :  { %2521 = vmatprep.subr.mxu0 %v2481_v60  ;;  %5187 = vmatprep.subr.mxu1 %v6080_v0  ;;  %v4560_v60 = vld [vmem:[#allocation10 + $0x1] ss:$0 sm:$0xff] }
 0xc61   :  { %2522 = vmatpush1.msra.mxu0 %v2480_v33  ;;  %5188 = vmatpush3.msra.mxu1 %v2461_v34 }
 0xc62   :  { %2523 = vmatprep.subr.mxu0 %v2478_v57  ;;  %5189 = vmatprep.subr.mxu1 %v6080_v0 }
 0xc63   :  { %2524 = vmatpush1.msra.mxu0 %v2477_v35  ;;  %5190 = vmatpush3.msra.mxu1 %v2458_v47 }
 0xc64   :  { %2525 = vmatprep.subr.mxu0 %v2475_v38  ;;  %5191 = vmatprep.subr.mxu1 %v6080_v0 }
 0xc65   :  { %2526 = vmatpush1.msra.mxu0 %v2474_v27  ;;  %5192 = vmatpush3.msra.mxu1 %v2455_v48 }
 0xc66   :  { %2527 = vmatprep.subr.mxu0 %v2472_v42  ;;  %5193 = vmatprep.subr.mxu1 %v6080_v0 }
 0xc67   :  { %2528 = vmatpush1.msra.mxu0 %v2471_v44  ;;  %5194 = vmatpush3.msra.mxu1 %v2452_v13 }
 0xc68   :  { %2529 = vmatprep.subr.mxu0 %v2469_v45  ;;  %5195 = vmatprep.subr.mxu1 %v6080_v0  ;;  %v4561_v45 = vld [vmem:[%s7322_s29 + $0x3] sm:$0x7] }
 0xc69   :  { %2530 = vmatpush1.msra.mxu0 %v2468_v49  ;;  %5196 = vmatpush3.msra.mxu1 %v2449_v14  ;;  %v2509_v50 = vrot.slane %v4561_v45, %v6301_v18  ;;  %v2505_v2 = vrot.slane %v4561_v45, %v6311_v28  ;;  %v2501_v13 = vrot.slane %v4561_v45, %v6296_v10  ;;  %v6929_v45 = vld [vmem:[%s7323_s8 + $0x10] sm:$0xff] }
 0xc6a   :  { %2531 = vmatprep.subr.mxu0 %v2466_v53  ;;  %5251 = vmatprep.subr.mxu1 %v6080_v0 }
 0xc6b   :  { %2532 = vmatpush1.msra.mxu0 %v2465_v56 }
 0xc6c   :  { %2533 = vmatprep.subr.mxu0 %v2463_v59 }
 0xc6d   :  { %2534 = vmatpush1.msra.mxu0 %v2462_v63 }
 0xc6e   :  { %2535 = vmatprep.subr.mxu0 %v2460_v5 }
 0xc6f   :  { %2536 = vmatpush1.msra.mxu0 %v2459_v25 }
 0xc70   :  { %2537 = vmatprep.subr.mxu0 %v2457_v54 }
 0xc71   :  { %2538 = vmatpush1.msra.mxu0 %v2456_v6 }
 0xc72   :  { %2539 = vmatprep.subr.mxu0 %v2454_v16 }
 0xc73   :  { %2540 = vmatpush1.msra.mxu0 %v2453_v11 }
 0xc74   :  { %2541 = vmatprep.subr.mxu0 %v2451_v3 }
 0xc75   :  { %2542 = vmatpush1.msra.mxu0 %v2450_v12 }
 0xc76   :  { %2543 = vmatprep.subr.mxu0 %v2448_v20 }
 0xc77   :  { %2544 = vmatpush1.msra.mxu0 %v2447_v29 }
 0xc78   :  { %5206 = vmatprep.subr.mxu0 %v6080_v0 }
 0xce0   :  { %v2396_v43 = vpop.xlane.xlu1 %2395 }
 0xce1   :  { %v2401_v21 = vmul.f32 0.0078125, %v2396_v43 }
 0xce3   :  { %v6802_v51 = vsub.f32 %v6786_v62, %v2401_v21 }
 0xce4   :  { %v2398_v17 = vpop.xlane.xlu0 %2397 }
 0xce5   :  { %v2402_v46 = vmul.f32 0.0078125, %v2398_v17  ;;  %v2407_v4 = vmul.f32 %v6802_v51, %v6802_v51 }
 0xce7   :  { %v6807_v19 = vsub.f32 %v6790_v39, %v2402_v46  ;;  %2410 = vadd.xlane.f32.xlu0 %v2407_v4 }
 0xce8   :  { %v2400_v7 = vpop.xlane.xlu1 %2399 }
 0xce9   :  { %v2403_v30 = vmul.f32 0.0078125, %v2400_v7  ;;  %v2408_v61 = vmul.f32 %v6807_v19, %v6807_v19 }
 0xceb   :  { %v6812_v31 = vsub.f32 %v6794_v58, %v2403_v30  ;;  %2412 = vadd.xlane.f32.xlu1 %v2408_v61  ;;  %v4559_v61 = vld [vmem:[#allocation9 + $0x1] ss:$0 sm:$0xff] }
 0xced   :  { %v2409_v32 = vmul.f32 %v6812_v31, %v6812_v31 }
 0xcef   :  { %2414 = vadd.xlane.f32.xlu0 %v2409_v32 }
 0xd70   :  { %v2411_v23 = vpop.xlane.xlu0 %2410 }
 0xd71   :  { %v2416_v15 = vmul.f32 0.0078125, %v2411_v23 }
 0xd73   :  { %v2419_v9 = vadd.f32 1e-05, %v2416_v15 }
 0xd74   :  { %v2413_v43 = vpop.xlane.xlu1 %2412 }
 0xd75   :  { %5579 = vrsqrt.f32 %v2419_v9  ;;  %v2417_v21 = vmul.f32 0.0078125, %v2413_v43 }
 0xd77   :  { %v2420_v17 = vadd.f32 1e-05, %v2417_v21 }
 0xd78   :  { %v2415_v46 = vpop.xlane.xlu0 %2414 }
 0xd79   :  { %5581 = vrsqrt.f32 %v2420_v17  ;;  %v2418_v4 = vmul.f32 0.0078125, %v2415_v46 }
 0xd7b   :  { %v2421_v7 = vadd.f32 1e-05, %v2418_v4 }
 0xd7d   :  { %5583 = vrsqrt.f32 %v2421_v7 }
 0xd82   :  { %v5580_v30 = vpop.eup %5579 }
 0xd83   :  { %v2425_v32 = vmul.f32 %v5580_v30, %v6802_v51 }
 0xd85   :  { %v2434_v33 = vmul.f32 %v4559_v61, %v2425_v32 }
 0xd86   :  { %v5582_v26 = vpop.eup %5581 }
 0xd87   :  { %v2443_v57 = vadd.f32 %v4560_v60, %v2434_v33  ;;  %v2426_v35 = vmul.f32 %v5582_v26, %v6807_v19 }
 0xd89   :  { %2578 = vmatmul.mubr.f32.vlgmr.msra.gmra.mxu0 %v2443_v57  ;;  %5198 = vmatmul.mubr.f32.vlgmr.msra.gmra.mxu1 %v2443_v57  ;;  %v2435_v36 = vmul.f32 %v4559_v61, %v2426_v35 }
 0xd8a   :  { %v5584_v38 = vpop.eup %5583  ;;  %2583 = vmatprep.mubr.f32.mxu0 %v6080_v0  ;;  %5200 = vmatprep.mubr.msk.f32.mxu1 %vm6082_vm0, %v6080_v0 }
 0xd8b   :  { %v2444_v27 = vadd.f32 %v4560_v60, %v2435_v36  ;;  %v2427_v40 = vmul.f32 %v5584_v38, %v6812_v31  ;;  %v6919_v36 = vld [vmem:[%s7323_s8] sm:$0xff] }
 0xd8d   :  { %2584 = vmatmul.mubr.f32.gmra.mxu0 %v2444_v27  ;;  %5201 = vmatmul.mubr.f32.gmra.mxu1 %v2444_v27  ;;  %v2436_v51 = vmul.f32 %v4559_v61, %v2427_v40 }
 0xd8e   :  { %2589 = vmatprep.mubr.f32.mxu0 %v6080_v0  ;;  %5203 = vmatprep.mubr.msk.f32.mxu1 %vm6082_vm0, %v6080_v0 }
 0xd8f   :  { %v2445_v19 = vadd.f32 %v4560_v60, %v2436_v51 }
 0xd91   :  { %2590 = vmatmul.mubr.f32.gmra.mxu0 %v2445_v19  ;;  %5204 = vmatmul.mubr.f32.gmra.mxu1 %v2445_v19  ;;  %v6924_v19 = vld [vmem:[%s7323_s8 + $0x8] sm:$0xff] }
 0xd92   :  { %5212 = vmatprep.mubr.msk.f32.mxu0 %vm6082_vm0, %v6080_v0  ;;  %5257 = vmatprep.mubr.msk.f32.mxu1 %vm6082_vm0, %v6080_v0 }
 0xe49   :  { %v2579_v42 = vpop.f32.mrf.mxu0  ;;  %v2662_v44 = vpop.f32.mrf.mxu1 }
 0xe4a   :  { %v6849_v6 = vadd.f32 %v2662_v44, %v2509_v50  ;;  %v2580_v14 = vadd.f32 %v2579_v42, %v2501_v13 }
 0xe4b   :  { %v2581_v31 = vpop.f32.mrf.mxu0  ;;  %v5199_v24 = vpop.f32.mrf.mxu1 }
 0xe4c   :  { %v2795_v12 = vmul.f32 %v6365_v22, %v6849_v6  ;;  %v6867_v20 = vadd.f32 %v2581_v31, %v2505_v2  ;;  %v6875_v15 = vmul.f32 0.17677669, %v2580_v14  ;;  %v2914_v61 = vmul.f32 %v6399_v41, %v6849_v6 }
 0xe4d   :  { %v2585_v49 = vpop.f32.mrf.mxu0  ;;  %v2667_v52 = vpop.f32.mrf.mxu1 }
 0xe4e   :  { %v6845_v5 = vadd.f32 %v2667_v52, %v2509_v50  ;;  %v2679_v23 = vmul.f32 %v6365_v22, %v6867_v20  ;;  %v2586_v9 = vadd.f32 %v2585_v49, %v2501_v13  ;;  %v2798_v4 = vmul.f32 %v6399_v41, %v6867_v20 }
 0xe4f   :  { %v2587_v53 = vpop.f32.mrf.mxu0  ;;  %v5202_v56 = vpop.f32.mrf.mxu1 }
 0xe50   :  { %v6855_v11 = vadd.f32 %v2587_v53, %v2505_v2  ;;  %v2796_v3 = vmul.f32 %v6365_v22, %v6845_v5  ;;  %v6883_v21 = vmul.f32 0.17677669, %v2586_v9  ;;  %v2915_v30 = vmul.f32 %v6399_v41, %v6845_v5 }
 0xe51   :  { %v2591_v59 = vpop.f32.mrf.mxu0  ;;  %v2672_v63 = vpop.f32.mrf.mxu1 }
 0xe52   :  { %v6847_v25 = vadd.f32 %v2672_v63, %v2509_v50  ;;  %v2680_v29 = vmul.f32 %v6365_v22, %v6855_v11  ;;  %v2592_v17 = vadd.f32 %v2591_v59, %v2501_v13 }
 0xe53   :  { %v2593_v34 = vpop.f32.mrf.mxu0  ;;  %v5205_v54 = vpop.f32.mrf.mxu1 }
 0xe54   :  { %v6851_v47 = vadd.f32 %v2593_v34, %v2505_v2  ;;  %v2797_v16 = vmul.f32 %v6365_v22, %v6847_v25  ;;  %v6891_v46 = vmul.f32 0.17677669, %v2592_v17  ;;  %v2916_v7 = vmul.f32 %v6399_v41, %v6847_v25 }
 0xe56   :  { %5252 = vmatpush3.msra.mxu1 %v2797_v16  ;;  %v2681_v48 = vmul.f32 %v6365_v22, %v6851_v47  ;;  %v2800_v43 = vmul.f32 %v6399_v41, %v6851_v47  ;;  %v2799_v22 = vmul.f32 %v6399_v41, %v6855_v11 }
 0xe57   :  { %5253 = vmatprep.subr.mxu1 %v6080_v0 }
 0xe58   :  { %5207 = vmatpush3.xpose.msra.mxu0 %v2681_v48  ;;  %5254 = vmatpush3.msra.mxu1 %v2796_v3 }
 0xe59   :  { %5255 = vmatprep.subr.mxu1 %v6080_v0  ;;  %5208 = vmatprep.subr.mxu0 %v6080_v0 }
 0xe5a   :  { %5256 = vmatpush3.msra.mxu1 %v2795_v12 }
 0xe5b   :  { %5281 = vmatprep.subr.mxu1 %v6080_v0 }
 0xe5c   :  { %5209 = vmatpush3.xpose.msra.mxu0 %v2680_v29 }
 0xe5d   :  { %5210 = vmatprep.subr.mxu0 %v6080_v0 }
 0xe60   :  { %5211 = vmatpush3.xpose.msra.mxu0 %v2679_v23 }
 0xe61   :  { %5221 = vmatprep.subr.mxu0 %v6080_v0 }
 0xe63   :  { %5213 = vmatmul.mubr.f32.vlgmr.msra.gmra.mxu0 %v6875_v15 }
 0xe64   :  { %5222 = vmatpush3.xpose.msra.mxu0 %v2800_v43  ;;  %5215 = vmatprep.mubr.msk.f32.mxu0 %vm6082_vm0, %v6080_v0 }
 0xe65   :  { %5223 = vmatprep.subr.mxu0 %v6080_v0 }
 0xe67   :  { %5216 = vmatmul.mubr.f32.gmra.mxu0 %v6883_v21 }
 0xe68   :  { %5224 = vmatpush3.xpose.msra.mxu0 %v2799_v22  ;;  %5218 = vmatprep.mubr.msk.f32.mxu0 %vm6082_vm0, %v6080_v0 }
 0xe69   :  { %5225 = vmatprep.subr.mxu0 %v6080_v0 }
 0xe6b   :  { %5219 = vmatmul.mubr.f32.gmra.mxu0 %v6891_v46 }
 0xe6c   :  { %5226 = vmatpush3.xpose.msra.mxu0 %v2798_v4  ;;  %5227 = vmatprep.mubr.msk.f32.mxu0 %vm6082_vm0, %v6080_v0 }
 0xe6d   :  { %5236 = vmatprep.subr.mxu0 %v6080_v0 }
 0xe6f   :  { %5228 = vmatmul.mubr.f32.vlgmr.msra.gmra.mxu0 %v6875_v15 }
 0xe70   :  { %5237 = vmatpush3.msra.mxu0 %v2916_v7  ;;  %5230 = vmatprep.mubr.msk.f32.mxu0 %vm6082_vm0, %v6080_v0 }
 0xe71   :  { %5238 = vmatprep.subr.mxu0 %v6080_v0 }
 0xe72   :  { %5239 = vmatpush3.msra.mxu0 %v2915_v30 }
 0xe73   :  { %5231 = vmatmul.mubr.f32.gmra.mxu0 %v6883_v21  ;;  %5240 = vmatprep.subr.mxu0 %v6080_v0 }
 0xe74   :  { %5241 = vmatpush3.msra.mxu0 %v2914_v61  ;;  %5233 = vmatprep.mubr.msk.f32.mxu0 %vm6082_vm0, %v6080_v0 }
 0xe75   :  { %5266 = vmatprep.subr.mxu0 %v6080_v0 }
 0xe77   :  { %5234 = vmatmul.mubr.f32.gmra.mxu0 %v6891_v46 }
 0xe78   :  { %5242 = vmatprep.mubr.msk.f32.mxu0 %vm6082_vm0, %v6080_v0 }
 0xf23   :  { %v2748_v32 = vpop.f32.mrf.mxu0 }
 0xf24   :  { %v6935_v29 = vadd.f32 %v6919_v36, %v2748_v32 }
 0xf25   :  { %v5214_v60 = vpop.f32.mrf.mxu0 }
 0xf26   :  { %v2762_v17 = vsel %vm882_vm7, %v6935_v29, -inf }
 0xf27   :  { %v2753_v33 = vpop.f32.mrf.mxu0 }
 0xf28   :  { %v6939_v9 = vadd.f32 %v6924_v19, %v2753_v33 }
 0xf29   :  { %v5217_v41 = vpop.f32.mrf.mxu0 }
 0xf2a   :  { %v2765_v7 = vsel %vm882_vm7, %v6939_v9, -inf  ;;  %v3097_v41 = vmul.f32 %v6477_v55, %v6851_v47 }
 0xf2b   :  { %v2758_v26 = vpop.f32.mrf.mxu0 }
 0xf2c   :  { %v6942_v43 = vadd.f32 %v6929_v45, %v2758_v26 }
 0xf2d   :  { %v5220_v57 = vpop.f32.mrf.mxu0 }
 0xf2e   :  { %v2768_v4 = vsel %vm882_vm7, %v6942_v43, -inf }
 0xf2f   :  { %v2867_v35 = vpop.f32.mrf.mxu0 }
 0xf30   :  { %v2868_v38 = vadd.f32 %v6919_v36, %v2867_v35  ;;  %v3096_v35 = vmul.f32 %v6477_v55, %v6855_v11 }
 0xf31   :  { %v5229_v27 = vpop.f32.mrf.mxu0 }
 0xf32   :  { %v2881_v40 = vsel %vm882_vm7, %v2868_v38, -inf }
 0xf33   :  { %2882 = vmax.xlane.f32.xlu1 %v2881_v40  ;;  %v2872_v51 = vpop.f32.mrf.mxu0  ;;  %v3095_v40 = vmul.f32 %v6477_v55, %v6867_v20 }
 0xf34   :  { %v2873_v42 = vadd.f32 %v6924_v19, %v2872_v51  ;;  %v3308_v51 = vmul.f32 %v6499_v1, %v6851_v47  ;;  %v3306_v47 = vmul.f32 %v6499_v1, %v6867_v20 }
 0xf35   :  { %v5232_v44 = vpop.f32.mrf.mxu0 }
 0xf36   :  { %v2884_v31 = vsel %vm882_vm7, %v2873_v42, -inf }
 0xf37   :  { %2885 = vmax.xlane.f32.xlu0 %v2884_v31  ;;  %v2877_v24 = vpop.f32.mrf.mxu0 }
 0xf38   :  { %v2878_v49 = vadd.f32 %v6929_v45, %v2877_v24 }
 0xf39   :  { %v5235_v52 = vpop.f32.mrf.mxu0 }
 0xf3a   :  { %v2887_v53 = vsel %vm882_vm7, %v2878_v49, -inf }
 0xf3b   :  { %2888 = vmax.xlane.f32.xlu1 %v2887_v53 }
 0xfbc   :  { %v2883_v56 = vpop.xlane.xlu1 %2882 }
 0xfbd   :  { %v2890_v50 = vsub.f32 %v2868_v38, %v2883_v56 }
 0xfbf   :  { %v2893_v59 = vmul.f32 1.442695, %v2890_v50 }
 0xfc0   :  { %v2886_v63 = vpop.xlane.xlu0 %2885 }
 0xfc1   :  { %5585 = vpow2.f32 %v2893_v59  ;;  %v2891_v2 = vsub.f32 %v2873_v42, %v2886_v63  ;;  %v3307_v42 = vmul.f32 %v6499_v1, %v6855_v11 }
 0xfc3   :  { %v2895_v34 = vmul.f32 1.442695, %v2891_v2 }
 0xfc4   :  { %v2889_v54 = vpop.xlane.xlu1 %2888 }
 0xfc5   :  { %5587 = vpow2.f32 %v2895_v34  ;;  %v2892_v16 = vsub.f32 %v2878_v49, %v2889_v54 }
 0xfc7   :  { %v2897_v48 = vmul.f32 1.442695, %v2892_v16 }
 0xfc9   :  { %5589 = vpow2.f32 %v2897_v48 }
 0xfce   :  { %v5586_v3 = vpop.eup %5585 }
 0xfcf   :  { %v2899_v12 = vsel %vm882_vm7, %v5586_v3, 0.0 }
 0xfd0   :  { %2900 = vadd.xlane.f32.xlu0 %v2899_v12 }
 0xfd2   :  { %v5588_v13 = vpop.eup %5587 }
 0xfd3   :  { %v2902_v14 = vsel %vm882_vm7, %v5588_v13, 0.0 }
 0xfd4   :  { %2903 = vadd.xlane.f32.xlu1 %v2902_v14 }
 0xfd6   :  { %v5590_v23 = vpop.eup %5589 }
 0xfd7   :  { %v2905_v22 = vsel %vm882_vm7, %v5590_v23, 0.0 }
 0xfd8   :  { %2763 = vmax.xlane.f32.xlu1 %v2762_v17  ;;  %2906 = vadd.xlane.f32.xlu0 %v2905_v22 }
 0xfdc   :  { %2769 = vmax.xlane.f32.xlu1 %v2768_v4  ;;  %2766 = vmax.xlane.f32.xlu0 %v2765_v7 }
0x1059   :  { %v2901_v30 = vpop.xlane.xlu0 %2900 }
0x105a   :  { %5591 = vrcp.f32 %v2901_v30 }
0x105d   :  { %v2904_v61 = vpop.xlane.xlu1 %2903 }
0x105e   :  { %5593 = vrcp.f32 %v2904_v61 }
0x1061   :  { %v2907_v32 = vpop.xlane.xlu0 %2906  ;;  %v2764_v11 = vpop.xlane.xlu1 %2763 }
0x1062   :  { %5595 = vrcp.f32 %v2907_v32  ;;  %v2771_v31 = vsub.f32 %v6935_v29, %v2764_v11 }
0x1064   :  { %v2774_v53 = vmul.f32 1.442695, %v2771_v31 }
0x1065   :  { %v2770_v24 = vpop.xlane.xlu1 %2769 }
0x1066   :  { %v2773_v56 = vsub.f32 %v6942_v43, %v2770_v24  ;;  %5597 = vpow2.f32 %v2774_v53 }
0x1067   :  { %v5592_v60 = vpop.eup %5591 }
0x1068   :  { %v2909_v33 = vmul.f32 %v5592_v60, %v5586_v3  ;;  %v2778_v63 = vmul.f32 1.442695, %v2773_v56 }
0x106a   :  { %5243 = vmatmul.mubr.msk.f32.vlgmr.msra.gmra.mxu0 %vm882_vm7, %v2909_v33 }
0x106b   :  { %v5594_v26 = vpop.eup %5593  ;;  %5267 = vmatpush3.xpose.msra.mxu0 %v3097_v41  ;;  %5245 = vmatprep.mubr.msk.f32.mxu0 %vm6082_vm0, %v6080_v0 }
0x106c   :  { %5268 = vmatprep.subr.mxu0 %v6080_v0  ;;  %v2911_v57 = vmul.f32 %v5594_v26, %v5588_v13 }
0x106e   :  { %5246 = vmatmul.mubr.msk.f32.gmra.mxu0 %vm882_vm7, %v2911_v57 }
0x106f   :  { %v5596_v38 = vpop.eup %5595  ;;  %5269 = vmatpush3.xpose.msra.mxu0 %v3096_v35  ;;  %5248 = vmatprep.mubr.msk.f32.mxu0 %vm6082_vm0, %v6080_v0 }
0x1070   :  { %5270 = vmatprep.subr.mxu0 %v6080_v0  ;;  %v2913_v27 = vmul.f32 %v5596_v38, %v5590_v23 }
0x1072   :  { %5249 = vmatmul.mubr.msk.f32.gmra.mxu0 %vm882_vm7, %v2913_v27 }
0x1073   :  { %5271 = vmatpush3.xpose.msra.mxu0 %v3095_v40  ;;  %5272 = vmatprep.mubr.msk.f32.mxu0 %vm6082_vm0, %v6080_v0  ;;  %v5598_v43 = vpop.eup %5597 }
0x1074   :  { %5296 = vmatprep.subr.mxu0 %v6080_v0  ;;  %v2780_v30 = vsel %vm882_vm7, %v5598_v43, 0.0 }
0x1076   :  { %5273 = vmatmul.mubr.f32.vlgmr.msra.gmra.mxu0 %v6875_v15 }
0x1077   :  { %5297 = vmatpush3.xpose.msra.mxu0 %v3308_v51  ;;  %5275 = vmatprep.mubr.msk.f32.mxu0 %vm6082_vm0, %v6080_v0 }
0x1078   :  { %5298 = vmatprep.subr.mxu0 %v6080_v0 }
0x107a   :  { %5276 = vmatmul.mubr.f32.gmra.mxu0 %v6883_v21 }
0x107b   :  { %5299 = vmatpush3.xpose.msra.mxu0 %v3307_v42  ;;  %5278 = vmatprep.mubr.msk.f32.mxu0 %vm6082_vm0, %v6080_v0 }
0x107c   :  { %5300 = vmatprep.subr.mxu0 %v6080_v0 }
0x107e   :  { %5279 = vmatmul.mubr.f32.gmra.mxu0 %v6891_v46 }
0x107f   :  { %5301 = vmatpush3.xpose.msra.mxu0 %v3306_v47  ;;  %5302 = vmatprep.mubr.msk.f32.mxu0 %vm6082_vm0, %v6080_v0 }
0x1080   :  { %5326 = vmatprep.subr.mxu0 %v6080_v0 }
0x1082   :  { %5303 = vmatmul.mubr.f32.vlgmr.msra.gmra.mxu0 %v6875_v15  ;;  %v2767_v15 = vpop.xlane.xlu0 %2766 }
0x1083   :  { %5305 = vmatprep.mubr.msk.f32.mxu0 %vm6082_vm0, %v6080_v0 }
0x1086   :  { %5306 = vmatmul.mubr.f32.gmra.mxu0 %v6883_v21  ;;  %v2772_v21 = vsub.f32 %v6939_v9, %v2767_v15 }
0x1087   :  { %5308 = vmatprep.mubr.msk.f32.mxu0 %vm6082_vm0, %v6080_v0 }
0x1088   :  { %v2776_v50 = vmul.f32 1.442695, %v2772_v21 }
0x108a   :  { %5309 = vmatmul.mubr.f32.gmra.mxu0 %v6891_v46  ;;  %5599 = vpow2.f32 %v2776_v50 }
0x108b   :  { %5358 = vmatprep.mubr.msk.f32.mxu0 %vm6082_vm0, %v6080_v0  ;;  %5601 = vpow2.f32 %v2778_v63 }
0x1097   :  { %v5600_v7 = vpop.eup %5599 }
0x1098   :  { %v7014_v32 = vpop.eup %5601  ;;  %v2783_v26 = vsel %vm882_vm7, %v5600_v7, 0.0 }
0x1099   :  { %v2786_v41 = vsel %vm882_vm7, %v7014_v32, 0.0 }
0x112a   :  { %v6996_v20 = vpop.f32.mrf.mxu0 }
0x112c   :  { %v5244_v44 = vpop.f32.mrf.mxu0 }
0x112e   :  { %v6999_v49 = vpop.f32.mrf.mxu0 }
0x1130   :  { %v5247_v52 = vpop.f32.mrf.mxu0 }
0x1132   :  { %v7003_v46 = vpop.f32.mrf.mxu0 }
0x1134   :  { %v5250_v59 = vpop.f32.mrf.mxu0 }
0x1136   :  { %v3164_v2 = vpop.f32.mrf.mxu0 }
0x1137   :  { %v3165_v34 = vadd.f32 %v6919_v36, %v3164_v2 }
0x1138   :  { %v5274_v54 = vpop.f32.mrf.mxu0 }
0x1139   :  { %v3178_v16 = vsel %vm882_vm7, %v3165_v34, -inf }
0x113a   :  { %3179 = vmax.xlane.f32.xlu0 %v3178_v16  ;;  %v3169_v48 = vpop.f32.mrf.mxu0 }
0x113b   :  { %v3170_v3 = vadd.f32 %v6924_v19, %v3169_v48 }
0x113c   :  { %v5277_v12 = vpop.f32.mrf.mxu0 }
0x113d   :  { %v3181_v13 = vsel %vm882_vm7, %v3170_v3, -inf }
0x113e   :  { %3182 = vmax.xlane.f32.xlu1 %v3181_v13  ;;  %v3174_v29 = vpop.f32.mrf.mxu0  ;;  %v3212_v13 = vmul.f32 %v6477_v55, %v6845_v5 }
0x113f   :  { %v3175_v14 = vadd.f32 %v6929_v45, %v3174_v29 }
0x1140   :  { %v5280_v23 = vpop.f32.mrf.mxu0 }
0x1141   :  { %v3184_v9 = vsel %vm882_vm7, %v3175_v14, -inf }
0x1142   :  { %3185 = vmax.xlane.f32.xlu0 %v3184_v9  ;;  %v3375_v17 = vpop.f32.mrf.mxu0 }
0x1143   :  { %v3376_v22 = vadd.f32 %v6919_v36, %v3375_v17  ;;  %v3211_v17 = vmul.f32 %v6477_v55, %v6849_v6 }
0x1144   :  { %v5304_v4 = vpop.f32.mrf.mxu0 }
0x1145   :  { %v3389_v61 = vsel %vm882_vm7, %v3376_v22, -inf }
0x1146   :  { %2781 = vadd.xlane.f32.xlu0 %v2780_v30  ;;  %3390 = vmax.xlane.f32.xlu1 %v3389_v61  ;;  %v3380_v60 = vpop.f32.mrf.mxu0 }
0x1147   :  { %v3381_v16 = vadd.f32 %v6924_v19, %v3380_v60 }
0x1148   :  { %v5307_v33 = vpop.f32.mrf.mxu0 }
0x1149   :  { %v3392_v23 = vsel %vm882_vm7, %v3381_v16, -inf }
0x114a   :  { %2787 = vadd.xlane.f32.xlu0 %v2786_v41  ;;  %2784 = vadd.xlane.f32.xlu1 %v2783_v26  ;;  %v3385_v36 = vpop.f32.mrf.mxu0  ;;  %v3424_v26 = vmul.f32 %v6499_v1, %v6847_v25 }
0x114c   :  { %v5310_v57 = vpop.f32.mrf.mxu0 }
0x11c3   :  { %v3180_v35 = vpop.xlane.xlu0 %3179 }
0x11c4   :  { %v3187_v38 = vsub.f32 %v3165_v34, %v3180_v35 }
0x11c6   :  { %v3190_v27 = vmul.f32 1.442695, %v3187_v38  ;;  %v3423_v38 = vmul.f32 %v6499_v1, %v6845_v5 }
0x11c7   :  { %v3183_v40 = vpop.xlane.xlu1 %3182 }
0x11c8   :  { %5603 = vpow2.f32 %v3190_v27  ;;  %v3188_v51 = vsub.f32 %v3170_v3, %v3183_v40  ;;  %v3213_v3 = vmul.f32 %v6477_v55, %v6847_v25  ;;  %v3422_v25 = vmul.f32 %v6499_v1, %v6849_v6 }
0x11ca   :  { %v3192_v42 = vmul.f32 1.442695, %v3188_v51 }
0x11cb   :  { %v3186_v47 = vpop.xlane.xlu0 %3185 }
0x11cc   :  { %5605 = vpow2.f32 %v3192_v42  ;;  %v3189_v11 = vsub.f32 %v3175_v14, %v3186_v47  ;;  %v3386_v14 = vadd.f32 %v6929_v45, %v3385_v36 }
0x11ce   :  { %v3194_v44 = vmul.f32 1.442695, %v3189_v11  ;;  %v3395_v45 = vsel %vm882_vm7, %v3386_v14, -inf }
0x11cf   :  { %v2782_v31 = vpop.xlane.xlu0 %2781  ;;  %v3391_v15 = vpop.xlane.xlu1 %3390 }
0x11d0   :  { %5607 = vpow2.f32 %v3194_v44  ;;  %v3398_v24 = vsub.f32 %v3376_v22, %v3391_v15  ;;  %v3532_v15 = vld [vmem:[#allocation13 + $0xf0] sm:$0xff] }
0x11d1   :  { %5609 = vrcp.f32 %v2782_v31  ;;  %v3533_v31 = vld [vmem:[#allocation13 + $0xf8] sm:$0xff] }
0x11d2   :  { %v3401_v21 = vmul.f32 1.442695, %v3398_v24  ;;  %5327 = vmatpush3.msra.mxu0 %v3533_v31  ;;  %v3744_v31 = vld [vmem:[#allocation19 + $0x3f8] sm:$0xff] }
0x11d3   :  { %v2785_v52 = vpop.xlane.xlu1 %2784  ;;  %v2788_v56 = vpop.xlane.xlu0 %2787  ;;  %5328 = vmatprep.subr.mxu0 %v6080_v0 }
0x11d4   :  { %5611 = vpow2.f32 %v3401_v21  ;;  %v3531_v21 = vld [vmem:[#allocation13 + $0xe8] sm:$0xff]  ;;  %5329 = vmatpush3.msra.mxu0 %v3532_v15 }
0x11d5   :  { %v5604_v53 = vpop.eup %5603  ;;  %5613 = vrcp.f32 %v2785_v52  ;;  %5330 = vmatprep.subr.mxu0 %v6080_v0  ;;  %v3741_v15 = vld [vmem:[#allocation19 + $0x3e0] sm:$0xff] }
0x11d6   :  { %v3196_v50 = vsel %vm882_vm7, %v5604_v53, 0.0  ;;  %5615 = vrcp.f32 %v2788_v56  ;;  %5331 = vmatpush3.msra.mxu0 %v3531_v21  ;;  %v3529_v56 = vld [vmem:[#allocation13 + $0xd8] sm:$0xff]  ;;  %v3738_v21 = vld [vmem:[#allocation19 + $0x3c8] sm:$0xff] }
0x11d7   :  { %3197 = vadd.xlane.f32.xlu1 %v3196_v50  ;;  %5332 = vmatprep.subr.mxu0 %v6080_v0 }
0x11d9   :  { %v5606_v59 = vpop.eup %5605 }
0x11da   :  { %v3199_v63 = vsel %vm882_vm7, %v5606_v59, 0.0 }
0x11db   :  { %3200 = vadd.xlane.f32.xlu0 %v3199_v63 }
0x11dd   :  { %v7021_v2 = vpop.eup %5607 }
0x11de   :  { %v5610_v34 = vpop.eup %5609  ;;  %v3202_v54 = vsel %vm882_vm7, %v7021_v2, 0.0 }
0x11df   :  { %v2790_v48 = vmul.f32 %v5610_v34, %v5598_v43  ;;  %3203 = vadd.xlane.f32.xlu1 %v3202_v54  ;;  %v3526_v54 = vld [vmem:[#allocation13 + $0xc0] sm:$0xff] }
0x11e1   :  { %v7028_v12 = vpop.eup %5611  ;;  %5258 = vmatmul.mubr.msk.f32.vlgmr.msra.gmra.mxu1 %vm882_vm7, %v2790_v48  ;;  %v3525_v48 = vld [vmem:[#allocation13 + $0xb8] sm:$0xff] }
0x11e2   :  { %5282 = vmatpush3.msra.mxu1 %v3213_v3  ;;  %5260 = vmatprep.mubr.msk.f32.mxu1 %vm6082_vm0, %v6080_v0  ;;  %v3407_v29 = vsel %vm882_vm7, %v7028_v12, 0.0  ;;  %v5614_v19 = vpop.eup %5613  ;;  %v3524_v3 = vld [vmem:[#allocation13 + $0xb0] sm:$0xff] }
0x11e3   :  { %5283 = vmatprep.subr.mxu1 %v6080_v0  ;;  %3408 = vadd.xlane.f32.xlu0 %v3407_v29  ;;  %v2792_v9 = vmul.f32 %v5614_v19, %v5600_v7  ;;  %v5616_v43 = vpop.eup %5615  ;;  %v3521_v29 = vld [vmem:[#allocation13 + $0x98] sm:$0xff]  ;;  %v3520_v19 = vld [vmem:[#allocation13 + $0x90] sm:$0xff] }
0x11e4   :  { %5284 = vmatpush3.msra.mxu1 %v3212_v13  ;;  %3393 = vmax.xlane.f32.xlu1 %v3392_v23  ;;  %v2794_v22 = vmul.f32 %v5616_v43, %v7014_v32  ;;  %v3522_v13 = vld [vmem:[#allocation13 + $0xa0] sm:$0xff] }
0x11e5   :  { %5285 = vmatprep.subr.mxu1 %v6080_v0  ;;  %5261 = vmatmul.mubr.msk.f32.gmra.mxu1 %vm882_vm7, %v2792_v9  ;;  %v3518_v23 = vld [vmem:[#allocation13 + $0x80] sm:$0xff] }
0x11e6   :  { %5286 = vmatpush3.msra.mxu1 %v3211_v17  ;;  %5263 = vmatprep.mubr.msk.f32.mxu1 %vm6082_vm0, %v6080_v0 }
0x11e7   :  { %3396 = vmax.xlane.f32.xlu0 %v3395_v45  ;;  %5311 = vmatprep.subr.mxu1 %v6080_v0 }
0x11e9   :  { %5264 = vmatmul.mubr.msk.f32.gmra.mxu1 %vm882_vm7, %v2794_v22 }
0x11ea   :  { %5287 = vmatprep.mubr.msk.f32.mxu1 %vm6082_vm0, %v6080_v0 }
0x1260   :  { %v3198_v4 = vpop.xlane.xlu1 %3197 }
0x1261   :  { %5617 = vrcp.f32 %v3198_v4 }
0x1264   :  { %v3201_v55 = vpop.xlane.xlu0 %3200 }
0x1265   :  { %5619 = vrcp.f32 %v3201_v55 }
0x1268   :  { %v3204_v7 = vpop.xlane.xlu1 %3203 }
0x1269   :  { %5621 = vrcp.f32 %v3204_v7 }
0x126c   :  { %v3409_v30 = vpop.xlane.xlu0 %3408 }
0x126d   :  { %5623 = vrcp.f32 %v3409_v30  ;;  %v3394_v61 = vpop.xlane.xlu1 %3393 }
0x126e   :  { %v5618_v60 = vpop.eup %5617  ;;  %v3399_v33 = vsub.f32 %v3381_v16, %v3394_v61 }
0x126f   :  { %v3206_v41 = vmul.f32 %v5618_v60, %v5604_v53  ;;  %v3530_v53 = vld [vmem:[#allocation13 + $0xe0] sm:$0xff] }
0x1270   :  { %v3403_v32 = vmul.f32 1.442695, %v3399_v33  ;;  %v3397_v36 = vpop.xlane.xlu0 %3396  ;;  %5333 = vmatpush3.msra.mxu0 %v3530_v53  ;;  %v3737_v53 = vld [vmem:[#allocation19 + $0x3c0] sm:$0xff] }
0x1271   :  { %5288 = vmatmul.mubr.msk.f32.vlgmr.msra.gmra.mxu1 %vm882_vm7, %v3206_v41  ;;  %v3400_v35 = vsub.f32 %v3386_v14, %v3397_v36  ;;  %5334 = vmatprep.subr.mxu0 %v6080_v0  ;;  %v3519_v14 = vld [vmem:[#allocation13 + $0x88] sm:$0xff] }
0x1272   :  { %v5620_v57 = vpop.eup %5619  ;;  %5625 = vpow2.f32 %v3403_v32  ;;  %5312 = vmatpush3.msra.mxu1 %v3424_v26  ;;  %5290 = vmatprep.mubr.msk.f32.mxu1 %vm6082_vm0, %v6080_v0 }
0x1273   :  { %5313 = vmatprep.subr.mxu1 %v6080_v0  ;;  %v3208_v27 = vmul.f32 %v5620_v57, %v5606_v59  ;;  %v3405_v40 = vmul.f32 1.442695, %v3400_v35  ;;  %v3528_v59 = vld [vmem:[#allocation13 + $0xd0] sm:$0xff]  ;;  %5335 = vmatpush3.msra.mxu0 %v3529_v56 }
0x1274   :  { %5314 = vmatpush3.msra.mxu1 %v3423_v38  ;;  %5336 = vmatprep.subr.mxu0 %v6080_v0  ;;  %v3739_v56 = vld [vmem:[#allocation19 + $0x3d0] sm:$0xff] }
0x1275   :  { %5315 = vmatprep.subr.mxu1 %v6080_v0  ;;  %5291 = vmatmul.mubr.msk.f32.gmra.mxu1 %vm882_vm7, %v3208_v27  ;;  %5627 = vpow2.f32 %v3405_v40 }
0x1276   :  { %v5622_v51 = vpop.eup %5621  ;;  %5316 = vmatpush3.msra.mxu1 %v3422_v25  ;;  %5293 = vmatprep.mubr.msk.f32.mxu1 %vm6082_vm0, %v6080_v0 }
0x1277   :  { %v3210_v5 = vmul.f32 %v5622_v51, %v7021_v2  ;;  %v3527_v2 = vld [vmem:[#allocation13 + $0xc8] sm:$0xff]  ;;  %5337 = vmatpush3.msra.mxu0 %v3528_v59  ;;  %v3736_v59 = vld [vmem:[#allocation19 + $0x3b8] sm:$0xff] }
0x1278   :  { %5338 = vmatprep.subr.mxu0 %v6080_v0 }
0x1279   :  { %5294 = vmatmul.mubr.msk.f32.gmra.mxu1 %vm882_vm7, %v3210_v5  ;;  %5339 = vmatpush3.msra.mxu0 %v3527_v2  ;;  %v3730_v2 = vld [vmem:[#allocation19 + $0x388] sm:$0xff] }
0x127a   :  { %v5624_v42 = vpop.eup %5623  ;;  %5317 = vmatprep.mubr.msk.f32.mxu1 %vm6082_vm0, %v6080_v0  ;;  %5340 = vmatprep.subr.mxu0 %v6080_v0 }
0x127b   :  { %v3417_v1 = vmul.f32 %v5624_v42, %v7028_v12  ;;  %5341 = vmatpush3.msra.mxu0 %v3526_v54  ;;  %v3523_v12 = vld [vmem:[#allocation13 + $0xa8] sm:$0xff]  ;;  %v4574_v42 = vld [vmem:[#allocation15 + $0x1] ss:$0 sm:$0xff] }
0x127c   :  { %5342 = vmatprep.subr.mxu0 %v6080_v0  ;;  %v3729_v54 = vld [vmem:[#allocation19 + $0x380] sm:$0xff] }
0x127d   :  { %5318 = vmatmul.mubr.msk.f32.vlgmr.msra.gmra.mxu1 %vm882_vm7, %v3417_v1  ;;  %5343 = vmatpush3.msra.mxu0 %v3525_v48 }
0x127e   :  { %5320 = vmatprep.mubr.msk.f32.mxu1 %vm6082_vm0, %v6080_v0  ;;  %5344 = vmatprep.subr.mxu0 %v6080_v0 }
0x127f   :  { %v7074_v6 = vpop.eup %5625  ;;  %5345 = vmatpush3.msra.mxu0 %v3524_v3 }
0x1280   :  { %v3410_v47 = vsel %vm882_vm7, %v7074_v6, 0.0  ;;  %5346 = vmatprep.subr.mxu0 %v6080_v0 }
0x1281   :  { %3411 = vadd.xlane.f32.xlu1 %v3410_v47  ;;  %5347 = vmatpush3.msra.mxu0 %v3523_v12 }
0x1282   :  { %v7078_v11 = vpop.eup %5627  ;;  %5348 = vmatprep.subr.mxu0 %v6080_v0 }
0x1283   :  { %v3413_v44 = vsel %vm882_vm7, %v7078_v11, 0.0  ;;  %5349 = vmatpush3.msra.mxu0 %v3522_v13 }
0x1284   :  { %3414 = vadd.xlane.f32.xlu0 %v3413_v44  ;;  %5350 = vmatprep.subr.mxu0 %v6080_v0  ;;  %v3742_v44 = vld [vmem:[#allocation19 + $0x3e8] sm:$0xff] }
0x1285   :  { %5351 = vmatpush3.msra.mxu0 %v3521_v29  ;;  %3768 = vmatprep.subr.mxu1 %v3742_v44  ;;  %v3700_v44 = vld [vmem:[#allocation19 + $0x298] sm:$0xff] }
0x1286   :  { %5352 = vmatprep.subr.mxu0 %v6080_v0  ;;  %3769 = vmatpush1.msra.mxu1 %v3741_v15  ;;  %v3699_v15 = vld [vmem:[#allocation19 + $0x290] sm:$0xff] }
0x1287   :  { %5353 = vmatpush3.msra.mxu0 %v3520_v19  ;;  %3770 = vmatprep.subr.mxu1 %v3738_v21  ;;  %v3696_v21 = vld [vmem:[#allocation19 + $0x278] sm:$0xff] }
0x1288   :  { %5354 = vmatprep.subr.mxu0 %v6080_v0  ;;  %3771 = vmatpush1.msra.mxu1 %v3737_v53  ;;  %v3695_v53 = vld [vmem:[#allocation19 + $0x270] sm:$0xff] }
0x1289   :  { %5355 = vmatpush3.msra.mxu0 %v3519_v14 }
0x128a   :  { %5356 = vmatprep.subr.mxu0 %v6080_v0 }
0x128b   :  { %5357 = vmatpush3.msra.mxu0 %v3518_v23 }
0x128c   :  { %3851 = vmatprep.subr.mxu0 %v3744_v31  ;;  %v3697_v31 = vld [vmem:[#allocation19 + $0x280] sm:$0xff] }
0x12a1   :  { %v7082_v24 = vpop.f32.mrf.mxu1 }
0x12a2   :  { %v3082_v26 = vadd.f32 %v7082_v24, %v6996_v20  ;;  %v3743_v24 = vld [vmem:[#allocation19 + $0x3f0] sm:$0xff] }
0x12a3   :  { %v5259_v52 = vpop.f32.mrf.mxu1 }
0x12a4   :  { %v3740_v52 = vld [vmem:[#allocation19 + $0x3d8] sm:$0xff] }
0x12a5   :  { %v3086_v50 = vpop.f32.mrf.mxu1 }
0x12a6   :  { %v3087_v30 = vadd.f32 %v3086_v50, %v6999_v49  ;;  %v3734_v50 = vld [vmem:[#allocation19 + $0x3a8] sm:$0xff] }
0x12a7   :  { %v5262_v63 = vpop.f32.mrf.mxu1  ;;  %3772 = vmatprep.subr.mxu1 %v3734_v50  ;;  %v3692_v50 = vld [vmem:[#allocation19 + $0x258] sm:$0xff] }
0x12a8   :  { %v3735_v63 = vld [vmem:[#allocation19 + $0x3b0] sm:$0xff] }
0x12a9   :  { %v3091_v34 = vpop.f32.mrf.mxu1 }
0x12aa   :  { %v3092_v41 = vadd.f32 %v3091_v34, %v7003_v46  ;;  %v3732_v34 = vld [vmem:[#allocation19 + $0x398] sm:$0xff] }
0x12ab   :  { %v5265_v16 = vpop.f32.mrf.mxu1 }
0x12ac   :  { %v3731_v16 = vld [vmem:[#allocation19 + $0x390] sm:$0xff] }
0x130a   :  { %v3412_v9 = vpop.xlane.xlu1 %3411 }
0x130b   :  { %5629 = vrcp.f32 %v3412_v9 }
0x130d   :  { %v3415_v43 = vpop.xlane.xlu0 %3414 }
0x130e   :  { %5631 = vrcp.f32 %v3415_v43 }
0x1318   :  { %v5630_v17 = vpop.eup %5629 }
0x1319   :  { %v3419_v45 = vmul.f32 %v5630_v17, %v7074_v6 }
0x131b   :  { %5321 = vmatmul.mubr.msk.f32.gmra.mxu1 %vm882_vm7, %v3419_v45  ;;  %v5632_v22 = vpop.eup %5631 }
0x131c   :  { %5323 = vmatprep.mubr.msk.f32.mxu1 %vm6082_vm0, %v6080_v0  ;;  %v3421_v4 = vmul.f32 %v5632_v22, %v7078_v11  ;;  %v3726_v22 = vld [vmem:[#allocation19 + $0x368] sm:$0xff] }
0x131f   :  { %5324 = vmatmul.mubr.msk.f32.gmra.mxu1 %vm882_vm7, %v3421_v4  ;;  %v3728_v4 = vld [vmem:[#allocation19 + $0x378] sm:$0xff] }
0x1320   :  { %3832 = vmatprep.mubr.f32.mxu1 %v6080_v0 }
0x1331   :  { %v3289_v55 = vpop.f32.mrf.mxu1 }
0x1332   :  { %v3303_v35 = vadd.f32 %v3289_v55, %v3082_v26  ;;  %v3725_v55 = vld [vmem:[#allocation19 + $0x360] sm:$0xff]  ;;  %v3714_v26 = vld [vmem:[#allocation19 + $0x308] sm:$0xff] }
0x1333   :  { %v5289_v7 = vpop.f32.mrf.mxu1 }
0x1334   :  { %v3727_v7 = vld [vmem:[#allocation19 + $0x370] sm:$0xff] }
0x1335   :  { %v3294_v61 = vpop.f32.mrf.mxu1 }
0x1336   :  { %v3304_v60 = vadd.f32 %v3294_v61, %v3087_v30  ;;  %v3722_v30 = vld [vmem:[#allocation19 + $0x348] sm:$0xff]  ;;  %v3721_v61 = vld [vmem:[#allocation19 + $0x340] sm:$0xff] }
0x1337   :  { %v5292_v33 = vpop.f32.mrf.mxu1 }
0x1338   :  { %v3718_v33 = vld [vmem:[#allocation19 + $0x328] sm:$0xff] }
0x1339   :  { %v3299_v32 = vpop.f32.mrf.mxu1 }
0x133a   :  { %v3305_v36 = vadd.f32 %v3299_v32, %v3092_v41  ;;  %v3717_v41 = vld [vmem:[#allocation19 + $0x320] sm:$0xff]  ;;  %v3719_v32 = vld [vmem:[#allocation19 + $0x330] sm:$0xff] }
0x133b   :  { %v5295_v57 = vpop.f32.mrf.mxu1 }
0x133c   :  { %v3713_v57 = vld [vmem:[#allocation19 + $0x300] sm:$0xff] }
0x133d   :  { %v3500_v38 = vpop.f32.mrf.mxu1 }
0x133e   :  { %v3514_v27 = vadd.f32 %v3500_v38, %v3303_v35  ;;  %v3715_v35 = vld [vmem:[#allocation19 + $0x310] sm:$0xff]  ;;  %v3710_v38 = vld [vmem:[#allocation19 + $0x2e8] sm:$0xff] }
0x133f   :  { %v5319_v40 = vpop.f32.mrf.mxu1 }
0x1340   :  { %5359 = vmatmul.mubr.f32.vlgmr.msra.gmra.mxu0 %v3514_v27  ;;  %v3712_v27 = vld [vmem:[#allocation19 + $0x2f8] sm:$0xff]  ;;  %v3709_v40 = vld [vmem:[#allocation19 + $0x2e0] sm:$0xff] }
0x1341   :  { %5361 = vmatprep.mubr.msk.f32.mxu0 %vm6082_vm0, %v6080_v0  ;;  %3852 = vmatpush1.msra.mxu0 %v3743_v24  ;;  %v3694_v24 = vld [vmem:[#allocation19 + $0x268] sm:$0xff] }
0x1342   :  { %3853 = vmatprep.subr.mxu0 %v3740_v52  ;;  %v3693_v52 = vld [vmem:[#allocation19 + $0x260] sm:$0xff] }
0x1343   :  { %3854 = vmatpush1.msra.mxu0 %v3739_v56  ;;  %v3690_v56 = vld [vmem:[#allocation19 + $0x248] sm:$0xff] }
0x1344   :  { %3855 = vmatprep.subr.mxu0 %v3736_v59  ;;  %v3689_v59 = vld [vmem:[#allocation19 + $0x240] sm:$0xff] }
0x1345   :  { %3856 = vmatpush1.msra.mxu0 %v3735_v63  ;;  %v3686_v63 = vld [vmem:[#allocation19 + $0x228] sm:$0xff] }
0x1346   :  { %3857 = vmatprep.subr.mxu0 %v3732_v34  ;;  %v3685_v34 = vld [vmem:[#allocation19 + $0x220] sm:$0xff] }
0x1347   :  { %3858 = vmatpush1.msra.mxu0 %v3731_v16  ;;  %v3682_v16 = vld [vmem:[#allocation19 + $0x208] sm:$0xff] }
0x1348   :  { %3859 = vmatprep.subr.mxu0 %v3728_v4 }
0x1349   :  { %3860 = vmatpush1.msra.mxu0 %v3727_v7 }
0x13db   :  { %v3505_v49 = vpop.f32.mrf.mxu1 }
0x13dc   :  { %v3515_v25 = vadd.f32 %v3505_v49, %v3304_v60  ;;  %v3723_v60 = vld [vmem:[#allocation19 + $0x350] sm:$0xff] }
0x13dd   :  { %v5322_v51 = vpop.f32.mrf.mxu1  ;;  %v3711_v49 = vld [vmem:[#allocation19 + $0x2f0] sm:$0xff] }
0x13de   :  { %5362 = vmatmul.mubr.f32.gmra.mxu0 %v3515_v25  ;;  %v3706_v25 = vld [vmem:[#allocation19 + $0x2c8] sm:$0xff]  ;;  %v3708_v51 = vld [vmem:[#allocation19 + $0x2d8] sm:$0xff] }
0x13df   :  { %v3510_v5 = vpop.f32.mrf.mxu1  ;;  %5364 = vmatprep.mubr.msk.f32.mxu0 %vm6082_vm0, %v6080_v0 }
0x13e0   :  { %v3516_v46 = vadd.f32 %v3510_v5, %v3305_v36  ;;  %v3716_v36 = vld [vmem:[#allocation19 + $0x318] sm:$0xff]  ;;  %v3705_v5 = vld [vmem:[#allocation19 + $0x2c0] sm:$0xff] }
0x13e1   :  { %v5325_v20 = vpop.f32.mrf.mxu1 }
0x13e2   :  { %5365 = vmatmul.mubr.f32.gmra.mxu0 %v3516_v46  ;;  %v3707_v46 = vld [vmem:[#allocation19 + $0x2d0] sm:$0xff]  ;;  %v3702_v20 = vld [vmem:[#allocation19 + $0x2a8] sm:$0xff] }
0x13e3   :  { %3915 = vmatprep.mubr.f32.mxu0 %v6080_v0 }
0x1400   :  { %v3608_v1 = vpop.f32.mrf.mxu0 }
0x1401   :  { %v3609_v6 = vadd.f32 %v4574_v42, %v3608_v1  ;;  %v3701_v1 = vld [vmem:[#allocation19 + $0x2a0] sm:$0xff] }
0x1402   :  { %v5360_v47 = vpop.f32.mrf.mxu0 }
0x1403   :  { %v7116_v11 = vadd.f32 %v3609_v6, %v6786_v62  ;;  %v3733_v62 = vld [vmem:[#allocation19 + $0x3a0] sm:$0xff]  ;;  %v3703_v6 = vld [vmem:[#allocation19 + $0x2b0] sm:$0xff]  ;;  %v3698_v47 = vld [vmem:[#allocation19 + $0x288] sm:$0xff] }
0x1404   :  { %3773 = vmatpush1.msra.mxu1 %v3733_v62  ;;  %v3691_v62 = vld [vmem:[#allocation19 + $0x250] sm:$0xff] }
0x1405   :  { %3629 = vadd.xlane.f32.xlu1 %v7116_v11  ;;  %3774 = vmatprep.subr.mxu1 %v3730_v2  ;;  %v3688_v2 = vld [vmem:[#allocation19 + $0x238] sm:$0xff] }
0x1406   :  { %3775 = vmatpush1.msra.mxu1 %v3729_v54  ;;  %v3687_v54 = vld [vmem:[#allocation19 + $0x230] sm:$0xff] }
0x1407   :  { %3776 = vmatprep.subr.mxu1 %v3726_v22 }
0x1408   :  { %3777 = vmatpush1.msra.mxu1 %v3725_v55  ;;  %v7135_v55 = vld [vmem:[#allocation16 + $0x1] ss:$0 sm:$0xff] }
0x1409   :  { %3778 = vmatprep.subr.mxu1 %v3722_v30 }
0x140a   :  { %3779 = vmatpush1.msra.mxu1 %v3721_v61  ;;  %v7140_v61 = vld [vmem:[#allocation18 + $0x1] ss:$0 sm:$0xff] }
0x140b   :  { %3780 = vmatprep.subr.mxu1 %v3718_v33 }
0x140c   :  { %3781 = vmatpush1.msra.mxu1 %v3717_v41  ;;  %v4106_v41 = vld [vmem:[#allocation21 + $0x3f8] sm:$0xff] }
0x140d   :  { %3782 = vmatprep.subr.mxu1 %v3714_v26  ;;  %v4073_v26 = vld [vmem:[#allocation21 + $0x2f0] sm:$0xff] }
0x140e   :  { %3783 = vmatpush1.msra.mxu1 %v3713_v57  ;;  %v4057_v57 = vld [vmem:[#allocation21 + $0x270] sm:$0xff] }
0x140f   :  { %3784 = vmatprep.subr.mxu1 %v3710_v38  ;;  %v4072_v38 = vld [vmem:[#allocation21 + $0x2e8] sm:$0xff] }
0x1410   :  { %3785 = vmatpush1.msra.mxu1 %v3709_v40  ;;  %v4056_v40 = vld [vmem:[#allocation21 + $0x268] sm:$0xff] }
0x1411   :  { %3786 = vmatprep.subr.mxu1 %v3706_v25  ;;  %v4071_v25 = vld [vmem:[#allocation21 + $0x2e0] sm:$0xff] }
0x1412   :  { %3787 = vmatpush1.msra.mxu1 %v3705_v5  ;;  %v4055_v5 = vld [vmem:[#allocation21 + $0x260] sm:$0xff] }
0x1413   :  { %3788 = vmatprep.subr.mxu1 %v3702_v20  ;;  %v4070_v20 = vld [vmem:[#allocation21 + $0x2d8] sm:$0xff] }
0x1414   :  { %3789 = vmatpush1.msra.mxu1 %v3701_v1  ;;  %v4054_v1 = vld [vmem:[#allocation21 + $0x258] sm:$0xff] }
0x1415   :  { %3790 = vmatprep.subr.mxu1 %v3698_v47  ;;  %v4069_v47 = vld [vmem:[#allocation21 + $0x2d0] sm:$0xff] }
0x1416   :  { %3791 = vmatpush1.msra.mxu1 %v3697_v31  ;;  %v4053_v31 = vld [vmem:[#allocation21 + $0x250] sm:$0xff] }
0x1417   :  { %3792 = vmatprep.subr.mxu1 %v3694_v24  ;;  %v4068_v24 = vld [vmem:[#allocation21 + $0x2c8] sm:$0xff] }
0x1418   :  { %3793 = vmatpush1.msra.mxu1 %v3693_v52  ;;  %v4052_v52 = vld [vmem:[#allocation21 + $0x248] sm:$0xff] }
0x1419   :  { %3794 = vmatprep.subr.mxu1 %v3690_v56  ;;  %v4067_v56 = vld [vmem:[#allocation21 + $0x2c0] sm:$0xff] }
0x141a   :  { %3795 = vmatpush1.msra.mxu1 %v3689_v59  ;;  %v4051_v59 = vld [vmem:[#allocation21 + $0x240] sm:$0xff] }
0x141b   :  { %3796 = vmatprep.subr.mxu1 %v3686_v63  ;;  %v4066_v63 = vld [vmem:[#allocation21 + $0x2b8] sm:$0xff] }
0x141c   :  { %3797 = vmatpush1.msra.mxu1 %v3685_v34  ;;  %v4050_v34 = vld [vmem:[#allocation21 + $0x238] sm:$0xff] }
0x141d   :  { %3798 = vmatprep.subr.mxu1 %v3682_v16  ;;  %v4065_v16 = vld [vmem:[#allocation21 + $0x2b0] sm:$0xff] }
0x148e   :  { %v3630_v48 = vpop.xlane.xlu1 %3629 }
0x148f   :  { %v3635_v3 = vmul.f32 0.0078125, %v3630_v48  ;;  %v3684_v48 = vld [vmem:[#allocation19 + $0x218] sm:$0xff] }
0x1491   :  { %v7120_v12 = vsub.f32 %v7116_v11, %v3635_v3  ;;  %v3681_v3 = vld [vmem:[#allocation19 + $0x200] sm:$0xff] }
0x1492   :  { %3799 = vmatpush1.msra.mxu1 %v3681_v3  ;;  %v4049_v3 = vld [vmem:[#allocation21 + $0x230] sm:$0xff] }
0x1493   :  { %v3641_v13 = vmul.f32 %v7120_v12, %v7120_v12 }
0x1495   :  { %3644 = vadd.xlane.f32.xlu0 %v3641_v13  ;;  %v3683_v13 = vld [vmem:[#allocation19 + $0x210] sm:$0xff] }
0x149e   :  { %v3613_v29 = vpop.f32.mrf.mxu0 }
0x149f   :  { %v3614_v19 = vadd.f32 %v4574_v42, %v3613_v29 }
0x14a0   :  { %v5363_v14 = vpop.f32.mrf.mxu0 }
0x14a1   :  { %v7125_v23 = vadd.f32 %v3614_v19, %v6790_v39  ;;  %v3724_v39 = vld [vmem:[#allocation19 + $0x358] sm:$0xff] }
0x14a2   :  { %v3618_v9 = vpop.f32.mrf.mxu0  ;;  %3861 = vmatprep.subr.mxu0 %v3724_v39 }
0x14a3   :  { %v3619_v43 = vadd.f32 %v4574_v42, %v3618_v9  ;;  %3631 = vadd.xlane.f32.xlu1 %v7125_v23  ;;  %3862 = vmatpush1.msra.mxu0 %v3723_v60  ;;  %v3704_v42 = vld [vmem:[#allocation19 + $0x2b8] sm:$0xff] }
0x14a4   :  { %v5366_v17 = vpop.f32.mrf.mxu0 }
0x14a5   :  { %v7129_v45 = vadd.f32 %v3619_v43, %v6794_v58  ;;  %v3720_v58 = vld [vmem:[#allocation19 + $0x338] sm:$0xff] }
0x14a6   :  { %3863 = vmatprep.subr.mxu0 %v3720_v58 }
0x14a7   :  { %3633 = vadd.xlane.f32.xlu0 %v7129_v45  ;;  %3864 = vmatpush1.msra.mxu0 %v3719_v32  ;;  %v4090_v32 = vld [vmem:[#allocation21 + $0x378] sm:$0xff] }
0x14a8   :  { %3865 = vmatprep.subr.mxu0 %v3716_v36  ;;  %v4105_v36 = vld [vmem:[#allocation21 + $0x3f0] sm:$0xff] }
0x14a9   :  { %3866 = vmatpush1.msra.mxu0 %v3715_v35  ;;  %v4089_v35 = vld [vmem:[#allocation21 + $0x370] sm:$0xff] }
0x14aa   :  { %3867 = vmatprep.subr.mxu0 %v3712_v27  ;;  %v4104_v27 = vld [vmem:[#allocation21 + $0x3e8] sm:$0xff] }
0x14ab   :  { %3868 = vmatpush1.msra.mxu0 %v3711_v49  ;;  %v4088_v49 = vld [vmem:[#allocation21 + $0x368] sm:$0xff] }
0x14ac   :  { %3869 = vmatprep.subr.mxu0 %v3708_v51  ;;  %v4103_v51 = vld [vmem:[#allocation21 + $0x3e0] sm:$0xff] }
0x14ad   :  { %3870 = vmatpush1.msra.mxu0 %v3707_v46  ;;  %v4087_v46 = vld [vmem:[#allocation21 + $0x360] sm:$0xff] }
0x14ae   :  { %3871 = vmatprep.subr.mxu0 %v3704_v42  ;;  %v4102_v42 = vld [vmem:[#allocation21 + $0x3d8] sm:$0xff] }
0x14af   :  { %3872 = vmatpush1.msra.mxu0 %v3703_v6  ;;  %v4086_v6 = vld [vmem:[#allocation21 + $0x358] sm:$0xff] }
0x14b0   :  { %3873 = vmatprep.subr.mxu0 %v3700_v44  ;;  %v4101_v44 = vld [vmem:[#allocation21 + $0x3d0] sm:$0xff] }
0x14b1   :  { %3874 = vmatpush1.msra.mxu0 %v3699_v15  ;;  %v4085_v15 = vld [vmem:[#allocation21 + $0x350] sm:$0xff] }
0x14b2   :  { %3875 = vmatprep.subr.mxu0 %v3696_v21  ;;  %v4100_v21 = vld [vmem:[#allocation21 + $0x3c8] sm:$0xff] }
0x14b3   :  { %3876 = vmatpush1.msra.mxu0 %v3695_v53  ;;  %v4084_v53 = vld [vmem:[#allocation21 + $0x348] sm:$0xff] }
0x14b4   :  { %3877 = vmatprep.subr.mxu0 %v3692_v50  ;;  %v4099_v50 = vld [vmem:[#allocation21 + $0x3c0] sm:$0xff] }
0x14b5   :  { %3878 = vmatpush1.msra.mxu0 %v3691_v62  ;;  %v4083_v62 = vld [vmem:[#allocation21 + $0x340] sm:$0xff] }
0x14b6   :  { %3879 = vmatprep.subr.mxu0 %v3688_v2  ;;  %v4098_v2 = vld [vmem:[#allocation21 + $0x3b8] sm:$0xff] }
0x14b7   :  { %3880 = vmatpush1.msra.mxu0 %v3687_v54  ;;  %v4082_v54 = vld [vmem:[#allocation21 + $0x338] sm:$0xff] }
0x14b8   :  { %3881 = vmatprep.subr.mxu0 %v3684_v48  ;;  %v4097_v48 = vld [vmem:[#allocation21 + $0x3b0] sm:$0xff] }
0x14b9   :  { %3882 = vmatpush1.msra.mxu0 %v3683_v13  ;;  %v4081_v13 = vld [vmem:[#allocation21 + $0x330] sm:$0xff] }
0x14ba   :  { %4881 = vmatprep.subr.mxu0 %v4106_v41  ;;  %v4045_v41 = vld [vmem:[#allocation21 + $0x210] sm:$0xff] }
0x151e   :  { %v3645_v29 = vpop.xlane.xlu0 %3644 }
0x151f   :  { %v3650_v19 = vmul.f32 0.0078125, %v3645_v29  ;;  %v4064_v29 = vld [vmem:[#allocation21 + $0x2a8] sm:$0xff] }
0x1521   :  { %v3653_v14 = vadd.f32 1e-05, %v3650_v19  ;;  %v4096_v19 = vld [vmem:[#allocation21 + $0x3a8] sm:$0xff] }
0x1523   :  { %5633 = vrsqrt.f32 %v3653_v14  ;;  %v4048_v14 = vld [vmem:[#allocation21 + $0x228] sm:$0xff] }
0x152c   :  { %v3632_v9 = vpop.xlane.xlu1 %3631 }
0x152d   :  { %v3636_v43 = vmul.f32 0.0078125, %v3632_v9  ;;  %v4080_v9 = vld [vmem:[#allocation21 + $0x328] sm:$0xff] }
0x152f   :  { %v7133_v17 = vsub.f32 %v7125_v23, %v3636_v43  ;;  %v4063_v43 = vld [vmem:[#allocation21 + $0x2a0] sm:$0xff] }
0x1530   :  { %v5634_v22 = vpop.eup %5633  ;;  %v3634_v4 = vpop.xlane.xlu0 %3633 }
0x1531   :  { %v3659_v7 = vmul.f32 %v5634_v22, %v7120_v12  ;;  %v3637_v30 = vmul.f32 0.0078125, %v3634_v4  ;;  %v3642_v39 = vmul.f32 %v7133_v17, %v7133_v17  ;;  %v4074_v12 = vld [vmem:[#allocation21 + $0x2f8] sm:$0xff]  ;;  %v4095_v22 = vld [vmem:[#allocation21 + $0x3a0] sm:$0xff] }
0x1532   :  { %4840 = vmatprep.subr.mxu1 %v4074_v12  ;;  %v4047_v4 = vld [vmem:[#allocation21 + $0x220] sm:$0xff]  ;;  %v4093_v12 = vld [vmem:[#allocation21 + $0x390] sm:$0xff] }
0x1533   :  { %v7143_v60 = vsub.f32 %v7129_v45, %v3637_v30  ;;  %3646 = vadd.xlane.f32.xlu1 %v3642_v39  ;;  %v3668_v33 = vmul.f32 %v7135_v55, %v3659_v7  ;;  %v4058_v45 = vld [vmem:[#allocation21 + $0x278] sm:$0xff]  ;;  %v4079_v7 = vld [vmem:[#allocation21 + $0x320] sm:$0xff] }
0x1534   :  { %v4062_v30 = vld [vmem:[#allocation21 + $0x298] sm:$0xff] }
0x1535   :  { %v3643_v23 = vmul.f32 %v7143_v60, %v7143_v60  ;;  %v3677_v58 = vadd.f32 %v7140_v61, %v3668_v33  ;;  %v4094_v39 = vld [vmem:[#allocation21 + $0x398] sm:$0xff] }
0x1536   :  { %v4046_v33 = vld [vmem:[#allocation21 + $0x218] sm:$0xff] }
0x1537   :  { %3648 = vadd.xlane.f32.xlu0 %v3643_v23  ;;  %3833 = vmatmul.mubr.f32.vlgmr.msra.gmra.mxu1 %v3677_v58  ;;  %v4078_v23 = vld [vmem:[#allocation21 + $0x318] sm:$0xff] }
0x1538   :  { %3916 = vmatmul.mubr.f32.vlgmr.msra.gmra.mxu0 %v3677_v58  ;;  %3838 = vmatprep.mubr.f32.mxu1 %v6080_v0  ;;  %v4061_v58 = vld [vmem:[#allocation21 + $0x290] sm:$0xff] }
0x1539   :  { %3921 = vmatprep.mubr.f32.mxu0 %v6080_v0  ;;  %4841 = vmatpush3.msra.mxu1 %v4058_v45  ;;  %v4077_v45 = vld [vmem:[#allocation21 + $0x310] sm:$0xff] }
0x153a   :  { %4882 = vmatpush3.msra.mxu0 %v4090_v32  ;;  %4842 = vmatprep.subr.mxu1 %v4073_v26  ;;  %v4060_v32 = vld [vmem:[#allocation21 + $0x288] sm:$0xff] }
0x153b   :  { %4883 = vmatprep.subr.mxu0 %v4105_v36  ;;  %4843 = vmatpush3.msra.mxu1 %v4057_v57  ;;  %v4092_v26 = vld [vmem:[#allocation21 + $0x388] sm:$0xff] }
0x153c   :  { %4884 = vmatpush3.msra.mxu0 %v4089_v35  ;;  %4844 = vmatprep.subr.mxu1 %v4072_v38  ;;  %v4044_v36 = vld [vmem:[#allocation21 + $0x208] sm:$0xff]  ;;  %v4059_v35 = vld [vmem:[#allocation21 + $0x280] sm:$0xff] }
0x153d   :  { %4885 = vmatprep.subr.mxu0 %v4104_v27  ;;  %4845 = vmatpush3.msra.mxu1 %v4056_v40  ;;  %v4076_v57 = vld [vmem:[#allocation21 + $0x308] sm:$0xff]  ;;  %v4091_v38 = vld [vmem:[#allocation21 + $0x380] sm:$0xff] }
0x153e   :  { %4886 = vmatpush3.msra.mxu0 %v4088_v49  ;;  %4846 = vmatprep.subr.mxu1 %v4071_v25  ;;  %v4043_v27 = vld [vmem:[#allocation21 + $0x200] sm:$0xff] }
0x153f   :  { %4887 = vmatprep.subr.mxu0 %v4103_v51  ;;  %4847 = vmatpush3.msra.mxu1 %v4055_v5  ;;  %v4075_v40 = vld [vmem:[#allocation21 + $0x300] sm:$0xff] }
0x1540   :  { %4888 = vmatpush3.msra.mxu0 %v4087_v46  ;;  %4848 = vmatprep.subr.mxu1 %v4070_v20 }
0x1541   :  { %4889 = vmatprep.subr.mxu0 %v4102_v42  ;;  %4849 = vmatpush3.msra.mxu1 %v4054_v1 }
0x1542   :  { %4890 = vmatpush3.msra.mxu0 %v4086_v6  ;;  %4850 = vmatprep.subr.mxu1 %v4069_v47 }
0x1543   :  { %4891 = vmatprep.subr.mxu0 %v4101_v44  ;;  %4851 = vmatpush3.msra.mxu1 %v4053_v31 }
0x1544   :  { %4892 = vmatpush3.msra.mxu0 %v4085_v15  ;;  %4852 = vmatprep.subr.mxu1 %v4068_v24 }
0x1545   :  { %4893 = vmatprep.subr.mxu0 %v4100_v21  ;;  %4853 = vmatpush3.msra.mxu1 %v4052_v52 }
0x1546   :  { %4894 = vmatpush3.msra.mxu0 %v4084_v53  ;;  %4854 = vmatprep.subr.mxu1 %v4067_v56 }
0x1547   :  { %4895 = vmatprep.subr.mxu0 %v4099_v50  ;;  %4855 = vmatpush3.msra.mxu1 %v4051_v59 }
0x1548   :  { %4896 = vmatpush3.msra.mxu0 %v4083_v62  ;;  %4856 = vmatprep.subr.mxu1 %v4066_v63 }
0x1549   :  { %4897 = vmatprep.subr.mxu0 %v4098_v2  ;;  %4857 = vmatpush3.msra.mxu1 %v4050_v34 }
0x154a   :  { %4898 = vmatpush3.msra.mxu0 %v4082_v54  ;;  %4858 = vmatprep.subr.mxu1 %v4065_v16 }
0x154b   :  { %4899 = vmatprep.subr.mxu0 %v4097_v48  ;;  %4859 = vmatpush3.msra.mxu1 %v4049_v3 }
0x154c   :  { %4900 = vmatpush3.msra.mxu0 %v4081_v13  ;;  %4860 = vmatprep.subr.mxu1 %v4064_v29 }
0x154d   :  { %4901 = vmatprep.subr.mxu0 %v4096_v19  ;;  %4861 = vmatpush3.msra.mxu1 %v4048_v14 }
0x154e   :  { %4902 = vmatpush3.msra.mxu0 %v4080_v9  ;;  %4862 = vmatprep.subr.mxu1 %v4063_v43 }
0x154f   :  { %4903 = vmatprep.subr.mxu0 %v4095_v22  ;;  %4863 = vmatpush3.msra.mxu1 %v4047_v4 }
0x1550   :  { %4904 = vmatpush3.msra.mxu0 %v4079_v7  ;;  %4864 = vmatprep.subr.mxu1 %v4062_v30 }
0x1551   :  { %4905 = vmatprep.subr.mxu0 %v4094_v39  ;;  %4865 = vmatpush3.msra.mxu1 %v4046_v33 }
0x1552   :  { %4906 = vmatpush3.msra.mxu0 %v4078_v23  ;;  %4866 = vmatprep.subr.mxu1 %v4061_v58 }
0x1553   :  { %4907 = vmatprep.subr.mxu0 %v4093_v12  ;;  %4867 = vmatpush3.msra.mxu1 %v4045_v41 }
0x1554   :  { %4908 = vmatpush3.msra.mxu0 %v4077_v45  ;;  %4868 = vmatprep.subr.mxu1 %v4060_v32 }
0x1555   :  { %4909 = vmatprep.subr.mxu0 %v4092_v26  ;;  %4869 = vmatpush3.msra.mxu1 %v4044_v36 }
0x1556   :  { %4910 = vmatpush3.msra.mxu0 %v4076_v57  ;;  %4870 = vmatprep.subr.mxu1 %v4059_v35 }
0x1557   :  { %4911 = vmatprep.subr.mxu0 %v4091_v38  ;;  %4871 = vmatpush3.msra.mxu1 %v4043_v27 }
0x1558   :  { %4912 = vmatpush3.msra.mxu0 %v4075_v40  ;;  %5367 = vmatprep.subr.mxu1 %v6080_v0 }
0x1559   :  { %5402 = vmatprep.subr.mxu0 %v6080_v0 }
0x15bc   :  { %v3647_v49 = vpop.xlane.xlu1 %3646 }
0x15bd   :  { %v3651_v25 = vmul.f32 0.0078125, %v3647_v49 }
0x15bf   :  { %v3654_v51 = vadd.f32 1e-05, %v3651_v25 }
0x15c0   :  { %v3649_v5 = vpop.xlane.xlu0 %3648 }
0x15c1   :  { %5635 = vrsqrt.f32 %v3654_v51  ;;  %v3652_v46 = vmul.f32 0.0078125, %v3649_v5 }
0x15c3   :  { %v3655_v20 = vadd.f32 1e-05, %v3652_v46 }
0x15c5   :  { %5637 = vrsqrt.f32 %v3655_v20 }
0x15ce   :  { %v5636_v42 = vpop.eup %5635 }
0x15cf   :  { %v3660_v1 = vmul.f32 %v5636_v42, %v7133_v17  ;;  %v4577_v17 = vld [vmem:[%s7324_s2 + $0x4] sm:$0xf] }
0x15d0   :  { %v7163_v21 = vrot.slane %v4577_v17, %v6296_v10  ;;  %v7166_v52 = vrot.slane %v4577_v17, %v6301_v18 }
0x15d1   :  { %v3669_v6 = vmul.f32 %v7135_v55, %v3660_v1 }
0x15d2   :  { %v5638_v47 = vpop.eup %5637 }
0x15d3   :  { %v3678_v44 = vadd.f32 %v7140_v61, %v3669_v6  ;;  %v3661_v31 = vmul.f32 %v5638_v47, %v7143_v60  ;;  %v7169_v60 = vrot.slane %v4577_v17, %v6311_v28 }
0x15d5   :  { %3839 = vmatmul.mubr.f32.gmra.mxu1 %v3678_v44  ;;  %3922 = vmatmul.mubr.f32.gmra.mxu0 %v3678_v44  ;;  %v3670_v15 = vmul.f32 %v7135_v55, %v3661_v31  ;;  %v7173_v55 = vrot.slane %v4577_v17, %v1877_v37 }
0x15d6   :  { %3844 = vmatprep.mubr.f32.mxu1 %v6080_v0  ;;  %3927 = vmatprep.mubr.f32.mxu0 %v6080_v0 }
0x15d7   :  { %v3679_v24 = vadd.f32 %v7140_v61, %v3670_v15 }
0x15d9   :  { %3845 = vmatmul.mubr.f32.gmra.mxu1 %v3679_v24  ;;  %3928 = vmatmul.mubr.f32.gmra.mxu0 %v3679_v24 }
0x15f7   :  { %v3834_v53 = vpop.f32.mrf.mxu1 }
0x15f8   :  { %v3835_v56 = vadd.f32 %v3834_v53, %v7163_v21  ;;  %v3917_v61 = vpop.f32.mrf.mxu0 }
0x15f9   :  { %v3918_v50 = vadd.f32 %v3917_v61, %v7166_v52  ;;  %v3836_v59 = vpop.f32.mrf.mxu1 }
0x15fa   :  { %v3946_v62 = vmul.f32 0.044715, %v3835_v56  ;;  %v3837_v10 = vadd.f32 %v3836_v59, %v7169_v60  ;;  %v3919_v63 = vpop.f32.mrf.mxu0  ;;  %v3934_v26 = vmul.f32 0.5, %v3835_v56 }
0x15fb   :  { %v3948_v18 = vmul.f32 0.044715, %v3918_v50  ;;  %v3920_v2 = vadd.f32 %v3919_v63, %v7173_v55  ;;  %v3936_v35 = vmul.f32 0.5, %v3918_v50 }
0x15fc   :  { %v3958_v28 = vmul.f32 %v3946_v62, %v3835_v56  ;;  %v3947_v34 = vmul.f32 0.044715, %v3837_v10  ;;  %v3935_v41 = vmul.f32 0.5, %v3837_v10 }
0x15fd   :  { %v3960_v54 = vmul.f32 %v3948_v18, %v3918_v50  ;;  %v3949_v16 = vmul.f32 0.044715, %v3920_v2  ;;  %v3937_v36 = vmul.f32 0.5, %v3920_v2 }
0x15fe   :  { %v3970_v8 = vmul.f32 %v3958_v28, %v3835_v56  ;;  %v3959_v37 = vmul.f32 %v3947_v34, %v3837_v10 }
0x15ff   :  { %v3972_v48 = vmul.f32 %v3960_v54, %v3918_v50  ;;  %v3961_v3 = vmul.f32 %v3949_v16, %v3920_v2 }
0x1600   :  { %v3982_v13 = vadd.f32 %v3970_v8, %v3835_v56  ;;  %v3971_v29 = vmul.f32 %v3959_v37, %v3837_v10 }
0x1601   :  { %v3984_v19 = vadd.f32 %v3972_v48, %v3918_v50  ;;  %v3973_v14 = vmul.f32 %v3961_v3, %v3920_v2 }
0x1602   :  { %v3994_v9 = vmul.f32 0.7978846, %v3982_v13  ;;  %v3983_v43 = vadd.f32 %v3971_v29, %v3837_v10 }
0x1603   :  { %v3996_v22 = vmul.f32 0.7978846, %v3984_v19  ;;  %v3985_v4 = vadd.f32 %v3973_v14, %v3920_v2 }
0x1604   :  { %5639 = vtanh.f32 %v3994_v9  ;;  %v3995_v7 = vmul.f32 0.7978846, %v3983_v43 }
0x1605   :  { %5641 = vtanh.f32 %v3996_v22  ;;  %v3997_v30 = vmul.f32 0.7978846, %v3985_v4 }
0x1606   :  { %5643 = vtanh.f32 %v3995_v7 }
0x1607   :  { %5645 = vtanh.f32 %v3997_v30 }
0x1611   :  { %v5640_v39 = vpop.eup %5639 }
0x1612   :  { %v5642_v33 = vpop.eup %5641  ;;  %v4018_v58 = vadd.f32 1.0, %v5640_v39 }
0x1613   :  { %v5644_v23 = vpop.eup %5643  ;;  %v4020_v32 = vadd.f32 1.0, %v5642_v33 }
0x1614   :  { %v5646_v12 = vpop.eup %5645  ;;  %v4019_v45 = vadd.f32 1.0, %v5644_v23  ;;  %v4030_v40 = vmul.f32 %v4018_v58, %v3934_v26 }
0x1615   :  { %v4021_v57 = vadd.f32 1.0, %v5646_v12  ;;  %v4032_v49 = vmul.f32 %v4020_v32, %v3936_v35 }
0x1616   :  { %v4031_v38 = vmul.f32 %v4019_v45, %v3935_v41 }
0x1617   :  { %v4033_v27 = vmul.f32 %v4021_v57, %v3937_v36 }
0x1618   :  { %4179 = vmatprep.mubr.f32.mxu1 %v4031_v38 }
0x1619   :  { %4257 = vmatprep.mubr.f32.mxu0 %v4033_v27  ;;  %4180 = vmatmul.mubr.f32.vlgmr.msra.gmra.mxu1 %v4030_v40 }
0x161a   :  { %4258 = vmatmul.mubr.f32.vlgmr.msra.gmra.mxu0 %v4032_v49 }
0x1695   :  { %v3840_v25 = vpop.f32.mrf.mxu1  ;;  %v3923_v51 = vpop.f32.mrf.mxu0 }
0x1696   :  { %v7180_v5 = vadd.f32 %v3840_v25, %v7163_v21  ;;  %v7183_v46 = vadd.f32 %v3923_v51, %v7166_v52 }
0x1697   :  { %v3842_v20 = vpop.f32.mrf.mxu1  ;;  %v3925_v42 = vpop.f32.mrf.mxu0 }
0x1698   :  { %v3950_v1 = vmul.f32 0.044715, %v7180_v5  ;;  %v3952_v6 = vmul.f32 0.044715, %v7183_v46  ;;  %v3843_v47 = vadd.f32 %v3842_v20, %v7169_v60  ;;  %v3926_v44 = vadd.f32 %v3925_v42, %v7173_v55 }
0x1699   :  { %v3846_v31 = vpop.f32.mrf.mxu1  ;;  %v3929_v15 = vpop.f32.mrf.mxu0  ;;  %v3938_v42 = vmul.f32 0.5, %v7180_v5 }
0x169a   :  { %v3962_v24 = vmul.f32 %v3950_v1, %v7180_v5  ;;  %v3964_v17 = vmul.f32 %v3952_v6, %v7183_v46  ;;  %v3951_v53 = vmul.f32 0.044715, %v3843_v47  ;;  %v3953_v56 = vmul.f32 0.044715, %v3926_v44 }
0x169b   :  { %v7192_v61 = vadd.f32 %v3846_v31, %v7163_v21  ;;  %v7195_v50 = vadd.f32 %v3929_v15, %v7166_v52  ;;  %v3848_v59 = vpop.f32.mrf.mxu1  ;;  %v3931_v62 = vpop.f32.mrf.mxu0  ;;  %v3939_v40 = vmul.f32 0.5, %v3843_v47  ;;  %v3941_v51 = vmul.f32 0.5, %v3926_v44 }
0x169c   :  { %v3963_v10 = vmul.f32 %v3951_v53, %v3843_v47  ;;  %v3965_v63 = vmul.f32 %v3953_v56, %v3926_v44  ;;  %v3849_v18 = vadd.f32 %v3848_v59, %v7169_v60  ;;  %v7199_v2 = vadd.f32 %v3931_v62, %v7173_v55 }
0x169d   :  { %v3954_v28 = vmul.f32 0.044715, %v7192_v61  ;;  %v3956_v34 = vmul.f32 0.044715, %v7195_v50  ;;  %v3974_v54 = vmul.f32 %v3962_v24, %v7180_v5  ;;  %v3976_v21 = vmul.f32 %v3964_v17, %v7183_v46 }
0x169e   :  { %v3955_v16 = vmul.f32 0.044715, %v3849_v18  ;;  %v3957_v52 = vmul.f32 0.044715, %v7199_v2  ;;  %v3975_v8 = vmul.f32 %v3963_v10, %v3843_v47  ;;  %v3977_v37 = vmul.f32 %v3965_v63, %v3926_v44 }
0x169f   :  { %v3966_v48 = vmul.f32 %v3954_v28, %v7192_v61  ;;  %v3968_v60 = vmul.f32 %v3956_v34, %v7195_v50  ;;  %v3986_v55 = vadd.f32 %v3974_v54, %v7180_v5  ;;  %v3988_v3 = vadd.f32 %v3976_v21, %v7183_v46 }
0x16a0   :  { %v3967_v13 = vmul.f32 %v3955_v16, %v3849_v18  ;;  %v3969_v29 = vmul.f32 %v3957_v52, %v7199_v2  ;;  %v3987_v19 = vadd.f32 %v3975_v8, %v3843_v47  ;;  %v3989_v14 = vadd.f32 %v3977_v37, %v3926_v44  ;;  %v4578_v52 = vld [vmem:[#allocation22 + $0x1] ss:$0 sm:$0xff] }
0x16a1   :  { %v3998_v9 = vmul.f32 0.7978846, %v3986_v55  ;;  %v4000_v43 = vmul.f32 0.7978846, %v3988_v3  ;;  %v3978_v39 = vmul.f32 %v3966_v48, %v7192_v61  ;;  %v3980_v58 = vmul.f32 %v3968_v60, %v7195_v50 }
0x16a2   :  { %v3999_v22 = vmul.f32 0.7978846, %v3987_v19  ;;  %v4001_v4 = vmul.f32 0.7978846, %v3989_v14  ;;  %v3979_v7 = vmul.f32 %v3967_v13, %v3849_v18  ;;  %v3981_v30 = vmul.f32 %v3969_v29, %v7199_v2  ;;  %v4314_v13 = vld [vmem:[%s7325_s14 + $0x78] sm:$0xff]  ;;  %v4313_v29 = vld [vmem:[%s7325_s14 + $0x70] sm:$0xff] }
0x16a3   :  { %5647 = vtanh.f32 %v3998_v9  ;;  %v3990_v12 = vadd.f32 %v3978_v39, %v7192_v61  ;;  %v3992_v32 = vadd.f32 %v3980_v58, %v7195_v50  ;;  %v3940_v6 = vmul.f32 0.5, %v7183_v46  ;;  %5368 = vmatpush3.msra.mxu1 %v4314_v13  ;;  %v4312_v19 = vld [vmem:[%s7325_s14 + $0x68] sm:$0xff]  ;;  %v4311_v14 = vld [vmem:[%s7325_s14 + $0x60] sm:$0xff] }
0x16a4   :  { %5649 = vtanh.f32 %v3999_v22  ;;  %v3991_v33 = vadd.f32 %v3979_v7, %v3849_v18  ;;  %v3993_v23 = vadd.f32 %v3981_v30, %v7199_v2  ;;  %v3943_v59 = vmul.f32 0.5, %v3849_v18  ;;  %5369 = vmatprep.subr.mxu1 %v6080_v0 }
0x16a5   :  { %5651 = vtanh.f32 %v4001_v4  ;;  %v4002_v26 = vmul.f32 0.7978846, %v3990_v12  ;;  %v4004_v36 = vmul.f32 0.7978846, %v3992_v32  ;;  %v3945_v47 = vmul.f32 0.5, %v7199_v2  ;;  %5370 = vmatpush3.msra.mxu1 %v4313_v29  ;;  %v4308_v32 = vld [vmem:[%s7325_s14 + $0x48] sm:$0xff] }
0x16a6   :  { %5653 = vtanh.f32 %v4000_v43  ;;  %v4003_v41 = vmul.f32 0.7978846, %v3991_v33  ;;  %v4005_v45 = vmul.f32 0.7978846, %v3993_v23  ;;  %v3942_v46 = vmul.f32 0.5, %v7192_v61  ;;  %5371 = vmatprep.subr.mxu1 %v6080_v0 }
0x16a7   :  { %v3944_v54 = vmul.f32 0.5, %v7195_v50  ;;  %5372 = vmatpush3.msra.mxu1 %v4312_v19 }
0x16a8   :  { %5655 = vtanh.f32 %v4003_v41  ;;  %5373 = vmatprep.subr.mxu1 %v6080_v0  ;;  %v4310_v41 = vld [vmem:[%s7325_s14 + $0x58] sm:$0xff] }
0x16a9   :  { %5657 = vtanh.f32 %v4005_v45  ;;  %5374 = vmatpush3.msra.mxu1 %v4311_v14  ;;  %v4309_v45 = vld [vmem:[%s7325_s14 + $0x50] sm:$0xff] }
0x16aa   :  { %5659 = vtanh.f32 %v4002_v26  ;;  %5375 = vmatprep.subr.mxu1 %v6080_v0  ;;  %v4307_v26 = vld [vmem:[%s7325_s14 + $0x40] sm:$0xff] }
0x16ab   :  { %5661 = vtanh.f32 %v4004_v36  ;;  %5376 = vmatpush3.msra.mxu1 %v4310_v41  ;;  %v4306_v36 = vld [vmem:[%s7325_s14 + $0x38] sm:$0xff] }
0x16ac   :  { %5377 = vmatprep.subr.mxu1 %v6080_v0 }
0x16ad   :  { %5378 = vmatpush3.msra.mxu1 %v4309_v45 }
0x16ae   :  { %5379 = vmatprep.subr.mxu1 %v6080_v0 }
0x16af   :  { %5380 = vmatpush3.msra.mxu1 %v4308_v32 }
0x16b0   :  { %v5648_v57 = vpop.eup %5647  ;;  %5381 = vmatprep.subr.mxu1 %v6080_v0 }
0x16b1   :  { %v5650_v35 = vpop.eup %5649  ;;  %v4022_v38 = vadd.f32 1.0, %v5648_v57  ;;  %5382 = vmatpush3.msra.mxu1 %v4307_v26  ;;  %v4305_v57 = vld [vmem:[%s7325_s14 + $0x30] sm:$0xff] }
0x16b2   :  { %v5652_v27 = vpop.eup %5651  ;;  %v4023_v49 = vadd.f32 1.0, %v5650_v35  ;;  %5383 = vmatprep.subr.mxu1 %v6080_v0  ;;  %v4304_v35 = vld [vmem:[%s7325_s14 + $0x28] sm:$0xff] }
0x16b3   :  { %v5654_v25 = vpop.eup %5653  ;;  %v4025_v20 = vadd.f32 1.0, %v5652_v27  ;;  %v4034_v17 = vmul.f32 %v4022_v38, %v3938_v42  ;;  %5384 = vmatpush3.msra.mxu1 %v4306_v36  ;;  %v4303_v38 = vld [vmem:[%s7325_s14 + $0x20] sm:$0xff]  ;;  %v4302_v27 = vld [vmem:[%s7325_s14 + $0x18] sm:$0xff] }
0x16b4   :  { %v4035_v1 = vmul.f32 %v4023_v49, %v3939_v40  ;;  %v4024_v31 = vadd.f32 1.0, %v5654_v25  ;;  %5385 = vmatprep.subr.mxu1 %v6080_v0  ;;  %v4301_v40 = vld [vmem:[%s7325_s14 + $0x10] sm:$0xff]  ;;  %v4408_v49 = vld [vmem:[%s6226_s9 + $0x78] sm:$0xff]  ;;  %v4299_v42 = vld [vmem:[%s7325_s14] sm:$0xff] }
0x16b5   :  { %v5656_v15 = vpop.eup %5655  ;;  %v4037_v24 = vmul.f32 %v4025_v20, %v3941_v51  ;;  %5386 = vmatpush3.msra.mxu1 %v4305_v57  ;;  %v4407_v25 = vld [vmem:[%s6226_s9 + $0x70] sm:$0xff]  ;;  %5403 = vmatpush3.msra.mxu0 %v4408_v49  ;;  %v4300_v51 = vld [vmem:[%s7325_s14 + $0x8] sm:$0xff] }
0x16b6   :  { %v5658_v53 = vpop.eup %5657  ;;  %4184 = vmatprep.mubr.f32.mxu1 %v4035_v1  ;;  %v4036_v56 = vmul.f32 %v4024_v31, %v3940_v6  ;;  %v4027_v62 = vadd.f32 1.0, %v5656_v15  ;;  %5387 = vmatprep.subr.mxu1 %v6080_v0  ;;  %v4406_v20 = vld [vmem:[%s6226_s9 + $0x68] sm:$0xff]  ;;  %v4405_v1 = vld [vmem:[%s6226_s9 + $0x60] sm:$0xff]  ;;  %v4404_v6 = vld [vmem:[%s6226_s9 + $0x58] sm:$0xff] }
0x16b7   :  { %v5660_v10 = vpop.eup %5659  ;;  %4262 = vmatprep.mubr.f32.mxu0 %v4037_v24  ;;  %4185 = vmatmul.mubr.f32.gmra.mxu1 %v4034_v17  ;;  %v4029_v44 = vadd.f32 1.0, %v5658_v53  ;;  %v4403_v31 = vld [vmem:[%s6226_s9 + $0x50] sm:$0xff]  ;;  %v4402_v15 = vld [vmem:[%s6226_s9 + $0x48] sm:$0xff]  ;;  %v4401_v24 = vld [vmem:[%s6226_s9 + $0x40] sm:$0xff] }
0x16b8   :  { %v5662_v63 = vpop.eup %5661  ;;  %4263 = vmatmul.mubr.f32.gmra.mxu0 %v4036_v56  ;;  %v4039_v5 = vmul.f32 %v4027_v62, %v3943_v59  ;;  %v4026_v28 = vadd.f32 1.0, %v5660_v10  ;;  %5388 = vmatpush3.msra.mxu1 %v4304_v35  ;;  %v4400_v17 = vld [vmem:[%s6226_s9 + $0x38] sm:$0xff]  ;;  %v4399_v53 = vld [vmem:[%s6226_s9 + $0x30] sm:$0xff]  ;;  %v4398_v56 = vld [vmem:[%s6226_s9 + $0x28] sm:$0xff] }
0x16b9   :  { %v4041_v34 = vmul.f32 %v4029_v44, %v3945_v47  ;;  %v4028_v21 = vadd.f32 1.0, %v5662_v63  ;;  %5389 = vmatprep.subr.mxu1 %v6080_v0  ;;  %5404 = vmatprep.subr.mxu0 %v6080_v0  ;;  %v4397_v59 = vld [vmem:[%s6226_s9 + $0x20] sm:$0xff]  ;;  %v4396_v62 = vld [vmem:[%s6226_s9 + $0x18] sm:$0xff] }
0x16ba   :  { %4188 = vmatprep.mubr.f32.mxu1 %v4039_v5  ;;  %v4038_v16 = vmul.f32 %v4026_v28, %v3942_v46  ;;  %5390 = vmatpush3.msra.mxu1 %v4303_v38  ;;  %v4579_v5 = vld [vmem:[#allocation24] ss:$0 sm:$0xff]  ;;  %v4580_v28 = vld [vmem:[#allocation25] ss:$0 sm:$0xff] }
0x16bb   :  { %4266 = vmatprep.mubr.f32.mxu0 %v4041_v34  ;;  %v4040_v18 = vmul.f32 %v4028_v21, %v3944_v54  ;;  %5391 = vmatprep.subr.mxu1 %v6080_v0  ;;  %v4395_v21 = vld [vmem:[%s6226_s9 + $0x10] sm:$0xff] }
0x16bc   :  { %4189 = vmatmul.mubr.f32.gmra.mxu1 %v4038_v16  ;;  %5405 = vmatpush3.msra.mxu0 %v4407_v25  ;;  %v4394_v16 = vld [vmem:[%s6226_s9 + $0x8] sm:$0xff] }
0x16bd   :  { %4267 = vmatmul.mubr.f32.gmra.mxu0 %v4040_v18  ;;  %5399 = vmatprep.mubr.msk.f32.mxu1 %vm6082_vm0, %v6080_v0  ;;  %v4393_v18 = vld [vmem:[%s6226_s9] sm:$0xff] }
0x16be   :  { %5434 = vmatprep.mubr.msk.f32.mxu0 %vm6082_vm0, %v6080_v0  ;;  %5392 = vmatpush3.msra.mxu1 %v4302_v27 }
0x16bf   :  { %5393 = vmatprep.subr.mxu1 %v6080_v0  ;;  %5406 = vmatprep.subr.mxu0 %v6080_v0 }
0x16c0   :  { %5394 = vmatpush3.msra.mxu1 %v4301_v40  ;;  %5407 = vmatpush3.msra.mxu0 %v4406_v20 }
0x16c1   :  { %5395 = vmatprep.subr.mxu1 %v6080_v0  ;;  %5408 = vmatprep.subr.mxu0 %v6080_v0 }
0x16c2   :  { %5396 = vmatpush3.msra.mxu1 %v4300_v51  ;;  %5409 = vmatpush3.msra.mxu0 %v4405_v1 }
0x16c3   :  { %5397 = vmatprep.subr.mxu1 %v6080_v0  ;;  %5410 = vmatprep.subr.mxu0 %v6080_v0 }
0x16c4   :  { %5398 = vmatpush3.msra.mxu1 %v4299_v42  ;;  %5411 = vmatpush3.msra.mxu0 %v4404_v6 }
0x16c5   :  { %5412 = vmatprep.subr.mxu0 %v6080_v0 }
0x16c6   :  { %5413 = vmatpush3.msra.mxu0 %v4403_v31 }
0x16c7   :  { %5414 = vmatprep.subr.mxu0 %v6080_v0 }
0x16c8   :  { %5415 = vmatpush3.msra.mxu0 %v4402_v15 }
0x16c9   :  { %5416 = vmatprep.subr.mxu0 %v6080_v0 }
0x16ca   :  { %5417 = vmatpush3.msra.mxu0 %v4401_v24 }
0x16cb   :  { %5418 = vmatprep.subr.mxu0 %v6080_v0 }
0x16cc   :  { %5419 = vmatpush3.msra.mxu0 %v4400_v17 }
0x16cd   :  { %5420 = vmatprep.subr.mxu0 %v6080_v0 }
0x16ce   :  { %5421 = vmatpush3.msra.mxu0 %v4399_v53 }
0x16cf   :  { %5422 = vmatprep.subr.mxu0 %v6080_v0 }
0x16d0   :  { %5423 = vmatpush3.msra.mxu0 %v4398_v56 }
0x16d1   :  { %5424 = vmatprep.subr.mxu0 %v6080_v0 }
0x16d2   :  { %5425 = vmatpush3.msra.mxu0 %v4397_v59 }
0x16d3   :  { %5426 = vmatprep.subr.mxu0 %v6080_v0 }
0x16d4   :  { %5427 = vmatpush3.msra.mxu0 %v4396_v62 }
0x16d5   :  { %5428 = vmatprep.subr.mxu0 %v6080_v0 }
0x16d6   :  { %5429 = vmatpush3.msra.mxu0 %v4395_v21 }
0x16d7   :  { %5430 = vmatprep.subr.mxu0 %v6080_v0 }
0x16d8   :  { %5431 = vmatpush3.msra.mxu0 %v4394_v16 }
0x16d9   :  { %v4872_v61 = vpop.f32.mrf.mxu1  ;;  %5432 = vmatprep.subr.mxu0 %v6080_v0 }
0x16da   :  { %v4913_v2 = vpop.f32.mrf.mxu0  ;;  %5433 = vmatpush3.msra.mxu0 %v4393_v18 }
0x16db   :  { %v4873_v50 = vpop.f32.mrf.mxu1 }
0x16dc   :  { %v4874_v8 = vadd.f32 %v4873_v50, %v4872_v61  ;;  %v4914_v37 = vpop.f32.mrf.mxu0  ;;  %v4581_v61 = vld [vmem:[#allocation27] ss:$0 sm:$0xff] }
0x16dd   :  { %v4915_v60 = vadd.f32 %v4914_v37, %v4913_v2  ;;  %v4582_v37 = vld [vmem:[%s6231_s19] ss:$0 sm:$0xff] }
0x16de   :  { %v4182_v48 = vadd.f32 %v4874_v8, %v4578_v52 }
0x16e0   :  { %v4260_v55 = vadd.f32 %v4915_v60, %v4182_v48 }
0x16e2   :  { %v4271_v3 = vadd.f32 %v4260_v55, %v7116_v11 }
0x16e4   :  { %4274 = vadd.xlane.f32.xlu1 %v4271_v3 }
0x176d   :  { %v4275_v9 = vpop.xlane.xlu1 %4274 }
0x176e   :  { %v4276_v11 = vmul.f32 0.0078125, %v4275_v9 }
0x1770   :  { %v7235_v43 = vsub.f32 %v4271_v3, %v4276_v11 }
0x1772   :  { %v4278_v22 = vmul.f32 %v7235_v43, %v7235_v43 }
0x1774   :  { %4279 = vadd.xlane.f32.xlu0 %v4278_v22 }
0x1777   :  { %v4875_v4 = vpop.f32.mrf.mxu1 }
0x1778   :  { %v4916_v7 = vpop.f32.mrf.mxu0 }
0x1779   :  { %v4876_v30 = vpop.f32.mrf.mxu1 }
0x177a   :  { %v4917_v39 = vpop.f32.mrf.mxu0 }
0x177c   :  { %v4878_v33 = vpop.f32.mrf.mxu1 }
0x177d   :  { %v4919_v23 = vpop.f32.mrf.mxu0 }
0x177e   :  { %v4879_v58 = vpop.f32.mrf.mxu1 }
0x177f   :  { %v4920_v12 = vpop.f32.mrf.mxu0 }
0x17fd   :  { %v4280_v10 = vpop.xlane.xlu0 %4279 }
0x17fe   :  { %v4281_v47 = vmul.f32 0.0078125, %v4280_v10 }
0x1800   :  { %v4282_v44 = vadd.f32 1e-05, %v4281_v47 }
0x1802   :  { %5663 = vrsqrt.f32 %v4282_v44 }
0x180f   :  { %v5664_v63 = vpop.eup %5663 }
0x1810   :  { %v4284_v46 = vmul.f32 %v5664_v63, %v7235_v43 }
0x1812   :  { %v4291_v34 = vmul.f32 %v4579_v5, %v4284_v46 }
0x1814   :  { %v4298_v54 = vadd.f32 %v4580_v28, %v4291_v34 }
0x1816   :  { %5400 = vmatmul.mubr.f32.vlgmr.msra.gmra.mxu1 %v4298_v54 }
0x18d6   :  { %v4388_v2 = vpop.f32.mrf.mxu1 }
0x18d7   :  { %v4389_v52 = vadd.f32 %v4581_v61, %v4388_v2 }
0x18d8   :  { %v5401_v50 = vpop.f32.mrf.mxu1 }
0x18d9   :  { %v4392_v8 = vmax.f32 %v4389_v52, 0.0 }
0x18db   :  { %5435 = vmatmul.mubr.f32.vlgmr.msra.gmra.mxu0 %v4392_v8 }
0x199b   :  { %v4482_v48 = vpop.f32.mrf.mxu0 }
0x199c   :  { %v4483_v60 = vadd.f32 %v4582_v37, %v4482_v48 }
0x199d   :  { %v5436_v55 = vpop.f32.mrf.mxu0 }
0x199e   :  { %4487 = vst.msk [vmem:[%s6236_s5] sm:$0xff] %vm4486_vm12, %v4483_v60 }
0x199f   :  { %4492 = vsyncpa [#allocation3], 1 }
0x19a0   :  { %4493 = vsyncpa [#allocation5], 1 }
0x19a1   :  { %4494 = vsyncpa [#allocation8], 1 }
0x19a2   :  { %4495 = vsyncpa [#allocation11], 1 }
0x19a3   :  { %4496 = vsyncpa [#allocation14], 1 }
0x19a4   :  { %4497 = vsyncpa [#allocation17], 1 }
0x19a5   :  { %4498 = vsyncpa [#allocation20], 1 }
0x19a6   :  { %4499 = vsyncpa [#allocation23], 1 }
0x19a7   :  { %4500 = vsyncpa [#allocation26], 1 }

</bundles_post_ra>
